<compile_context>
chip_gen: v7x
topology: tpu7x:2x2x1
jax: 0.10.0
libtpu: 0.0.40
codegen_flags: <defaults>
</compile_context>

<pallas_src>
import functools

import jax
import jax.numpy as jnp
from jax import lax
from jax.experimental import pallas as pl
from jax.experimental.pallas import tpu as pltpu

BN_EPS = 1e-5
TK_CAP = 512   # K-tile cap; bf16 double-buffered footprint << scoped VMEM on all gens


def _round_up(x, m):
    return (x + m - 1) // m * m


def _pick_tk(kp):
    """Largest multiple of 128 <= TK_CAP that divides kp (kp % 128 == 0)."""
    best = 128
    t = 256
    while t <= TK_CAP:
        if kp % t == 0:
            best = t
        t += 128
    return best


def _pick_tn(np_):
    """256-wide N tiles only when that still leaves >=2 N-blocks (v7x megacore)."""
    return 256 if (np_ % 256 == 0 and np_ >= 512) else 128


# ---------------------------------------------------------------------------
# Pallas kernel: tiled bf16 matmul, f32 accumulate.  BN scale is pre-folded
# into the weights, so the epilogue is acc + bias (+ residual) (+ ReLU).
# Used for every conv (via im2col) and the fc layer.
# ---------------------------------------------------------------------------
def _mm_kernel(*refs, relu, has_resid):
    if has_resid:
        a_ref, b_ref, c_ref, r_ref, o_ref, acc_ref = refs
    else:
        a_ref, b_ref, c_ref, o_ref, acc_ref = refs
        r_ref = None

    k = pl.program_id(2)

    @pl.when(k == 0)
    def _():
        acc_ref[...] = jnp.zeros_like(acc_ref)

    acc_ref[...] += jnp.dot(a_ref[...], b_ref[...],
                            preferred_element_type=jnp.float32)

    @pl.when(k == pl.num_programs(2) - 1)
    def _():
        y = acc_ref[...] + c_ref[...]
        if has_resid:
            y = y + r_ref[...].astype(jnp.float32)   # residual added only once
        if relu:
            y = jnp.maximum(y, 0.0)
        o_ref[...] = y.astype(o_ref.dtype)


def _matmul_fused(a, b, c, resid, *, relu, out_dtype):
    """(M,Kp)bf16 @ (Kp,Np)bf16 + c[Np] (+resid) (+ReLU) -> (M, Np) lane-dense."""
    M, Kp = a.shape
    Kp2, Np = b.shape
    assert Kp == Kp2
    TM = min(256, _round_up(M, 16))          # bf16 sublane tile = 16; no 128-pad of M
    TN = _pick_tn(Np)
    TK = _pick_tk(Kp)
    # N (Cout) axis leads: largest parallel axis -> useful megacore sharding.
    grid = (Np // TN, pl.cdiv(M, TM), Kp // TK)

    in_specs = [
        pl.BlockSpec((TM, TK), lambda j, i, k: (i, k)),
        pl.BlockSpec((TK, TN), lambda j, i, k: (k, j)),
        pl.BlockSpec((1, TN), lambda j, i, k: (0, j)),
    ]
    args = [a, b, c]
    has_resid = resid is not None
    if has_resid:
        in_specs.append(pl.BlockSpec((TM, TN), lambda j, i, k: (i, j)))
        args.append(resid)

    out = pl.pallas_call(
        functools.partial(_mm_kernel, relu=relu, has_resid=has_resid),
        out_shape=jax.ShapeDtypeStruct((M, Np), out_dtype),
        grid_spec=pltpu.PrefetchScalarGridSpec(
            num_scalar_prefetch=0,
            grid=grid,
            in_specs=in_specs,
            out_specs=pl.BlockSpec((TM, TN), lambda j, i, k: (i, j)),
            scratch_shapes=[pltpu.VMEM((TM, TN), jnp.float32)],
        ),
        compiler_params=pltpu.CompilerParams(
            dimension_semantics=("parallel", "parallel", "arbitrary")),
    )(*args)
    return out


# ---------------------------------------------------------------------------
# Convolution = im2col (plain-JAX glue, fused inside the single outer jit) +
# Pallas matmul with folded BN + optional residual + ReLU epilogue.
# Activations carry zero-padded channels (stored Cin = round_up(Cout,128) of
# the producer), so no per-call K-padding of A except the 3-channel stem.
# ---------------------------------------------------------------------------
def conv2d_bn(x, w_p, c_p, resid, *, kh, kw, stride, padding, relu,
              out_dtype=jnp.bfloat16):
    # x: (N,H,W,Cs) bf16   w_p: (Kp, Np) bf16 (BN scale folded)   c_p: (1, Np) f32
    Nb, H, W, Cs = x.shape
    Ho = (H + 2 * padding - kh) // stride + 1
    Wo = (W + 2 * padding - kw) // stride + 1
    xp = jnp.pad(x, ((0, 0), (padding, padding), (padding, padding), (0, 0))) \
        if padding else x
    if kh == 1 and kw == 1 and stride == 1:
        patches = xp
    else:
        cols = [xp[:, i:i + stride * Ho:stride, j:j + stride * Wo:stride, :]
                for i in range(kh) for j in range(kw)]
        patches = jnp.concatenate(cols, axis=-1)     # (N,Ho,Wo,kh*kw*Cs)
    K = kh * kw * Cs
    Kp, Np = w_p.shape
    A = patches.reshape(Nb * Ho * Wo, K)
    if Kp > K:
        A = jnp.pad(A, ((0, 0), (0, Kp - K)))        # only the stem (147 -> 256)
    r = None if resid is None else resid.reshape(Nb * Ho * Wo, Np)
    y = _matmul_fused(A, w_p, c_p, r, relu=relu, out_dtype=out_dtype)
    return y.reshape(Nb, Ho, Wo, Np)


# ---------------------------------------------------------------------------
# Pallas kernel: STAR shape blend as a VPU reduction (no MXU padding).
#   v_shaped_flat = v_template_flat + sum_k betas[k] * shapedirs_t[k, :]
# Constant inputs -> computed once at __init__ and cached.
# ---------------------------------------------------------------------------
def _star_kernel(sd_ref, b_ref, vt_ref, o_ref):
    offs = jnp.sum(sd_ref[...] * b_ref[...], axis=0, keepdims=True)
    o_ref[...] = vt_ref[...] + offs


@jax.jit
def star_v_shaped(betas, v_template_flat, shapedirs_t):
    nb, L = shapedirs_t.shape
    out = pl.pallas_call(
        _star_kernel,
        out_shape=jax.ShapeDtypeStruct((1, L), jnp.float32),
        in_specs=[pl.BlockSpec(memory_space=pltpu.MemorySpace.VMEM)] * 3,
        out_specs=pl.BlockSpec(memory_space=pltpu.MemorySpace.VMEM),
    )(shapedirs_t, betas.reshape(nb, 1), v_template_flat)
    return out.reshape(-1, 3)


# ---------------------------------------------------------------------------
# Deterministic synthetic parameters: weights are reshaped to (K, Cout) with
# the *stored* (channel-padded) Cin layout, BN scale folded in (f32), then
# K/N-padded to multiples of 128 and cast to bf16 ONCE here.
# ---------------------------------------------------------------------------
def init_bn(key, c):
    k1, k2 = jax.random.split(key)
    gamma = 1.0 + 0.05 * jax.random.normal(k1, (c,), jnp.float32)
    beta = 0.05 * jax.random.normal(k2, (c,), jnp.float32)
    mean = jnp.zeros((c,), jnp.float32)
    var = jnp.ones((c,), jnp.float32)
    scale = gamma / jnp.sqrt(var + BN_EPS)
    bias = beta - mean * scale
    return scale, bias


def make_conv_bn(key, kh, kw, cin, cout, cin_stored=None):
    if cin_stored is None:
        cin_stored = cin
    kw_key, kbn = jax.random.split(key)
    fan_in = kh * kw * cin
    w = jax.random.normal(kw_key, (kh, kw, cin, cout), jnp.float32) * \
        (1.4 / fan_in) ** 0.5
    scale, bias = init_bn(kbn, cout)
    w = w * scale[None, None, None, :]                 # fold BN scale (f32)
    K = kh * kw * cin_stored
    Kp, Np = _round_up(K, 128), _round_up(cout, 128)
    w_full = jnp.zeros((kh, kw, cin_stored, cout), jnp.float32)
    w_full = w_full.at[:, :, :cin, :].set(w)           # zero rows for padded Cin
    w2 = w_full.reshape(K, cout).astype(jnp.bfloat16)
    return {
        "w": jnp.zeros((Kp, Np), jnp.bfloat16).at[:K, :cout].set(w2),
        "c": jnp.zeros((1, Np), jnp.float32).at[0, :cout].set(bias),
    }


RESNET50_CFG = [(64, 3, 1), (128, 4, 2), (256, 6, 2), (512, 3, 2)]


def make_resnet50_params(key):
    keys = jax.random.split(key, 3)
    params = {"stem": make_conv_bn(keys[0], 7, 7, 3, 64)}
    layers = []
    inplanes = 64
    inplanes_stored = _round_up(64, 128)      # stem output is channel-padded to 128
    bcount = 0
    for planes, nblocks, _ in RESNET50_CFG:
        blocks = []
        planes_stored = _round_up(planes, 128)
        for b in range(nblocks):
            bkey = jax.random.fold_in(keys[1], bcount)
            bcount += 1
            ks = jax.random.split(bkey, 4)
            blk = {
                "conv1": make_conv_bn(ks[0], 1, 1, inplanes, planes, inplanes_stored),
                "conv2": make_conv_bn(ks[1], 3, 3, planes, planes, planes_stored),
                "conv3": make_conv_bn(ks[2], 1, 1, planes, planes * 4, planes_stored),
            }
            if b == 0:
                blk["down"] = make_conv_bn(ks[3], 1, 1, inplanes, planes * 4,
                                           inplanes_stored)
            blocks.append(blk)
            inplanes = planes * 4
            inplanes_stored = _round_up(inplanes, 128)
        layers.append(blocks)
    params["layers"] = layers

    kfc_w, kfc_b = jax.random.split(keys[2])
    fc_w = jax.random.normal(kfc_w, (2048, 1000), jnp.float32) * (1.0 / 2048) ** 0.5
    fc_b = 0.01 * jax.random.normal(kfc_b, (1000,), jnp.float32)
    Np = _round_up(1000, 128)
    params["fc"] = {
        "w": jnp.zeros((2048, Np), jnp.bfloat16).at[:, :1000].set(
            fc_w.astype(jnp.bfloat16)),
        "c": jnp.zeros((1, Np), jnp.float32).at[0, :1000].set(fc_b),
    }
    return params


# ---------------------------------------------------------------------------
# ResNet-50 forward (feature extractor) — ONE outer jit, residual add+ReLU
# fused into conv3's matmul epilogue.
# ---------------------------------------------------------------------------
def bottleneck_forward(x, bp, stride, downsample):
    if downsample:
        d = bp["down"]
        identity = conv2d_bn(x, d["w"], d["c"], None,
                             kh=1, kw=1, stride=stride, padding=0, relu=False)
    else:
        identity = x
    c1, c2, c3 = bp["conv1"], bp["conv2"], bp["conv3"]
    out = conv2d_bn(x, c1["w"], c1["c"], None,
                    kh=1, kw=1, stride=1, padding=0, relu=True)
    out = conv2d_bn(out, c2["w"], c2["c"], None,
                    kh=3, kw=3, stride=stride, padding=1, relu=True)
    out = conv2d_bn(out, c3["w"], c3["c"], identity,
                    kh=1, kw=1, stride=1, padding=0, relu=True)
    return out


@jax.jit
def van_resnet_forward(x_nchw, params):
    x = jnp.transpose(x_nchw, (0, 2, 3, 1)).astype(jnp.bfloat16)   # NCHW -> NHWC bf16
    st = params["stem"]
    x = conv2d_bn(x, st["w"], st["c"], None,
                  kh=7, kw=7, stride=2, padding=3, relu=True)
    # 3x3/2 max-pool kept as plain-JAX glue (tiny reduction, fused in the jit).
    x = lax.reduce_window(x, jnp.array(-jnp.inf, dtype=x.dtype), lax.max,
                          (1, 3, 3, 1), (1, 2, 2, 1),
                          ((0, 0), (1, 1), (1, 1), (0, 0)))
    for (_, _, stride), layer in zip(RESNET50_CFG, params["layers"]):
        for b, bp in enumerate(layer):
            s = stride if b == 0 else 1
            x = bottleneck_forward(x, bp, s, downsample=(b == 0))
    fc = params["fc"]
    feat = jnp.mean(x.astype(jnp.float32), axis=(1, 2))            # global avg pool
    logits = _matmul_fused(feat.astype(jnp.bfloat16), fc["w"], fc["c"], None,
                           relu=False, out_dtype=jnp.float32)
    return logits[:, :1000]                                        # drop padded cols


# ---------------------------------------------------------------------------
# VAN module (Pallas version)
# TODO(synk): full STAR LBS (pose blendshapes, joint regression, skinning) is
# not implemented — VAN.forward only reads model.v_shaped (poses/trans are 0).
# ---------------------------------------------------------------------------
class VANPallas:
    def __init__(self, key):
        k1, k2, k3 = jax.random.split(key, 3)
        self.num_betas = 10
        self.batch_size = 1
        self.resnet_params = make_resnet50_params(k1)
        # synthetic STAR(neutral) template & shape dirs (true vertex count 6890)
        self.num_verts = 6890
        v_template = 0.1 * jax.random.normal(
            k2, (self.num_verts, 3), jnp.float32)
        shapedirs = 0.01 * jax.random.normal(
            k3, (self.num_verts, 3, self.num_betas), jnp.float32)
        v_template_flat = v_template.reshape(1, self.num_verts * 3)
        shapedirs_t = jnp.transpose(shapedirs, (2, 0, 1)).reshape(
            self.num_betas, self.num_verts * 3)
        self.betas = jnp.array([[2.25176191, -3.7883464, 0.46747496,
                                 3.89178988, 2.20098416, 0.26102114,
                                 -3.07428093, 0.55708514, -3.94442258,
                                 -2.88552087]], jnp.float32)
        # betas / template / shapedirs are constants -> blend once and cache.
        self.v_shaped = star_v_shaped(self.betas, v_template_flat, shapedirs_t)

    def forward(self, x):
        features = van_resnet_forward(x, self.resnet_params)
        shaped = self.v_shaped          # == model.v_shaped[-1, :, :] (batch 1)
        # Original PyTorch forward ends with `pass` (returns None); we return
        # the computed tensors so they can be materialized.
        return features, shaped


if __name__ == "__main__":
    key = jax.random.PRNGKey(0)
    k_param, k_x = jax.random.split(key)
    van = VANPallas(k_param)
    x = jax.random.normal(k_x, (1, 3, 64, 64), jnp.float32)   # NCHW input
    features, shaped = van.forward(x)
    jax.block_until_ready((features, shaped))
    assert features.shape == (1, 1000)
    assert shaped.shape == (van.num_verts, 3)
    print("KERNEL_OK")
</pallas_src>

<mosaic_0001>
module attributes {stable_mosaic.version = 11 : i64} {
  func.func @_star_kernel(%arg0: memref<10x20670xf32, #tpu.memory_space<vmem>>, %arg1: memref<10x1xf32, #tpu.memory_space<vmem>>, %arg2: memref<1x20670xf32, #tpu.memory_space<vmem>>, %arg3: memref<1x20670xf32, #tpu.memory_space<vmem>>) attributes {dimension_semantics = [], scalar_prefetch = 0 : i64, scratch_operands = 0 : i64, tpu.core_type = #tpu.core_type<tc>} {
    %c0 = arith.constant 0 : index
    %c0_0 = arith.constant 0 : index
    %0 = vector.load %arg0[%c0, %c0_0] : memref<10x20670xf32, #tpu.memory_space<vmem>>, vector<10x20670xf32>
    %c0_1 = arith.constant 0 : index
    %c0_2 = arith.constant 0 : index
    %1 = vector.load %arg1[%c0_1, %c0_2] : memref<10x1xf32, #tpu.memory_space<vmem>>, vector<10x1xf32>
    %2 = vector.broadcast %1 : vector<10x1xf32> to vector<10x20670xf32>
    %3 = arith.mulf %0, %2 : vector<10x20670xf32>
    %cst = arith.constant dense<0.000000e+00> : vector<20670xf32>
    %4 = vector.multi_reduction <add>, %3, %cst [0] : vector<10x20670xf32> to vector<20670xf32>
    %5 = vector.shape_cast %4 : vector<20670xf32> to vector<1x20670xf32>
    %c0_3 = arith.constant 0 : index
    %c0_4 = arith.constant 0 : index
    %6 = vector.load %arg2[%c0_3, %c0_4] : memref<1x20670xf32, #tpu.memory_space<vmem>>, vector<1x20670xf32>
    %7 = arith.addf %6, %5 : vector<1x20670xf32>
    %c0_5 = arith.constant 0 : index
    %c0_6 = arith.constant 0 : index
    %8 = vector.load %arg3[%c0_5, %c0_6] : memref<1x20670xf32, #tpu.memory_space<vmem>>, vector<1x20670xf32>
    tpu.vector_store %arg3[%c0_5, %c0_6], %7 {strides = array<i32>} : memref<1x20670xf32, #tpu.memory_space<vmem>>, vector<1x20670xf32>,
    return
  }
}

</mosaic_0001>

<bundles_post_ra>
// kernel: star_v_shaped.1
= control target key start
LH: loop header
LB: loop body
LE: loop exit
PB: predicated region body
PF: predicated region fallthrough
CT: control target
= control target key end

     0   :  { %8 = vsyncpa [#allocation3], 0  ;;  %s5657_s0 = inlined_call_operand.hbm [shape: f32[10,20670], index: 0, kind: input, shape index: {}]   ;;  %s5658_s1 = inlined_call_operand.vmem [shape: f32[10,1], index: 1, kind: input, shape index: {}]   ;;  %s5659_s2 = inlined_call_operand.hbm [shape: f32[1,20670], index: 2, kind: input, shape index: {}]   ;;  %s5660_s3 = inlined_call_operand.vmem [shape: f32[1,20670], index: 3, kind: output, shape index: {}]  }
   0x1   :  { %9 = vsyncpa [#allocation5], 0  ;;  %s3306_s12 = smov [#allocation2]   ;;  %s3258_s16 = scalar_lea.hbm %s5657_s0, 41472 }
   0x2   :  { %s15_s13 = sshll.u32 %s3306_s12, 4  ;;  %p3259_p0 = scmp.ne.s32.totalorder %s5657_s0, %s3258_s16  ;;  %s16_s13 = int_to_ptr.vmem [resolvable:$true] %s15_s13 }
   0x3   :  { %p3262_p1 = scmp.lt.u32.totalorder %s3258_s16, %s5657_s0 }
   0x5   :  { %p3264_p2 = pnand %p3262_p1, %p3259_p0 }
   0x7   :  { %3267 = shalt.err (!%p3264_p2)
}
   0x8   :  { %s3268_s21 = scalar_lea.vmem %s16_s13, 41472  ;;  %p3273_p4 = scmp.lt.s32.totalorder %s16_s13, %s16_s13 }
   0x9   :  { %p3269_p3 = scmp.ne.s32.totalorder %s16_s13, %s3268_s21  ;;  %p3274_p5 = scmp.lt.s32.totalorder %s3268_s21, %s3268_s21 }
   0xb   :  { %p3275_p6 = por %p3274_p5, %p3273_p4 }
   0xd   :  { %p3276_p7 = pnand %p3275_p6, %p3269_p3 }
   0xf   :  { %3279 = shalt.err (!%p3276_p7)
}
  0x10   :  { %s3307_s22 = smov 20736   ;;  %s3308_s23 = smov 1296  }
  0x11   :  { %21 = dma.hbm_to_vmem [thread:$0]  %s5657_s0, 41472, %s16_s13, [#allocation3], %s3307_s22, %s3307_s22, %s3308_s23  }
  0x12   :  { %s3309_s26 = smov [#allocation4]   ;;  %s3280_s30 = scalar_lea.hbm %s5659_s2, 2592 }
  0x13   :  { %s30_s27 = sshll.u32 %s3309_s26, 4  ;;  %p3281_p8 = scmp.ne.s32.totalorder %s5659_s2, %s3280_s30  ;;  %s31_s27 = int_to_ptr.vmem [resolvable:$true] %s30_s27 }
  0x14   :  { %p3284_p9 = scmp.lt.u32.totalorder %s3280_s30, %s5659_s2 }
  0x16   :  { %p3286_p10 = pnand %p3284_p9, %p3281_p8 }
  0x18   :  { %3289 = shalt.err (!%p3286_p10)
}
  0x19   :  { %s3290_s8 = scalar_lea.vmem %s31_s27, 2592  ;;  %p3295_p12 = scmp.lt.s32.totalorder %s31_s27, %s31_s27 }
  0x1a   :  { %p3291_p11 = scmp.ne.s32.totalorder %s31_s27, %s3290_s8  ;;  %p3296_p13 = scmp.lt.s32.totalorder %s3290_s8, %s3290_s8 }
  0x1c   :  { %p3297_p0 = por %p3296_p13, %p3295_p12 }
  0x1e   :  { %p3298_p1 = pnand %p3297_p0, %p3291_p11 }
  0x20   :  { %3301 = shalt.err (!%p3298_p1)
}
  0x21   :  { %33 = dma.hbm_to_vmem [thread:$0]  %s5659_s2, 2592, %s31_s27, [#allocation5]  }
  0x22   :  { %3302 = dma.done.wait [#allocation3], 41472  }
  0x23   :  { %3303 = vsyncadd [#allocation3], 4294925824 }
  0x24   :  { %3304 = dma.done.wait [#allocation5], 2592  }
  0x25   :  { %3305 = vsyncadd [#allocation5], 4294964704  ;;  %v3310_v0 = vmov 0   ;;  %v365_v1 = vld [vmem:[%s5658_s1 + $0x8] sm:$0x3]  ;;  %v364_v2 = vld [vmem:[%s5658_s1] sm:$0xff] }
  0x26   :  { %3257 = vset.pattern.permute.xlu0 %v3310_v0  ;;  %v202_v3 = vld [vmem:[#allocation2 + $0x510] sm:$0x3]  ;;  %v203_v4 = vld [vmem:[#allocation2 + $0x518] sm:$0x3]  ;;  %v204_v5 = vld [vmem:[#allocation2 + $0x520] sm:$0x3] }
  0x27   :  { %373 = vperm.xlu0 %3257, %v365_v1   ;;  %v205_v6 = vld [vmem:[#allocation2 + $0x528] sm:$0x3]  ;;  %v206_v7 = vld [vmem:[#allocation2 + $0x530] sm:$0x3]  ;;  %v207_v8 = vld [vmem:[#allocation2 + $0x538] sm:$0x3] }
  0x28   :  { %v208_v9 = vld [vmem:[#allocation2 + $0x540] sm:$0x3]  ;;  %v209_v10 = vld [vmem:[#allocation2 + $0x548] sm:$0x3]  ;;  %v210_v11 = vld [vmem:[#allocation2 + $0x550] sm:$0x3] }
  0x29   :  { %v211_v12 = vld [vmem:[#allocation2 + $0x558] sm:$0x3]  ;;  %v40_v14 = vld [vmem:[#allocation2] sm:$0xff]  ;;  %v41_v15 = vld [vmem:[#allocation2 + $0x8] sm:$0xff]  ;;  %vm700_vm0 = vcmask 1041408   ;;  %vm1989_vm1 = vcmask 506880  }
  0x2a   :  { %v42_v16 = vld [vmem:[#allocation2 + $0x10] sm:$0xff]  ;;  %v43_v17 = vld [vmem:[#allocation2 + $0x18] sm:$0xff]  ;;  %v212_v18 = vld [vmem:[#allocation2 + $0x560] sm:$0x3]  ;;  %vm1991_vm2 = vcmask 500736  }
  0x2b   :  { %368 = vperm.xlu0 %3257, %v364_v2   ;;  %v213_v19 = vld [vmem:[#allocation2 + $0x568] sm:$0x3]  ;;  %v214_v20 = vld [vmem:[#allocation2 + $0x570] sm:$0x3]  ;;  %v44_v21 = vld [vmem:[#allocation2 + $0x20] sm:$0xff] }
  0x2c   :  { %v45_v22 = vld [vmem:[#allocation2 + $0x28] sm:$0xff]  ;;  %v46_v23 = vld [vmem:[#allocation2 + $0x30] sm:$0xff]  ;;  %v47_v24 = vld [vmem:[#allocation2 + $0x38] sm:$0xff] }
  0x2d   :  { %v215_v25 = vld [vmem:[#allocation2 + $0x578] sm:$0x3]  ;;  %v216_v26 = vld [vmem:[#allocation2 + $0x580] sm:$0x3]  ;;  %v217_v27 = vld [vmem:[#allocation2 + $0x588] sm:$0x3] }
  0x2e   :  { %v48_v32 = vld [vmem:[#allocation2 + $0x40] sm:$0xff]  ;;  %v49_v33 = vld [vmem:[#allocation2 + $0x48] sm:$0xff]  ;;  %v50_v34 = vld [vmem:[#allocation2 + $0x50] sm:$0xff] }
  0x2f   :  { %v51_v35 = vld [vmem:[#allocation2 + $0x58] sm:$0xff]  ;;  %v52_v40 = vld [vmem:[#allocation2 + $0x60] sm:$0xff]  ;;  %v53_v41 = vld [vmem:[#allocation2 + $0x68] sm:$0xff] }
  0x30   :  { %v54_v42 = vld [vmem:[#allocation2 + $0x70] sm:$0xff]  ;;  %v55_v43 = vld [vmem:[#allocation2 + $0x78] sm:$0xff]  ;;  %v56_v49 = vld [vmem:[#allocation2 + $0x80] sm:$0xff] }
  0x31   :  { %v57_v50 = vld [vmem:[#allocation2 + $0x88] sm:$0xff]  ;;  %v58_v51 = vld [vmem:[#allocation2 + $0x90] sm:$0xff]  ;;  %v59_v52 = vld [vmem:[#allocation2 + $0x98] sm:$0xff] }
  0x32   :  { %v60_v57 = vld [vmem:[#allocation2 + $0xa0] sm:$0xff]  ;;  %v61_v58 = vld [vmem:[#allocation2 + $0xa8] sm:$0xff]  ;;  %v62_v59 = vld [vmem:[#allocation2 + $0xb0] sm:$0xff] }
  0x33   :  { %v63_v60 = vld [vmem:[#allocation2 + $0xb8] sm:$0xff]  ;;  %v64_v1 = vld [vmem:[#allocation2 + $0xc0] sm:$0xff]  ;;  %v65_v2 = vld [vmem:[#allocation2 + $0xc8] sm:$0xff] }
  0xa6   :  { %v3362_v13 = vpop.permute.xlu0 %373 }
  0xa7   :  { %v3365_v28 = vmul.f32 %v3362_v13, %v202_v3  ;;  %v3368_v29 = vmul.f32 %v3362_v13, %v203_v4  ;;  %v3371_v30 = vmul.f32 %v3362_v13, %v204_v5  ;;  %v3374_v31 = vmul.f32 %v3362_v13, %v205_v6  ;;  %v66_v3 = vld [vmem:[#allocation2 + $0xd0] sm:$0xff]  ;;  %v67_v4 = vld [vmem:[#allocation2 + $0xd8] sm:$0xff] }
  0xa8   :  { %v3377_v36 = vmul.f32 %v3362_v13, %v206_v7  ;;  %v3380_v37 = vmul.f32 %v3362_v13, %v207_v8  ;;  %v3383_v38 = vmul.f32 %v3362_v13, %v208_v9  ;;  %v3386_v39 = vmul.f32 %v3362_v13, %v209_v10  ;;  %v68_v9 = vld [vmem:[#allocation2 + $0xe0] sm:$0xff]  ;;  %v69_v10 = vld [vmem:[#allocation2 + $0xe8] sm:$0xff] }
  0xa9   :  { %v3389_v44 = vmul.f32 %v3362_v13, %v210_v11  ;;  %v3392_v45 = vmul.f32 %v3362_v13, %v211_v12  ;;  %v3395_v46 = vmul.f32 %v3362_v13, %v212_v18  ;;  %v3398_v47 = vmul.f32 %v3362_v13, %v213_v19  ;;  %v70_v11 = vld [vmem:[#allocation2 + $0xf0] sm:$0xff]  ;;  %v71_v12 = vld [vmem:[#allocation2 + $0xf8] sm:$0xff]  ;;  %v72_v18 = vld [vmem:[#allocation2 + $0x100] sm:$0xff] }
  0xaa   :  { %v3400_v48 = vpop.permute.xlu0 %368  ;;  %v3403_v53 = vmul.f32 %v3362_v13, %v214_v20  ;;  %v3406_v54 = vmul.f32 %v3362_v13, %v215_v25  ;;  %v3409_v55 = vmul.f32 %v3362_v13, %v216_v26  ;;  %v3412_v56 = vmul.f32 %v3362_v13, %v217_v27  ;;  %v73_v19 = vld [vmem:[#allocation2 + $0x108] sm:$0xff]  ;;  %v74_v20 = vld [vmem:[#allocation2 + $0x110] sm:$0xff]  ;;  %v76_v26 = vld [vmem:[#allocation2 + $0x120] sm:$0xff] }
  0xab   :  { %v3415_v61 = vmul.f32 %v3400_v48, %v40_v14  ;;  %v3418_v62 = vmul.f32 %v3400_v48, %v41_v15  ;;  %v3421_v63 = vmul.f32 %v3400_v48, %v42_v16  ;;  %v3424_v0 = vmul.f32 %v3400_v48, %v43_v17  ;;  %v77_v27 = vld [vmem:[#allocation2 + $0x128] sm:$0xff] }
  0xac   :  { %v3427_v5 = vmul.f32 %v3400_v48, %v44_v21  ;;  %v3430_v6 = vmul.f32 %v3400_v48, %v45_v22  ;;  %v3433_v7 = vmul.f32 %v3400_v48, %v46_v23  ;;  %v3436_v8 = vmul.f32 %v3400_v48, %v47_v24  ;;  %v75_v21 = vld [vmem:[#allocation2 + $0x118] sm:$0xff] }
  0xad   :  { %v3439_v14 = vmul.f32 %v3400_v48, %v48_v32  ;;  %v3442_v15 = vmul.f32 %v3400_v48, %v49_v33  ;;  %v3445_v16 = vmul.f32 %v3400_v48, %v50_v34  ;;  %v3448_v17 = vmul.f32 %v3400_v48, %v51_v35  ;;  %v78_v32 = vld [vmem:[#allocation2 + $0x130] sm:$0xff]  ;;  %v79_v33 = vld [vmem:[#allocation2 + $0x138] sm:$0xff] }
  0xae   :  { %v3451_v22 = vmul.f32 %v3400_v48, %v52_v40  ;;  %v3454_v23 = vmul.f32 %v3400_v48, %v53_v41  ;;  %v3457_v24 = vmul.f32 %v3400_v48, %v54_v42  ;;  %v3460_v25 = vmul.f32 %v3400_v48, %v55_v43  ;;  %v80_v42 = vld [vmem:[#allocation2 + $0x140] sm:$0xff]  ;;  %v82_v43 = vld [vmem:[#allocation2 + $0x150] sm:$0xff] }
  0xaf   :  { %v3463_v34 = vmul.f32 %v3400_v48, %v56_v49  ;;  %v3466_v35 = vmul.f32 %v3400_v48, %v57_v50  ;;  %v3469_v40 = vmul.f32 %v3400_v48, %v58_v51  ;;  %v3472_v41 = vmul.f32 %v3400_v48, %v59_v52  ;;  %v84_v51 = vld [vmem:[#allocation2 + $0x160] sm:$0xff]  ;;  %v86_v52 = vld [vmem:[#allocation2 + $0x170] sm:$0xff] }
  0xb0   :  { %5665 = vst [vmem:[#allocation8_spill] sm:$0xff] %v3451_v22  ;;  %5666 = vst [vmem:[#allocation9_spill] sm:$0xff] %v3454_v23  ;;  %v3475_v23 = vmul.f32 %v3400_v48, %v60_v57  ;;  %v3478_v22 = vmul.f32 %v3400_v48, %v61_v58  ;;  %v3481_v49 = vmul.f32 %v3400_v48, %v62_v59  ;;  %v88_v59 = vld [vmem:[#allocation2 + $0x180] sm:$0xff] }
  0xb1   :  { %5667 = vst [vmem:[#allocation10_spill] sm:$0xff] %v3457_v24  ;;  %5668 = vst [vmem:[#allocation11_spill] sm:$0xff] %v3460_v25  ;;  %v81_v24 = vld [vmem:[#allocation2 + $0x148] sm:$0xff]  ;;  %v83_v25 = vld [vmem:[#allocation2 + $0x158] sm:$0xff]  ;;  %v3484_v50 = vmul.f32 %v3400_v48, %v63_v60  ;;  %v3493_v57 = vmul.f32 %v3400_v48, %v66_v3  ;;  %v3496_v58 = vmul.f32 %v3400_v48, %v67_v4 }
  0xb2   :  { %5669 = vst [vmem:[#allocation12_spill] sm:$0xff] %v3463_v34  ;;  %5670 = vst [vmem:[#allocation13_spill] sm:$0xff] %v3466_v35  ;;  %v3487_v35 = vmul.f32 %v3400_v48, %v64_v1  ;;  %v3490_v34 = vmul.f32 %v3400_v48, %v65_v2  ;;  %v90_v60 = vld [vmem:[#allocation2 + $0x190] sm:$0xff]  ;;  %v3505_v1 = vmul.f32 %v3400_v48, %v70_v11  ;;  %v92_v3 = vld [vmem:[#allocation2 + $0x1a0] sm:$0xff] }
  0xb3   :  { %5671 = vst [vmem:[#allocation14_spill] sm:$0xff] %v3469_v40  ;;  %5672 = vst [vmem:[#allocation15_spill] sm:$0xff] %v3472_v41  ;;  %v85_v40 = vld [vmem:[#allocation2 + $0x168] sm:$0xff]  ;;  %v87_v41 = vld [vmem:[#allocation2 + $0x178] sm:$0xff]  ;;  %v3508_v2 = vmul.f32 %v3400_v48, %v71_v12 }
  0xb4   :  { %5673 = vst [vmem:[#allocation16_spill] sm:$0xff] %v3475_v23  ;;  %5674 = vst [vmem:[#allocation17_spill] sm:$0xff] %v3478_v22  ;;  %v3499_v22 = vmul.f32 %v3400_v48, %v68_v9  ;;  %v3502_v23 = vmul.f32 %v3400_v48, %v69_v10  ;;  %v94_v4 = vld [vmem:[#allocation2 + $0x1b0] sm:$0xff]  ;;  %v3517_v9 = vmul.f32 %v3400_v48, %v74_v20  ;;  %v96_v11 = vld [vmem:[#allocation2 + $0x1c0] sm:$0xff] }
  0xb5   :  { %5675 = vst [vmem:[#allocation18_spill] sm:$0xff] %v3481_v49  ;;  %5676 = vst [vmem:[#allocation19_spill] sm:$0xff] %v3484_v50  ;;  %v89_v49 = vld [vmem:[#allocation2 + $0x188] sm:$0xff]  ;;  %v91_v50 = vld [vmem:[#allocation2 + $0x198] sm:$0xff]  ;;  %v3520_v10 = vmul.f32 %v3400_v48, %v75_v21 }
  0xb6   :  { %5677 = vst [vmem:[#allocation20_spill] sm:$0xff] %v3487_v35  ;;  %5678 = vst [vmem:[#allocation21_spill] sm:$0xff] %v3490_v34  ;;  %v3511_v34 = vmul.f32 %v3400_v48, %v72_v18  ;;  %v3514_v35 = vmul.f32 %v3400_v48, %v73_v19  ;;  %v98_v12 = vld [vmem:[#allocation2 + $0x1d0] sm:$0xff]  ;;  %v3529_v18 = vmul.f32 %v3400_v48, %v78_v32  ;;  %v100_v20 = vld [vmem:[#allocation2 + $0x1e0] sm:$0xff] }
  0xb7   :  { %5679 = vst [vmem:[#allocation22_spill] sm:$0xff] %v3493_v57  ;;  %5680 = vst [vmem:[#allocation23_spill] sm:$0xff] %v3496_v58  ;;  %v93_v57 = vld [vmem:[#allocation2 + $0x1a8] sm:$0xff]  ;;  %v95_v58 = vld [vmem:[#allocation2 + $0x1b8] sm:$0xff]  ;;  %v3532_v19 = vmul.f32 %v3400_v48, %v79_v33 }
  0xb8   :  { %5681 = vst [vmem:[#allocation24_spill] sm:$0xff] %v3499_v22  ;;  %5682 = vst [vmem:[#allocation25_spill] sm:$0xff] %v3502_v23  ;;  %v3523_v23 = vmul.f32 %v3400_v48, %v76_v26  ;;  %v3526_v22 = vmul.f32 %v3400_v48, %v77_v27  ;;  %v102_v21 = vld [vmem:[#allocation2 + $0x1f0] sm:$0xff]  ;;  %v3541_v26 = vmul.f32 %v3400_v48, %v82_v43  ;;  %v104_v32 = vld [vmem:[#allocation2 + $0x200] sm:$0xff] }
  0xb9   :  { %5683 = vst [vmem:[#allocation26_spill] sm:$0xff] %v3505_v1  ;;  %5684 = vst [vmem:[#allocation27_spill] sm:$0xff] %v3508_v2  ;;  %v97_v1 = vld [vmem:[#allocation2 + $0x1c8] sm:$0xff]  ;;  %v99_v2 = vld [vmem:[#allocation2 + $0x1d8] sm:$0xff]  ;;  %v3544_v27 = vmul.f32 %v3400_v48, %v83_v25 }
  0xba   :  { %5685 = vst [vmem:[#allocation28_spill] sm:$0xff] %v3511_v34  ;;  %5686 = vst [vmem:[#allocation29_spill] sm:$0xff] %v3514_v35  ;;  %v3535_v35 = vmul.f32 %v3400_v48, %v80_v42  ;;  %v3538_v34 = vmul.f32 %v3400_v48, %v81_v24  ;;  %v106_v33 = vld [vmem:[#allocation2 + $0x210] sm:$0xff]  ;;  %v3553_v42 = vmul.f32 %v3400_v48, %v86_v52  ;;  %v108_v43 = vld [vmem:[#allocation2 + $0x220] sm:$0xff] }
  0xbb   :  { %5687 = vst [vmem:[#allocation30_spill] sm:$0xff] %v3517_v9  ;;  %5688 = vst [vmem:[#allocation31_spill] sm:$0xff] %v3520_v10  ;;  %v101_v9 = vld [vmem:[#allocation2 + $0x1e8] sm:$0xff]  ;;  %v103_v10 = vld [vmem:[#allocation2 + $0x1f8] sm:$0xff]  ;;  %v3556_v24 = vmul.f32 %v3400_v48, %v87_v41 }
  0xbc   :  { %5689 = vst [vmem:[#allocation32_spill] sm:$0xff] %v3523_v23  ;;  %5690 = vst [vmem:[#allocation33_spill] sm:$0xff] %v3526_v22  ;;  %v3547_v22 = vmul.f32 %v3400_v48, %v84_v51  ;;  %v3550_v23 = vmul.f32 %v3400_v48, %v85_v40  ;;  %v110_v25 = vld [vmem:[#allocation2 + $0x230] sm:$0xff]  ;;  %v3565_v51 = vmul.f32 %v3400_v48, %v90_v60  ;;  %v112_v52 = vld [vmem:[#allocation2 + $0x240] sm:$0xff] }
  0xbd   :  { %5691 = vst [vmem:[#allocation34_spill] sm:$0xff] %v3529_v18  ;;  %5692 = vst [vmem:[#allocation35_spill] sm:$0xff] %v3532_v19  ;;  %v105_v18 = vld [vmem:[#allocation2 + $0x208] sm:$0xff]  ;;  %v107_v19 = vld [vmem:[#allocation2 + $0x218] sm:$0xff]  ;;  %v3568_v40 = vmul.f32 %v3400_v48, %v91_v50 }
  0xbe   :  { %5693 = vst [vmem:[#allocation36_spill] sm:$0xff] %v3535_v35  ;;  %5694 = vst [vmem:[#allocation37_spill] sm:$0xff] %v3538_v34  ;;  %v3559_v34 = vmul.f32 %v3400_v48, %v88_v59  ;;  %v3562_v35 = vmul.f32 %v3400_v48, %v89_v49  ;;  %v114_v41 = vld [vmem:[#allocation2 + $0x250] sm:$0xff]  ;;  %v3577_v59 = vmul.f32 %v3400_v48, %v94_v4  ;;  %v116_v60 = vld [vmem:[#allocation2 + $0x260] sm:$0xff] }
  0xbf   :  { %5695 = vst [vmem:[#allocation38_spill] sm:$0xff] %v3541_v26  ;;  %5696 = vst [vmem:[#allocation39_spill] sm:$0xff] %v3544_v27  ;;  %v109_v26 = vld [vmem:[#allocation2 + $0x228] sm:$0xff]  ;;  %v111_v27 = vld [vmem:[#allocation2 + $0x238] sm:$0xff]  ;;  %v3580_v49 = vmul.f32 %v3400_v48, %v95_v58 }
  0xc0   :  { %5697 = vst [vmem:[#allocation40_spill] sm:$0xff] %v3547_v22  ;;  %5698 = vst [vmem:[#allocation41_spill] sm:$0xff] %v3550_v23  ;;  %v3571_v23 = vmul.f32 %v3400_v48, %v92_v3  ;;  %v3574_v22 = vmul.f32 %v3400_v48, %v93_v57  ;;  %v118_v50 = vld [vmem:[#allocation2 + $0x270] sm:$0xff]  ;;  %v3589_v3 = vmul.f32 %v3400_v48, %v98_v12  ;;  %v120_v4 = vld [vmem:[#allocation2 + $0x280] sm:$0xff] }
  0xc1   :  { %5699 = vst [vmem:[#allocation42_spill] sm:$0xff] %v3553_v42  ;;  %5700 = vst [vmem:[#allocation43_spill] sm:$0xff] %v3556_v24  ;;  %v113_v42 = vld [vmem:[#allocation2 + $0x248] sm:$0xff]  ;;  %v115_v24 = vld [vmem:[#allocation2 + $0x258] sm:$0xff]  ;;  %v3592_v57 = vmul.f32 %v3400_v48, %v99_v2 }
  0xc2   :  { %5701 = vst [vmem:[#allocation44_spill] sm:$0xff] %v3559_v34  ;;  %5702 = vst [vmem:[#allocation45_spill] sm:$0xff] %v3562_v35  ;;  %v3583_v35 = vmul.f32 %v3400_v48, %v96_v11  ;;  %v3586_v34 = vmul.f32 %v3400_v48, %v97_v1  ;;  %v122_v58 = vld [vmem:[#allocation2 + $0x290] sm:$0xff]  ;;  %v3601_v11 = vmul.f32 %v3400_v48, %v102_v21  ;;  %v124_v12 = vld [vmem:[#allocation2 + $0x2a0] sm:$0xff] }
  0xc3   :  { %5703 = vst [vmem:[#allocation46_spill] sm:$0xff] %v3565_v51  ;;  %5704 = vst [vmem:[#allocation47_spill] sm:$0xff] %v3568_v40  ;;  %v117_v51 = vld [vmem:[#allocation2 + $0x268] sm:$0xff]  ;;  %v119_v40 = vld [vmem:[#allocation2 + $0x278] sm:$0xff]  ;;  %v3604_v1 = vmul.f32 %v3400_v48, %v103_v10 }
  0xc4   :  { %5705 = vst [vmem:[#allocation48_spill] sm:$0xff] %v3571_v23  ;;  %5706 = vst [vmem:[#allocation49_spill] sm:$0xff] %v3574_v22  ;;  %v3595_v22 = vmul.f32 %v3400_v48, %v100_v20  ;;  %v3598_v23 = vmul.f32 %v3400_v48, %v101_v9  ;;  %v126_v2 = vld [vmem:[#allocation2 + $0x2b0] sm:$0xff]  ;;  %v3613_v20 = vmul.f32 %v3400_v48, %v106_v33  ;;  %v128_v21 = vld [vmem:[#allocation2 + $0x2c0] sm:$0xff] }
  0xc5   :  { %5707 = vst [vmem:[#allocation50_spill] sm:$0xff] %v3577_v59  ;;  %5708 = vst [vmem:[#allocation51_spill] sm:$0xff] %v3580_v49  ;;  %v121_v59 = vld [vmem:[#allocation2 + $0x288] sm:$0xff]  ;;  %v123_v49 = vld [vmem:[#allocation2 + $0x298] sm:$0xff]  ;;  %v3616_v9 = vmul.f32 %v3400_v48, %v107_v19 }
  0xc6   :  { %5709 = vst [vmem:[#allocation52_spill] sm:$0xff] %v3583_v35  ;;  %5710 = vst [vmem:[#allocation53_spill] sm:$0xff] %v3586_v34  ;;  %v3607_v34 = vmul.f32 %v3400_v48, %v104_v32  ;;  %v3610_v35 = vmul.f32 %v3400_v48, %v105_v18  ;;  %v130_v10 = vld [vmem:[#allocation2 + $0x2d0] sm:$0xff]  ;;  %v3625_v32 = vmul.f32 %v3400_v48, %v110_v25  ;;  %v132_v33 = vld [vmem:[#allocation2 + $0x2e0] sm:$0xff] }
  0xc7   :  { %5711 = vst [vmem:[#allocation54_spill] sm:$0xff] %v3589_v3  ;;  %5712 = vst [vmem:[#allocation55_spill] sm:$0xff] %v3592_v57  ;;  %v125_v3 = vld [vmem:[#allocation2 + $0x2a8] sm:$0xff]  ;;  %v127_v57 = vld [vmem:[#allocation2 + $0x2b8] sm:$0xff]  ;;  %v3628_v18 = vmul.f32 %v3400_v48, %v111_v27 }
  0xc8   :  { %5713 = vst [vmem:[#allocation56_spill] sm:$0xff] %v3595_v22  ;;  %5714 = vst [vmem:[#allocation57_spill] sm:$0xff] %v3598_v23  ;;  %v3619_v23 = vmul.f32 %v3400_v48, %v108_v43  ;;  %v3622_v22 = vmul.f32 %v3400_v48, %v109_v26  ;;  %v134_v19 = vld [vmem:[#allocation2 + $0x2f0] sm:$0xff]  ;;  %v3637_v43 = vmul.f32 %v3400_v48, %v114_v41  ;;  %v136_v25 = vld [vmem:[#allocation2 + $0x300] sm:$0xff] }
  0xc9   :  { %5715 = vst [vmem:[#allocation58_spill] sm:$0xff] %v3601_v11  ;;  %5716 = vst [vmem:[#allocation59_spill] sm:$0xff] %v3604_v1  ;;  %v129_v11 = vld [vmem:[#allocation2 + $0x2c8] sm:$0xff]  ;;  %v131_v1 = vld [vmem:[#allocation2 + $0x2d8] sm:$0xff]  ;;  %v3640_v26 = vmul.f32 %v3400_v48, %v115_v24 }
  0xca   :  { %5717 = vst [vmem:[#allocation60_spill] sm:$0xff] %v3607_v34  ;;  %5718 = vst [vmem:[#allocation61_spill] sm:$0xff] %v3610_v35  ;;  %v3631_v35 = vmul.f32 %v3400_v48, %v112_v52  ;;  %v3634_v34 = vmul.f32 %v3400_v48, %v113_v42  ;;  %v138_v27 = vld [vmem:[#allocation2 + $0x310] sm:$0xff]  ;;  %v3649_v52 = vmul.f32 %v3400_v48, %v118_v50  ;;  %v140_v41 = vld [vmem:[#allocation2 + $0x320] sm:$0xff] }
  0xcb   :  { %5719 = vst [vmem:[#allocation62_spill] sm:$0xff] %v3613_v20  ;;  %5720 = vst [vmem:[#allocation63_spill] sm:$0xff] %v3616_v9  ;;  %v133_v20 = vld [vmem:[#allocation2 + $0x2e8] sm:$0xff]  ;;  %v135_v9 = vld [vmem:[#allocation2 + $0x2f8] sm:$0xff]  ;;  %v3652_v42 = vmul.f32 %v3400_v48, %v119_v40 }
  0xcc   :  { %5721 = vst [vmem:[#allocation64_spill] sm:$0xff] %v3619_v23  ;;  %5722 = vst [vmem:[#allocation65_spill] sm:$0xff] %v3622_v22  ;;  %v3643_v22 = vmul.f32 %v3400_v48, %v116_v60  ;;  %v3646_v23 = vmul.f32 %v3400_v48, %v117_v51  ;;  %v142_v24 = vld [vmem:[#allocation2 + $0x330] sm:$0xff]  ;;  %v3661_v60 = vmul.f32 %v3400_v48, %v122_v58  ;;  %v144_v50 = vld [vmem:[#allocation2 + $0x340] sm:$0xff] }
  0xcd   :  { %5723 = vst [vmem:[#allocation66_spill] sm:$0xff] %v3625_v32  ;;  %5724 = vst [vmem:[#allocation67_spill] sm:$0xff] %v3628_v18  ;;  %v137_v32 = vld [vmem:[#allocation2 + $0x308] sm:$0xff]  ;;  %v139_v18 = vld [vmem:[#allocation2 + $0x318] sm:$0xff]  ;;  %v3664_v51 = vmul.f32 %v3400_v48, %v123_v49 }
  0xce   :  { %5725 = vst [vmem:[#allocation68_spill] sm:$0xff] %v3631_v35  ;;  %5726 = vst [vmem:[#allocation69_spill] sm:$0xff] %v3634_v34  ;;  %v3655_v34 = vmul.f32 %v3400_v48, %v120_v4  ;;  %v3658_v35 = vmul.f32 %v3400_v48, %v121_v59  ;;  %v146_v40 = vld [vmem:[#allocation2 + $0x350] sm:$0xff]  ;;  %v3673_v4 = vmul.f32 %v3400_v48, %v126_v2  ;;  %v148_v58 = vld [vmem:[#allocation2 + $0x360] sm:$0xff] }
  0xcf   :  { %5727 = vst [vmem:[#allocation70_spill] sm:$0xff] %v3637_v43  ;;  %5728 = vst [vmem:[#allocation71_spill] sm:$0xff] %v3640_v26  ;;  %v141_v43 = vld [vmem:[#allocation2 + $0x328] sm:$0xff]  ;;  %v143_v26 = vld [vmem:[#allocation2 + $0x338] sm:$0xff]  ;;  %v3676_v59 = vmul.f32 %v3400_v48, %v127_v57 }
  0xd0   :  { %5729 = vst [vmem:[#allocation72_spill] sm:$0xff] %v3643_v22  ;;  %5730 = vst [vmem:[#allocation73_spill] sm:$0xff] %v3646_v23  ;;  %v3667_v23 = vmul.f32 %v3400_v48, %v124_v12  ;;  %v3670_v22 = vmul.f32 %v3400_v48, %v125_v3  ;;  %v150_v49 = vld [vmem:[#allocation2 + $0x370] sm:$0xff]  ;;  %v3685_v12 = vmul.f32 %v3400_v48, %v130_v10  ;;  %v152_v2 = vld [vmem:[#allocation2 + $0x380] sm:$0xff] }
  0xd1   :  { %5731 = vst [vmem:[#allocation74_spill] sm:$0xff] %v3649_v52  ;;  %5732 = vst [vmem:[#allocation75_spill] sm:$0xff] %v3652_v42  ;;  %v145_v52 = vld [vmem:[#allocation2 + $0x348] sm:$0xff]  ;;  %v147_v42 = vld [vmem:[#allocation2 + $0x358] sm:$0xff]  ;;  %v3688_v3 = vmul.f32 %v3400_v48, %v131_v1 }
  0xd2   :  { %5733 = vst [vmem:[#allocation76_spill] sm:$0xff] %v3655_v34  ;;  %5734 = vst [vmem:[#allocation77_spill] sm:$0xff] %v3658_v35  ;;  %v3679_v35 = vmul.f32 %v3400_v48, %v128_v21  ;;  %v3682_v34 = vmul.f32 %v3400_v48, %v129_v11  ;;  %v154_v57 = vld [vmem:[#allocation2 + $0x390] sm:$0xff]  ;;  %v3697_v21 = vmul.f32 %v3400_v48, %v134_v19  ;;  %v156_v10 = vld [vmem:[#allocation2 + $0x3a0] sm:$0xff] }
  0xd3   :  { %5735 = vst [vmem:[#allocation78_spill] sm:$0xff] %v3661_v60  ;;  %5736 = vst [vmem:[#allocation79_spill] sm:$0xff] %v3664_v51  ;;  %v149_v60 = vld [vmem:[#allocation2 + $0x368] sm:$0xff]  ;;  %v151_v51 = vld [vmem:[#allocation2 + $0x378] sm:$0xff]  ;;  %v3700_v11 = vmul.f32 %v3400_v48, %v135_v9 }
  0xd4   :  { %5737 = vst [vmem:[#allocation80_spill] sm:$0xff] %v3667_v23  ;;  %5738 = vst [vmem:[#allocation81_spill] sm:$0xff] %v3670_v22  ;;  %v3691_v22 = vmul.f32 %v3400_v48, %v132_v33  ;;  %v3694_v23 = vmul.f32 %v3400_v48, %v133_v20  ;;  %v158_v1 = vld [vmem:[#allocation2 + $0x3b0] sm:$0xff]  ;;  %v3709_v33 = vmul.f32 %v3400_v48, %v138_v27  ;;  %v160_v19 = vld [vmem:[#allocation2 + $0x3c0] sm:$0xff] }
  0xd5   :  { %5739 = vst [vmem:[#allocation82_spill] sm:$0xff] %v3673_v4  ;;  %5740 = vst [vmem:[#allocation83_spill] sm:$0xff] %v3676_v59  ;;  %v153_v4 = vld [vmem:[#allocation2 + $0x388] sm:$0xff]  ;;  %v155_v59 = vld [vmem:[#allocation2 + $0x398] sm:$0xff]  ;;  %v3712_v20 = vmul.f32 %v3400_v48, %v139_v18 }
  0xd6   :  { %5741 = vst [vmem:[#allocation84_spill] sm:$0xff] %v3679_v35  ;;  %5742 = vst [vmem:[#allocation85_spill] sm:$0xff] %v3682_v34  ;;  %v3703_v34 = vmul.f32 %v3400_v48, %v136_v25  ;;  %v3706_v35 = vmul.f32 %v3400_v48, %v137_v32  ;;  %v162_v9 = vld [vmem:[#allocation2 + $0x3d0] sm:$0xff]  ;;  %v3721_v25 = vmul.f32 %v3400_v48, %v142_v24  ;;  %v164_v27 = vld [vmem:[#allocation2 + $0x3e0] sm:$0xff] }
  0xd7   :  { %5743 = vst [vmem:[#allocation86_spill] sm:$0xff] %v3685_v12  ;;  %5744 = vst [vmem:[#allocation87_spill] sm:$0xff] %v3688_v3  ;;  %v157_v12 = vld [vmem:[#allocation2 + $0x3a8] sm:$0xff]  ;;  %v159_v3 = vld [vmem:[#allocation2 + $0x3b8] sm:$0xff]  ;;  %v3724_v32 = vmul.f32 %v3400_v48, %v143_v26 }
  0xd8   :  { %5745 = vst [vmem:[#allocation88_spill] sm:$0xff] %v3691_v22  ;;  %5746 = vst [vmem:[#allocation89_spill] sm:$0xff] %v3694_v23  ;;  %v3715_v23 = vmul.f32 %v3400_v48, %v140_v41  ;;  %v3718_v22 = vmul.f32 %v3400_v48, %v141_v43  ;;  %v166_v18 = vld [vmem:[#allocation2 + $0x3f0] sm:$0xff]  ;;  %v3733_v41 = vmul.f32 %v3400_v48, %v146_v40  ;;  %v168_v24 = vld [vmem:[#allocation2 + $0x400] sm:$0xff] }
  0xd9   :  { %5747 = vst [vmem:[#allocation90_spill] sm:$0xff] %v3697_v21  ;;  %5748 = vst [vmem:[#allocation91_spill] sm:$0xff] %v3700_v11  ;;  %v161_v21 = vld [vmem:[#allocation2 + $0x3c8] sm:$0xff]  ;;  %v163_v11 = vld [vmem:[#allocation2 + $0x3d8] sm:$0xff]  ;;  %v3736_v43 = vmul.f32 %v3400_v48, %v147_v42 }
  0xda   :  { %5749 = vst [vmem:[#allocation92_spill] sm:$0xff] %v3703_v34  ;;  %5750 = vst [vmem:[#allocation93_spill] sm:$0xff] %v3706_v35  ;;  %v3727_v35 = vmul.f32 %v3400_v48, %v144_v50  ;;  %v3730_v34 = vmul.f32 %v3400_v48, %v145_v52  ;;  %v170_v26 = vld [vmem:[#allocation2 + $0x410] sm:$0xff]  ;;  %v3745_v50 = vmul.f32 %v3400_v48, %v150_v49  ;;  %v172_v40 = vld [vmem:[#allocation2 + $0x420] sm:$0xff] }
  0xdb   :  { %5751 = vst [vmem:[#allocation94_spill] sm:$0xff] %v3709_v33  ;;  %5752 = vst [vmem:[#allocation95_spill] sm:$0xff] %v3712_v20  ;;  %v165_v33 = vld [vmem:[#allocation2 + $0x3e8] sm:$0xff]  ;;  %v167_v20 = vld [vmem:[#allocation2 + $0x3f8] sm:$0xff]  ;;  %v3748_v52 = vmul.f32 %v3400_v48, %v151_v51 }
  0xdc   :  { %5753 = vst [vmem:[#allocation96_spill] sm:$0xff] %v3715_v23  ;;  %5754 = vst [vmem:[#allocation97_spill] sm:$0xff] %v3718_v22  ;;  %v3739_v22 = vmul.f32 %v3400_v48, %v148_v58  ;;  %v3742_v23 = vmul.f32 %v3400_v48, %v149_v60  ;;  %v174_v42 = vld [vmem:[#allocation2 + $0x430] sm:$0xff]  ;;  %v3757_v58 = vmul.f32 %v3400_v48, %v154_v57  ;;  %v176_v49 = vld [vmem:[#allocation2 + $0x440] sm:$0xff] }
  0xdd   :  { %5755 = vst [vmem:[#allocation98_spill] sm:$0xff] %v3721_v25  ;;  %5756 = vst [vmem:[#allocation99_spill] sm:$0xff] %v3724_v32  ;;  %v169_v25 = vld [vmem:[#allocation2 + $0x408] sm:$0xff]  ;;  %v171_v32 = vld [vmem:[#allocation2 + $0x418] sm:$0xff]  ;;  %v3760_v60 = vmul.f32 %v3400_v48, %v155_v59 }
  0xde   :  { %5757 = vst [vmem:[#allocation100_spill] sm:$0xff] %v3727_v35  ;;  %5758 = vst [vmem:[#allocation101_spill] sm:$0xff] %v3730_v34  ;;  %v3751_v34 = vmul.f32 %v3400_v48, %v152_v2  ;;  %v3754_v35 = vmul.f32 %v3400_v48, %v153_v4  ;;  %v178_v51 = vld [vmem:[#allocation2 + $0x450] sm:$0xff]  ;;  %v3769_v2 = vmul.f32 %v3400_v48, %v158_v1  ;;  %v180_v57 = vld [vmem:[#allocation2 + $0x460] sm:$0xff] }
  0xdf   :  { %5759 = vst [vmem:[#allocation102_spill] sm:$0xff] %v3733_v41  ;;  %5760 = vst [vmem:[#allocation103_spill] sm:$0xff] %v3736_v43  ;;  %v173_v41 = vld [vmem:[#allocation2 + $0x428] sm:$0xff]  ;;  %v175_v43 = vld [vmem:[#allocation2 + $0x438] sm:$0xff]  ;;  %v3772_v4 = vmul.f32 %v3400_v48, %v159_v3 }
  0xe0   :  { %5761 = vst [vmem:[#allocation104_spill] sm:$0xff] %v3739_v22  ;;  %5762 = vst [vmem:[#allocation105_spill] sm:$0xff] %v3742_v23  ;;  %v3763_v23 = vmul.f32 %v3400_v48, %v156_v10  ;;  %v3766_v22 = vmul.f32 %v3400_v48, %v157_v12  ;;  %v182_v59 = vld [vmem:[#allocation2 + $0x470] sm:$0xff]  ;;  %v3781_v10 = vmul.f32 %v3400_v48, %v162_v9  ;;  %v184_v1 = vld [vmem:[#allocation2 + $0x480] sm:$0xff] }
  0xe1   :  { %5763 = vst [vmem:[#allocation106_spill] sm:$0xff] %v3745_v50  ;;  %5764 = vst [vmem:[#allocation107_spill] sm:$0xff] %v3748_v52  ;;  %v177_v50 = vld [vmem:[#allocation2 + $0x448] sm:$0xff]  ;;  %v179_v52 = vld [vmem:[#allocation2 + $0x458] sm:$0xff]  ;;  %v3784_v12 = vmul.f32 %v3400_v48, %v163_v11 }
  0xe2   :  { %5765 = vst [vmem:[#allocation108_spill] sm:$0xff] %v3751_v34  ;;  %5766 = vst [vmem:[#allocation109_spill] sm:$0xff] %v3754_v35  ;;  %v3775_v35 = vmul.f32 %v3400_v48, %v160_v19  ;;  %v3778_v34 = vmul.f32 %v3400_v48, %v161_v21  ;;  %v186_v3 = vld [vmem:[#allocation2 + $0x490] sm:$0xff]  ;;  %v3793_v19 = vmul.f32 %v3400_v48, %v166_v18  ;;  %v188_v9 = vld [vmem:[#allocation2 + $0x4a0] sm:$0xff] }
  0xe3   :  { %5767 = vst [vmem:[#allocation110_spill] sm:$0xff] %v3757_v58  ;;  %5768 = vst [vmem:[#allocation111_spill] sm:$0xff] %v3760_v60  ;;  %v181_v58 = vld [vmem:[#allocation2 + $0x468] sm:$0xff]  ;;  %v183_v60 = vld [vmem:[#allocation2 + $0x478] sm:$0xff]  ;;  %v3796_v21 = vmul.f32 %v3400_v48, %v167_v20 }
  0xe4   :  { %5769 = vst [vmem:[#allocation112_spill] sm:$0xff] %v3763_v23  ;;  %5770 = vst [vmem:[#allocation113_spill] sm:$0xff] %v3766_v22  ;;  %v3787_v22 = vmul.f32 %v3400_v48, %v164_v27  ;;  %v3790_v23 = vmul.f32 %v3400_v48, %v165_v33  ;;  %v190_v11 = vld [vmem:[#allocation2 + $0x4b0] sm:$0xff]  ;;  %v3805_v27 = vmul.f32 %v3400_v48, %v170_v26  ;;  %v192_v18 = vld [vmem:[#allocation2 + $0x4c0] sm:$0xff] }
  0xe5   :  { %5771 = vst [vmem:[#allocation114_spill] sm:$0xff] %v3769_v2  ;;  %5772 = vst [vmem:[#allocation115_spill] sm:$0xff] %v3772_v4  ;;  %v185_v2 = vld [vmem:[#allocation2 + $0x488] sm:$0xff]  ;;  %v187_v4 = vld [vmem:[#allocation2 + $0x498] sm:$0xff]  ;;  %v3808_v33 = vmul.f32 %v3400_v48, %v171_v32 }
  0xe6   :  { %5773 = vst [vmem:[#allocation116_spill] sm:$0xff] %v3775_v35  ;;  %5774 = vst [vmem:[#allocation117_spill] sm:$0xff] %v3778_v34  ;;  %v3799_v34 = vmul.f32 %v3400_v48, %v168_v24  ;;  %v3802_v35 = vmul.f32 %v3400_v48, %v169_v25  ;;  %v194_v20 = vld [vmem:[#allocation2 + $0x4d0] sm:$0xff]  ;;  %v3817_v24 = vmul.f32 %v3400_v48, %v174_v42  ;;  %v196_v26 = vld [vmem:[#allocation2 + $0x4e0] sm:$0xff] }
  0xe7   :  { %5775 = vst [vmem:[#allocation118_spill] sm:$0xff] %v3781_v10  ;;  %5776 = vst [vmem:[#allocation119_spill] sm:$0xff] %v3784_v12  ;;  %v189_v10 = vld [vmem:[#allocation2 + $0x4a8] sm:$0xff]  ;;  %v191_v12 = vld [vmem:[#allocation2 + $0x4b8] sm:$0xff]  ;;  %v3820_v25 = vmul.f32 %v3400_v48, %v175_v43 }
  0xe8   :  { %5777 = vst [vmem:[#allocation120_spill] sm:$0xff] %v3787_v22  ;;  %5778 = vst [vmem:[#allocation121_spill] sm:$0xff] %v3790_v23  ;;  %v3811_v23 = vmul.f32 %v3400_v48, %v172_v40  ;;  %v3814_v22 = vmul.f32 %v3400_v48, %v173_v41  ;;  %v198_v32 = vld [vmem:[#allocation2 + $0x4f0] sm:$0xff]  ;;  %v3829_v40 = vmul.f32 %v3400_v48, %v178_v51  ;;  %v200_v42 = vld [vmem:[#allocation2 + $0x500] sm:$0xff] }
  0xe9   :  { %5779 = vst [vmem:[#allocation122_spill] sm:$0xff] %v3793_v19  ;;  %5780 = vst [vmem:[#allocation123_spill] sm:$0xff] %v3796_v21  ;;  %v193_v19 = vld [vmem:[#allocation2 + $0x4c8] sm:$0xff]  ;;  %v195_v21 = vld [vmem:[#allocation2 + $0x4d8] sm:$0xff]  ;;  %v3832_v41 = vmul.f32 %v3400_v48, %v179_v52 }
  0xea   :  { %5781 = vst [vmem:[#allocation124_spill] sm:$0xff] %v3799_v34  ;;  %5782 = vst [vmem:[#allocation125_spill] sm:$0xff] %v3802_v35  ;;  %v3823_v35 = vmul.f32 %v3400_v48, %v176_v49  ;;  %v3826_v34 = vmul.f32 %v3400_v48, %v177_v50  ;;  %v218_v43 = vld [vmem:[#allocation2 + $0x590] sm:$0x3]  ;;  %v3841_v49 = vmul.f32 %v3400_v48, %v182_v59  ;;  %v220_v51 = vld [vmem:[#allocation2 + $0x5a0] sm:$0x3] }
  0xeb   :  { %5783 = vst [vmem:[#allocation126_spill] sm:$0xff] %v3805_v27  ;;  %5784 = vst [vmem:[#allocation127_spill] sm:$0xff] %v3808_v33  ;;  %v197_v27 = vld [vmem:[#allocation2 + $0x4e8] sm:$0xff]  ;;  %v199_v33 = vld [vmem:[#allocation2 + $0x4f8] sm:$0xff]  ;;  %v3844_v50 = vmul.f32 %v3400_v48, %v183_v60 }
  0xec   :  { %5785 = vst [vmem:[#allocation128_spill] sm:$0xff] %v3811_v23  ;;  %5786 = vst [vmem:[#allocation129_spill] sm:$0xff] %v3814_v22  ;;  %v3835_v22 = vmul.f32 %v3400_v48, %v180_v57  ;;  %v3838_v23 = vmul.f32 %v3400_v48, %v181_v58  ;;  %v222_v52 = vld [vmem:[#allocation2 + $0x5b0] sm:$0x3]  ;;  %v3853_v57 = vmul.f32 %v3400_v48, %v186_v3  ;;  %v224_v59 = vld [vmem:[#allocation2 + $0x5c0] sm:$0x3] }
  0xed   :  { %5787 = vst [vmem:[#allocation130_spill] sm:$0xff] %v3817_v24  ;;  %5788 = vst [vmem:[#allocation131_spill] sm:$0xff] %v3820_v25  ;;  %v201_v24 = vld [vmem:[#allocation2 + $0x508] sm:$0xff]  ;;  %v219_v25 = vld [vmem:[#allocation2 + $0x598] sm:$0x3]  ;;  %v3856_v58 = vmul.f32 %v3400_v48, %v187_v4 }
  0xee   :  { %5789 = vst [vmem:[#allocation132_spill] sm:$0xff] %v3823_v35  ;;  %5790 = vst [vmem:[#allocation133_spill] sm:$0xff] %v3826_v34  ;;  %v3847_v34 = vmul.f32 %v3400_v48, %v184_v1  ;;  %v3850_v35 = vmul.f32 %v3400_v48, %v185_v2  ;;  %v226_v60 = vld [vmem:[#allocation2 + $0x5d0] sm:$0x3]  ;;  %v3865_v1 = vmul.f32 %v3400_v48, %v190_v11  ;;  %v228_v3 = vld [vmem:[#allocation2 + $0x5e0] sm:$0x3] }
  0xef   :  { %5791 = vst [vmem:[#allocation134_spill] sm:$0xff] %v3829_v40  ;;  %5792 = vst [vmem:[#allocation135_spill] sm:$0xff] %v3832_v41  ;;  %v221_v40 = vld [vmem:[#allocation2 + $0x5a8] sm:$0x3]  ;;  %v223_v41 = vld [vmem:[#allocation2 + $0x5b8] sm:$0x3]  ;;  %v3868_v2 = vmul.f32 %v3400_v48, %v191_v12 }
  0xf0   :  { %5793 = vst [vmem:[#allocation136_spill] sm:$0xff] %v3835_v22  ;;  %5794 = vst [vmem:[#allocation137_spill] sm:$0xff] %v3838_v23  ;;  %v3859_v23 = vmul.f32 %v3400_v48, %v188_v9  ;;  %v3862_v22 = vmul.f32 %v3400_v48, %v189_v10  ;;  %v230_v4 = vld [vmem:[#allocation2 + $0x5f0] sm:$0x3]  ;;  %v3877_v9 = vmul.f32 %v3400_v48, %v194_v20  ;;  %v232_v11 = vld [vmem:[#allocation2 + $0x600] sm:$0x3] }
  0xf1   :  { %5795 = vst [vmem:[#allocation138_spill] sm:$0xff] %v3841_v49  ;;  %5796 = vst [vmem:[#allocation139_spill] sm:$0xff] %v3844_v50  ;;  %v225_v49 = vld [vmem:[#allocation2 + $0x5c8] sm:$0x3]  ;;  %v227_v50 = vld [vmem:[#allocation2 + $0x5d8] sm:$0x3]  ;;  %v3880_v10 = vmul.f32 %v3400_v48, %v195_v21 }
  0xf2   :  { %5797 = vst [vmem:[#allocation140_spill] sm:$0xff] %v3847_v34  ;;  %5798 = vst [vmem:[#allocation141_spill] sm:$0xff] %v3850_v35  ;;  %v3871_v35 = vmul.f32 %v3400_v48, %v192_v18  ;;  %v3874_v34 = vmul.f32 %v3400_v48, %v193_v19  ;;  %v234_v12 = vld [vmem:[#allocation2 + $0x610] sm:$0x3]  ;;  %v3889_v18 = vmul.f32 %v3400_v48, %v198_v32  ;;  %v236_v20 = vld [vmem:[#allocation2 + $0x620] sm:$0x3] }
  0xf3   :  { %5799 = vst [vmem:[#allocation142_spill] sm:$0xff] %v3853_v57  ;;  %5800 = vst [vmem:[#allocation143_spill] sm:$0xff] %v3856_v58  ;;  %v229_v57 = vld [vmem:[#allocation2 + $0x5e8] sm:$0x3]  ;;  %v231_v58 = vld [vmem:[#allocation2 + $0x5f8] sm:$0x3]  ;;  %v3892_v19 = vmul.f32 %v3400_v48, %v199_v33 }
  0xf4   :  { %5801 = vst [vmem:[#allocation144_spill] sm:$0xff] %v3859_v23  ;;  %5802 = vst [vmem:[#allocation145_spill] sm:$0xff] %v3862_v22  ;;  %v3883_v22 = vmul.f32 %v3400_v48, %v196_v26  ;;  %v3886_v23 = vmul.f32 %v3400_v48, %v197_v27  ;;  %v238_v21 = vld [vmem:[#allocation2 + $0x630] sm:$0x3]  ;;  %v3901_v26 = vmul.f32 %v3362_v13, %v218_v43  ;;  %v240_v32 = vld [vmem:[#allocation2 + $0x640] sm:$0x3] }
  0xf5   :  { %5803 = vst [vmem:[#allocation146_spill] sm:$0xff] %v3865_v1  ;;  %5804 = vst [vmem:[#allocation147_spill] sm:$0xff] %v3868_v2  ;;  %v233_v1 = vld [vmem:[#allocation2 + $0x608] sm:$0x3]  ;;  %v235_v2 = vld [vmem:[#allocation2 + $0x618] sm:$0x3]  ;;  %v3904_v27 = vmul.f32 %v3362_v13, %v219_v25 }
  0xf6   :  { %5805 = vst [vmem:[#allocation148_spill] sm:$0xff] %v3871_v35  ;;  %5806 = vst [vmem:[#allocation149_spill] sm:$0xff] %v3874_v34  ;;  %v3895_v34 = vmul.f32 %v3400_v48, %v200_v42  ;;  %v3898_v35 = vmul.f32 %v3400_v48, %v201_v24  ;;  %v242_v33 = vld [vmem:[#allocation2 + $0x650] sm:$0x3]  ;;  %v3913_v42 = vmul.f32 %v3362_v13, %v222_v52  ;;  %v244_v24 = vld [vmem:[#allocation2 + $0x660] sm:$0x3] }
  0xf7   :  { %5807 = vst [vmem:[#allocation150_spill] sm:$0xff] %v3877_v9  ;;  %5808 = vst [vmem:[#allocation151_spill] sm:$0xff] %v3880_v10  ;;  %v237_v9 = vld [vmem:[#allocation2 + $0x628] sm:$0x3]  ;;  %v239_v10 = vld [vmem:[#allocation2 + $0x638] sm:$0x3]  ;;  %v3916_v48 = vmul.f32 %v3362_v13, %v223_v41 }
  0xf8   :  { %5809 = vst [vmem:[#allocation152_spill] sm:$0xff] %v3883_v22  ;;  %5810 = vst [vmem:[#allocation153_spill] sm:$0xff] %v3886_v23  ;;  %v3907_v23 = vmul.f32 %v3362_v13, %v220_v51  ;;  %v3910_v22 = vmul.f32 %v3362_v13, %v221_v40  ;;  %v245_v43 = vld [vmem:[#allocation2 + $0x668] sm:$0x3]  ;;  %v246_v25 = vld [vmem:[#allocation2 + $0x670] sm:$0x3]  ;;  %v3925_v51 = vmul.f32 %v3362_v13, %v226_v60 }
  0xf9   :  { %5811 = vst [vmem:[#allocation154_spill] sm:$0xff] %v3889_v18  ;;  %5812 = vst [vmem:[#allocation155_spill] sm:$0xff] %v3892_v19  ;;  %v241_v18 = vld [vmem:[#allocation2 + $0x648] sm:$0x3]  ;;  %v243_v19 = vld [vmem:[#allocation2 + $0x658] sm:$0x3]  ;;  %v3928_v40 = vmul.f32 %v3362_v13, %v227_v50 }
  0xfa   :  { %5813 = vst [vmem:[#allocation156_spill] sm:$0xff] %v3895_v34  ;;  %5814 = vst [vmem:[#allocation157_spill] sm:$0xff] %v3898_v35  ;;  %v247_v35 = vld [vmem:[#allocation2 + $0x678] sm:$0x3]  ;;  %v3919_v34 = vmul.f32 %v3362_v13, %v224_v59  ;;  %v248_v52 = vld [vmem:[#allocation2 + $0x680] sm:$0x3]  ;;  %v3937_v59 = vmul.f32 %v3362_v13, %v230_v4 }
  0xfb   :  { %5815 = vst [vmem:[#allocation158_spill] sm:$0xff] %v3904_v27  ;;  %5816 = vst [vmem:[#allocation159_spill] sm:$0xff] %v3907_v23  ;;  %v3922_v27 = vmul.f32 %v3362_v13, %v225_v49  ;;  %v250_v41 = vld [vmem:[#allocation2 + $0x690] sm:$0x3]  ;;  %v3934_v23 = vmul.f32 %v3362_v13, %v229_v57  ;;  %v3940_v49 = vmul.f32 %v3362_v13, %v231_v58  ;;  %v252_v60 = vld [vmem:[#allocation2 + $0x6a0] sm:$0x3] }
  0xfc   :  { %5817 = vst [vmem:[#allocation160_spill] sm:$0xff] %v3910_v22  ;;  %5818 = vst [vmem:[#allocation161_spill] sm:$0xff] %v3913_v42  ;;  %v249_v42 = vld [vmem:[#allocation2 + $0x688] sm:$0x3]  ;;  %v3931_v22 = vmul.f32 %v3362_v13, %v228_v3  ;;  %v254_v50 = vld [vmem:[#allocation2 + $0x6b0] sm:$0x3]  ;;  %v3949_v3 = vmul.f32 %v3362_v13, %v234_v12  ;;  %v3952_v57 = vmul.f32 %v3362_v13, %v235_v2 }
  0xfd   :  { %5819 = vst [vmem:[#allocation162_spill] sm:$0xff] %v3916_v48  ;;  %5820 = vst [vmem:[#allocation163_spill] sm:$0xff] %v3919_v34  ;;  %v251_v48 = vld [vmem:[#allocation2 + $0x698] sm:$0x3]  ;;  %v3946_v34 = vmul.f32 %v3362_v13, %v233_v1  ;;  %v256_v4 = vld [vmem:[#allocation2 + $0x6c0] sm:$0x3]  ;;  %v3964_v1 = vmul.f32 %v3362_v13, %v239_v10 }
  0xfe   :  { %5821 = vst [vmem:[#allocation164_spill] sm:$0xff] %v3922_v27  ;;  %5822 = vst [vmem:[#allocation165_spill] sm:$0xff] %v3925_v51  ;;  %v253_v51 = vld [vmem:[#allocation2 + $0x6a8] sm:$0x3]  ;;  %v3943_v27 = vmul.f32 %v3362_v13, %v232_v11  ;;  %v258_v58 = vld [vmem:[#allocation2 + $0x6d0] sm:$0x3]  ;;  %v3961_v11 = vmul.f32 %v3362_v13, %v238_v21 }
  0xff   :  { %5823 = vst [vmem:[#allocation166_spill] sm:$0xff] %v3928_v40  ;;  %5824 = vst [vmem:[#allocation167_spill] sm:$0xff] %v3931_v22  ;;  %v255_v40 = vld [vmem:[#allocation2 + $0x6b8] sm:$0x3]  ;;  %v3958_v22 = vmul.f32 %v3362_v13, %v237_v9  ;;  %v260_v12 = vld [vmem:[#allocation2 + $0x6e0] sm:$0x3]  ;;  %v3976_v9 = vmul.f32 %v3362_v13, %v243_v19 }
 0x100   :  { %5825 = vst [vmem:[#allocation168_spill] sm:$0xff] %v3934_v23  ;;  %5826 = vst [vmem:[#allocation169_spill] sm:$0xff] %v3937_v59  ;;  %v257_v59 = vld [vmem:[#allocation2 + $0x6c8] sm:$0x3]  ;;  %v3955_v23 = vmul.f32 %v3362_v13, %v236_v20  ;;  %v262_v2 = vld [vmem:[#allocation2 + $0x6f0] sm:$0x3]  ;;  %v3973_v20 = vmul.f32 %v3362_v13, %v242_v33 }
 0x101   :  { %5827 = vst [vmem:[#allocation170_spill] sm:$0xff] %v3940_v49  ;;  %5828 = vst [vmem:[#allocation171_spill] sm:$0xff] %v3943_v27  ;;  %v259_v49 = vld [vmem:[#allocation2 + $0x6d8] sm:$0x3]  ;;  %v3970_v27 = vmul.f32 %v3362_v13, %v241_v18  ;;  %v264_v21 = vld [vmem:[#allocation2 + $0x700] sm:$0x3]  ;;  %v3988_v18 = vmul.f32 %v3362_v13, %v247_v35 }
 0x102   :  { %5829 = vst [vmem:[#allocation172_spill] sm:$0xff] %v3946_v34  ;;  %5830 = vst [vmem:[#allocation173_spill] sm:$0xff] %v3949_v3  ;;  %v261_v3 = vld [vmem:[#allocation2 + $0x6e8] sm:$0x3]  ;;  %v3967_v34 = vmul.f32 %v3362_v13, %v240_v32  ;;  %v266_v10 = vld [vmem:[#allocation2 + $0x710] sm:$0x3]  ;;  %v3985_v32 = vmul.f32 %v3362_v13, %v246_v25 }
 0x103   :  { %5831 = vst [vmem:[#allocation174_spill] sm:$0xff] %v3952_v57  ;;  %5832 = vst [vmem:[#allocation175_spill] sm:$0xff] %v3955_v23  ;;  %v263_v57 = vld [vmem:[#allocation2 + $0x6f8] sm:$0x3]  ;;  %v3982_v23 = vmul.f32 %v3362_v13, %v245_v43  ;;  %v268_v33 = vld [vmem:[#allocation2 + $0x720] sm:$0x3]  ;;  %v4000_v43 = vmul.f32 %v3362_v13, %v251_v48 }
 0x104   :  { %5833 = vst [vmem:[#allocation176_spill] sm:$0xff] %v3958_v22  ;;  %5834 = vst [vmem:[#allocation177_spill] sm:$0xff] %v3961_v11  ;;  %v265_v11 = vld [vmem:[#allocation2 + $0x708] sm:$0x3]  ;;  %v3979_v22 = vmul.f32 %v3362_v13, %v244_v24  ;;  %v270_v19 = vld [vmem:[#allocation2 + $0x730] sm:$0x3]  ;;  %v3997_v24 = vmul.f32 %v3362_v13, %v250_v41 }
 0x105   :  { %5835 = vst [vmem:[#allocation178_spill] sm:$0xff] %v3964_v1  ;;  %5836 = vst [vmem:[#allocation179_spill] sm:$0xff] %v3967_v34  ;;  %v267_v1 = vld [vmem:[#allocation2 + $0x718] sm:$0x3]  ;;  %v3994_v34 = vmul.f32 %v3362_v13, %v249_v42  ;;  %v272_v25 = vld [vmem:[#allocation2 + $0x740] sm:$0x3]  ;;  %v4012_v42 = vmul.f32 %v3362_v13, %v255_v40 }
 0x106   :  { %5837 = vst [vmem:[#allocation180_spill] sm:$0xff] %v3970_v27  ;;  %5838 = vst [vmem:[#allocation181_spill] sm:$0xff] %v3973_v20  ;;  %v269_v20 = vld [vmem:[#allocation2 + $0x728] sm:$0x3]  ;;  %v3991_v27 = vmul.f32 %v3362_v13, %v248_v52  ;;  %v274_v35 = vld [vmem:[#allocation2 + $0x750] sm:$0x3]  ;;  %v4009_v52 = vmul.f32 %v3362_v13, %v254_v50 }
 0x107   :  { %5839 = vst [vmem:[#allocation182_spill] sm:$0xff] %v3976_v9  ;;  %5840 = vst [vmem:[#allocation183_spill] sm:$0xff] %v3979_v22  ;;  %v271_v9 = vld [vmem:[#allocation2 + $0x738] sm:$0x3]  ;;  %v4006_v22 = vmul.f32 %v3362_v13, %v253_v51  ;;  %v276_v41 = vld [vmem:[#allocation2 + $0x760] sm:$0x3]  ;;  %v4024_v51 = vmul.f32 %v3362_v13, %v259_v49 }
 0x108   :  { %5841 = vst [vmem:[#allocation184_spill] sm:$0xff] %v3982_v23  ;;  %5842 = vst [vmem:[#allocation185_spill] sm:$0xff] %v3985_v32  ;;  %v273_v32 = vld [vmem:[#allocation2 + $0x748] sm:$0x3]  ;;  %v4003_v23 = vmul.f32 %v3362_v13, %v252_v60  ;;  %v278_v48 = vld [vmem:[#allocation2 + $0x770] sm:$0x3]  ;;  %v4021_v60 = vmul.f32 %v3362_v13, %v258_v58 }
 0x109   :  { %5843 = vst [vmem:[#allocation186_spill] sm:$0xff] %v3988_v18  ;;  %5844 = vst [vmem:[#allocation187_spill] sm:$0xff] %v3991_v27  ;;  %v275_v18 = vld [vmem:[#allocation2 + $0x758] sm:$0x3]  ;;  %v4018_v27 = vmul.f32 %v3362_v13, %v257_v59  ;;  %v280_v50 = vld [vmem:[#allocation2 + $0x780] sm:$0x3]  ;;  %v4036_v59 = vmul.f32 %v3362_v13, %v263_v57 }
 0x10a   :  { %5845 = vst [vmem:[#allocation188_spill] sm:$0xff] %v3994_v34  ;;  %5846 = vst [vmem:[#allocation189_spill] sm:$0xff] %v3997_v24  ;;  %v277_v24 = vld [vmem:[#allocation2 + $0x768] sm:$0x3]  ;;  %v4015_v34 = vmul.f32 %v3362_v13, %v256_v4  ;;  %v282_v40 = vld [vmem:[#allocation2 + $0x790] sm:$0x3]  ;;  %v4033_v4 = vmul.f32 %v3362_v13, %v262_v2 }
 0x10b   :  { %5847 = vst [vmem:[#allocation190_spill] sm:$0xff] %v4000_v43  ;;  %5848 = vst [vmem:[#allocation191_spill] sm:$0xff] %v4003_v23  ;;  %v279_v43 = vld [vmem:[#allocation2 + $0x778] sm:$0x3]  ;;  %v4030_v23 = vmul.f32 %v3362_v13, %v261_v3  ;;  %v284_v58 = vld [vmem:[#allocation2 + $0x7a0] sm:$0x3]  ;;  %v4048_v3 = vmul.f32 %v3362_v13, %v267_v1 }
 0x10c   :  { %5849 = vst [vmem:[#allocation192_spill] sm:$0xff] %v4006_v22  ;;  %5850 = vst [vmem:[#allocation193_spill] sm:$0xff] %v4009_v52  ;;  %v281_v52 = vld [vmem:[#allocation2 + $0x788] sm:$0x3]  ;;  %v4027_v22 = vmul.f32 %v3362_v13, %v260_v12  ;;  %v286_v49 = vld [vmem:[#allocation2 + $0x7b0] sm:$0x3]  ;;  %v4045_v12 = vmul.f32 %v3362_v13, %v266_v10 }
 0x10d   :  { %5851 = vst [vmem:[#allocation194_spill] sm:$0xff] %v4012_v42  ;;  %5852 = vst [vmem:[#allocation195_spill] sm:$0xff] %v4015_v34  ;;  %v283_v42 = vld [vmem:[#allocation2 + $0x798] sm:$0x3]  ;;  %v4042_v34 = vmul.f32 %v3362_v13, %v265_v11  ;;  %v288_v2 = vld [vmem:[#allocation2 + $0x7c0] sm:$0x3]  ;;  %v4060_v11 = vmul.f32 %v3362_v13, %v271_v9 }
 0x10e   :  { %5853 = vst [vmem:[#allocation196_spill] sm:$0xff] %v4018_v27  ;;  %5854 = vst [vmem:[#allocation197_spill] sm:$0xff] %v4021_v60  ;;  %v285_v60 = vld [vmem:[#allocation2 + $0x7a8] sm:$0x3]  ;;  %v4039_v27 = vmul.f32 %v3362_v13, %v264_v21  ;;  %v290_v57 = vld [vmem:[#allocation2 + $0x7d0] sm:$0x3]  ;;  %v4057_v21 = vmul.f32 %v3362_v13, %v270_v19 }
 0x10f   :  { %5855 = vst [vmem:[#allocation198_spill] sm:$0xff] %v4024_v51  ;;  %5856 = vst [vmem:[#allocation199_spill] sm:$0xff] %v4027_v22  ;;  %v287_v51 = vld [vmem:[#allocation2 + $0x7b8] sm:$0x3]  ;;  %v4054_v22 = vmul.f32 %v3362_v13, %v269_v20  ;;  %v292_v10 = vld [vmem:[#allocation2 + $0x7e0] sm:$0x3]  ;;  %v4072_v20 = vmul.f32 %v3362_v13, %v275_v18 }
 0x110   :  { %5857 = vst [vmem:[#allocation200_spill] sm:$0xff] %v4030_v23  ;;  %5858 = vst [vmem:[#allocation201_spill] sm:$0xff] %v4033_v4  ;;  %v289_v4 = vld [vmem:[#allocation2 + $0x7c8] sm:$0x3]  ;;  %v4051_v23 = vmul.f32 %v3362_v13, %v268_v33  ;;  %v294_v1 = vld [vmem:[#allocation2 + $0x7f0] sm:$0x3]  ;;  %v4069_v33 = vmul.f32 %v3362_v13, %v274_v35 }
 0x111   :  { %5859 = vst [vmem:[#allocation202_spill] sm:$0xff] %v4036_v59  ;;  %5860 = vst [vmem:[#allocation203_spill] sm:$0xff] %v4039_v27  ;;  %v291_v59 = vld [vmem:[#allocation2 + $0x7d8] sm:$0x3]  ;;  %v4066_v27 = vmul.f32 %v3362_v13, %v273_v32  ;;  %v296_v19 = vld [vmem:[#allocation2 + $0x800] sm:$0x3]  ;;  %v4084_v32 = vmul.f32 %v3362_v13, %v279_v43 }
 0x112   :  { %5861 = vst [vmem:[#allocation204_spill] sm:$0xff] %v4042_v34  ;;  %5862 = vst [vmem:[#allocation205_spill] sm:$0xff] %v4045_v12  ;;  %v293_v12 = vld [vmem:[#allocation2 + $0x7e8] sm:$0x3]  ;;  %v4063_v34 = vmul.f32 %v3362_v13, %v272_v25  ;;  %v298_v9 = vld [vmem:[#allocation2 + $0x810] sm:$0x3]  ;;  %v4081_v25 = vmul.f32 %v3362_v13, %v278_v48 }
 0x113   :  { %5863 = vst [vmem:[#allocation206_spill] sm:$0xff] %v4048_v3  ;;  %5864 = vst [vmem:[#allocation207_spill] sm:$0xff] %v4051_v23  ;;  %v295_v3 = vld [vmem:[#allocation2 + $0x7f8] sm:$0x3]  ;;  %v4078_v23 = vmul.f32 %v3362_v13, %v277_v24  ;;  %v300_v35 = vld [vmem:[#allocation2 + $0x820] sm:$0x3]  ;;  %v4096_v24 = vmul.f32 %v3362_v13, %v283_v42 }
 0x114   :  { %5865 = vst [vmem:[#allocation208_spill] sm:$0xff] %v4054_v22  ;;  %5866 = vst [vmem:[#allocation209_spill] sm:$0xff] %v4057_v21  ;;  %v297_v21 = vld [vmem:[#allocation2 + $0x808] sm:$0x3]  ;;  %v4075_v22 = vmul.f32 %v3362_v13, %v276_v41  ;;  %v302_v18 = vld [vmem:[#allocation2 + $0x830] sm:$0x3]  ;;  %v4093_v41 = vmul.f32 %v3362_v13, %v282_v40 }
 0x115   :  { %5867 = vst [vmem:[#allocation210_spill] sm:$0xff] %v4060_v11  ;;  %5868 = vst [vmem:[#allocation211_spill] sm:$0xff] %v4063_v34  ;;  %v299_v11 = vld [vmem:[#allocation2 + $0x818] sm:$0x3]  ;;  %v4090_v34 = vmul.f32 %v3362_v13, %v281_v52  ;;  %v304_v48 = vld [vmem:[#allocation2 + $0x840] sm:$0x3]  ;;  %v4108_v52 = vmul.f32 %v3362_v13, %v287_v51 }
 0x116   :  { %5869 = vst [vmem:[#allocation212_spill] sm:$0xff] %v4066_v27  ;;  %5870 = vst [vmem:[#allocation213_spill] sm:$0xff] %v4069_v33  ;;  %v301_v33 = vld [vmem:[#allocation2 + $0x828] sm:$0x3]  ;;  %v4087_v27 = vmul.f32 %v3362_v13, %v280_v50  ;;  %v306_v43 = vld [vmem:[#allocation2 + $0x850] sm:$0x3]  ;;  %v4105_v50 = vmul.f32 %v3362_v13, %v286_v49 }
 0x117   :  { %5871 = vst [vmem:[#allocation214_spill] sm:$0xff] %v4072_v20  ;;  %5872 = vst [vmem:[#allocation215_spill] sm:$0xff] %v4075_v22  ;;  %v303_v20 = vld [vmem:[#allocation2 + $0x838] sm:$0x3]  ;;  %v4102_v22 = vmul.f32 %v3362_v13, %v285_v60  ;;  %v308_v40 = vld [vmem:[#allocation2 + $0x860] sm:$0x3]  ;;  %v4120_v60 = vmul.f32 %v3362_v13, %v291_v59 }
 0x118   :  { %5873 = vst [vmem:[#allocation216_spill] sm:$0xff] %v4078_v23  ;;  %5874 = vst [vmem:[#allocation217_spill] sm:$0xff] %v4081_v25  ;;  %v305_v25 = vld [vmem:[#allocation2 + $0x848] sm:$0x3]  ;;  %v4099_v23 = vmul.f32 %v3362_v13, %v284_v58  ;;  %v310_v42 = vld [vmem:[#allocation2 + $0x870] sm:$0x3]  ;;  %v4117_v58 = vmul.f32 %v3362_v13, %v290_v57 }
 0x119   :  { %5875 = vst [vmem:[#allocation218_spill] sm:$0xff] %v4084_v32  ;;  %5876 = vst [vmem:[#allocation219_spill] sm:$0xff] %v4087_v27  ;;  %v307_v32 = vld [vmem:[#allocation2 + $0x858] sm:$0x3]  ;;  %v4114_v27 = vmul.f32 %v3362_v13, %v289_v4  ;;  %v312_v49 = vld [vmem:[#allocation2 + $0x880] sm:$0x3]  ;;  %v4132_v4 = vmul.f32 %v3362_v13, %v295_v3 }
 0x11a   :  { %5877 = vst [vmem:[#allocation220_spill] sm:$0xff] %v4090_v34  ;;  %5878 = vst [vmem:[#allocation221_spill] sm:$0xff] %v4093_v41  ;;  %v309_v41 = vld [vmem:[#allocation2 + $0x868] sm:$0x3]  ;;  %v4111_v34 = vmul.f32 %v3362_v13, %v288_v2  ;;  %v314_v51 = vld [vmem:[#allocation2 + $0x890] sm:$0x3]  ;;  %v4129_v2 = vmul.f32 %v3362_v13, %v294_v1 }
 0x11b   :  { %5879 = vst [vmem:[#allocation222_spill] sm:$0xff] %v4096_v24  ;;  %5880 = vst [vmem:[#allocation223_spill] sm:$0xff] %v4099_v23  ;;  %v311_v24 = vld [vmem:[#allocation2 + $0x878] sm:$0x3]  ;;  %v4126_v23 = vmul.f32 %v3362_v13, %v293_v12  ;;  %v316_v57 = vld [vmem:[#allocation2 + $0x8a0] sm:$0x3]  ;;  %v4144_v12 = vmul.f32 %v3362_v13, %v299_v11 }
 0x11c   :  { %5881 = vst [vmem:[#allocation224_spill] sm:$0xff] %v4102_v22  ;;  %5882 = vst [vmem:[#allocation225_spill] sm:$0xff] %v4105_v50  ;;  %v313_v50 = vld [vmem:[#allocation2 + $0x888] sm:$0x3]  ;;  %v4123_v22 = vmul.f32 %v3362_v13, %v292_v10  ;;  %v318_v59 = vld [vmem:[#allocation2 + $0x8b0] sm:$0x3]  ;;  %v4141_v10 = vmul.f32 %v3362_v13, %v298_v9 }
 0x11d   :  { %5883 = vst [vmem:[#allocation226_spill] sm:$0xff] %v4108_v52  ;;  %5884 = vst [vmem:[#allocation227_spill] sm:$0xff] %v4111_v34  ;;  %v315_v52 = vld [vmem:[#allocation2 + $0x898] sm:$0x3]  ;;  %v4138_v34 = vmul.f32 %v3362_v13, %v297_v21  ;;  %v320_v1 = vld [vmem:[#allocation2 + $0x8c0] sm:$0x3]  ;;  %v4156_v21 = vmul.f32 %v3362_v13, %v303_v20 }
 0x11e   :  { %5885 = vst [vmem:[#allocation228_spill] sm:$0xff] %v4114_v27  ;;  %5886 = vst [vmem:[#allocation229_spill] sm:$0xff] %v4117_v58  ;;  %v317_v58 = vld [vmem:[#allocation2 + $0x8a8] sm:$0x3]  ;;  %v4135_v27 = vmul.f32 %v3362_v13, %v296_v19  ;;  %v322_v3 = vld [vmem:[#allocation2 + $0x8d0] sm:$0x3]  ;;  %v4153_v19 = vmul.f32 %v3362_v13, %v302_v18 }
 0x11f   :  { %5887 = vst [vmem:[#allocation230_spill] sm:$0xff] %v4120_v60  ;;  %5888 = vst [vmem:[#allocation231_spill] sm:$0xff] %v4123_v22  ;;  %v319_v60 = vld [vmem:[#allocation2 + $0x8b8] sm:$0x3]  ;;  %v4150_v22 = vmul.f32 %v3362_v13, %v301_v33  ;;  %v324_v9 = vld [vmem:[#allocation2 + $0x8e0] sm:$0x3]  ;;  %v4168_v33 = vmul.f32 %v3362_v13, %v307_v32 }
 0x120   :  { %5889 = vst [vmem:[#allocation232_spill] sm:$0xff] %v4126_v23  ;;  %5890 = vst [vmem:[#allocation233_spill] sm:$0xff] %v4129_v2  ;;  %v321_v2 = vld [vmem:[#allocation2 + $0x8c8] sm:$0x3]  ;;  %v4147_v23 = vmul.f32 %v3362_v13, %v300_v35  ;;  %v326_v11 = vld [vmem:[#allocation2 + $0x8f0] sm:$0x3]  ;;  %v4165_v35 = vmul.f32 %v3362_v13, %v306_v43 }
 0x121   :  { %5891 = vst [vmem:[#allocation234_spill] sm:$0xff] %v4132_v4  ;;  %5892 = vst [vmem:[#allocation235_spill] sm:$0xff] %v4135_v27  ;;  %v323_v4 = vld [vmem:[#allocation2 + $0x8d8] sm:$0x3]  ;;  %v4162_v27 = vmul.f32 %v3362_v13, %v305_v25  ;;  %v328_v18 = vld [vmem:[#allocation2 + $0x900] sm:$0x3]  ;;  %v4180_v25 = vmul.f32 %v3362_v13, %v311_v24 }
 0x122   :  { %5893 = vst [vmem:[#allocation236_spill] sm:$0xff] %v4138_v34  ;;  %5894 = vst [vmem:[#allocation237_spill] sm:$0xff] %v4141_v10  ;;  %v325_v10 = vld [vmem:[#allocation2 + $0x8e8] sm:$0x3]  ;;  %v4159_v34 = vmul.f32 %v3362_v13, %v304_v48  ;;  %v330_v20 = vld [vmem:[#allocation2 + $0x910] sm:$0x3]  ;;  %v4177_v48 = vmul.f32 %v3362_v13, %v310_v42 }
 0x123   :  { %5895 = vst [vmem:[#allocation238_spill] sm:$0xff] %v4144_v12  ;;  %5896 = vst [vmem:[#allocation239_spill] sm:$0xff] %v4147_v23  ;;  %v327_v12 = vld [vmem:[#allocation2 + $0x8f8] sm:$0x3]  ;;  %v4174_v23 = vmul.f32 %v3362_v13, %v309_v41  ;;  %v332_v43 = vld [vmem:[#allocation2 + $0x920] sm:$0x3]  ;;  %v4192_v41 = vmul.f32 %v3362_v13, %v315_v52 }
 0x124   :  { %5897 = vst [vmem:[#allocation240_spill] sm:$0xff] %v4150_v22  ;;  %5898 = vst [vmem:[#allocation241_spill] sm:$0xff] %v4153_v19  ;;  %v329_v19 = vld [vmem:[#allocation2 + $0x908] sm:$0x3]  ;;  %v4171_v22 = vmul.f32 %v3362_v13, %v308_v40  ;;  %v334_v32 = vld [vmem:[#allocation2 + $0x930] sm:$0x3]  ;;  %v4189_v40 = vmul.f32 %v3362_v13, %v314_v51 }
 0x125   :  { %5899 = vst [vmem:[#allocation242_spill] sm:$0xff] %v4156_v21  ;;  %5900 = vst [vmem:[#allocation243_spill] sm:$0xff] %v4159_v34  ;;  %v331_v21 = vld [vmem:[#allocation2 + $0x918] sm:$0x3]  ;;  %v4186_v34 = vmul.f32 %v3362_v13, %v313_v50  ;;  %v336_v42 = vld [vmem:[#allocation2 + $0x940] sm:$0x3]  ;;  %v4204_v50 = vmul.f32 %v3362_v13, %v319_v60 }
 0x126   :  { %5901 = vst [vmem:[#allocation244_spill] sm:$0xff] %v4162_v27  ;;  %5902 = vst [vmem:[#allocation245_spill] sm:$0xff] %v4165_v35  ;;  %v333_v35 = vld [vmem:[#allocation2 + $0x928] sm:$0x3]  ;;  %v4183_v27 = vmul.f32 %v3362_v13, %v312_v49  ;;  %v338_v24 = vld [vmem:[#allocation2 + $0x950] sm:$0x3]  ;;  %v4201_v49 = vmul.f32 %v3362_v13, %v318_v59 }
 0x127   :  { %5903 = vst [vmem:[#allocation246_spill] sm:$0xff] %v4168_v33  ;;  %5904 = vst [vmem:[#allocation247_spill] sm:$0xff] %v4171_v22  ;;  %v335_v33 = vld [vmem:[#allocation2 + $0x938] sm:$0x3]  ;;  %v4198_v22 = vmul.f32 %v3362_v13, %v317_v58  ;;  %v340_v51 = vld [vmem:[#allocation2 + $0x960] sm:$0x3]  ;;  %v4216_v58 = vmul.f32 %v3362_v13, %v323_v4 }
 0x128   :  { %5905 = vst [vmem:[#allocation248_spill] sm:$0xff] %v4174_v23  ;;  %5906 = vst [vmem:[#allocation249_spill] sm:$0xff] %v4177_v48  ;;  %v337_v48 = vld [vmem:[#allocation2 + $0x948] sm:$0x3]  ;;  %v4195_v23 = vmul.f32 %v3362_v13, %v316_v57  ;;  %v342_v52 = vld [vmem:[#allocation2 + $0x970] sm:$0x3]  ;;  %v4213_v57 = vmul.f32 %v3362_v13, %v322_v3 }
 0x129   :  { %5907 = vst [vmem:[#allocation250_spill] sm:$0xff] %v4180_v25  ;;  %5908 = vst [vmem:[#allocation251_spill] sm:$0xff] %v4186_v34  ;;  %v339_v25 = vld [vmem:[#allocation2 + $0x958] sm:$0x3]  ;;  %v4210_v34 = vmul.f32 %v3362_v13, %v321_v2  ;;  %v345_v60 = vld [vmem:[#allocation2 + $0x988] sm:$0x3]  ;;  %v4228_v2 = vmul.f32 %v3362_v13, %v327_v12  ;;  %v4243_v12 = vmul.f32 %v3362_v13, %v332_v43 }
 0x12a   :  { %5909 = vst [vmem:[#allocation252_spill] sm:$0xff] %v4189_v40  ;;  %5910 = vst [vmem:[#allocation253_spill] sm:$0xff] %v4192_v41  ;;  %v341_v40 = vld [vmem:[#allocation2 + $0x968] sm:$0x3]  ;;  %v4207_v41 = vmul.f32 %v3362_v13, %v320_v1  ;;  %v343_v59 = vld [vmem:[#allocation2 + $0x978] sm:$0x3]  ;;  %v4225_v1 = vmul.f32 %v3362_v13, %v326_v11  ;;  %v4261_v43 = vmul.f32 %v3362_v13, %v338_v24 }
 0x12b   :  { %5911 = vst [vmem:[#allocation254_spill] sm:$0xff] %v4198_v22  ;;  %5912 = vst [vmem:[#allocation255_spill] sm:$0xff] %v4201_v49  ;;  %v344_v49 = vld [vmem:[#allocation2 + $0x980] sm:$0x3]  ;;  %v4222_v22 = vmul.f32 %v3362_v13, %v325_v10  ;;  %v346_v3 = vld [vmem:[#allocation2 + $0x990] sm:$0x3]  ;;  %v4240_v10 = vmul.f32 %v3362_v13, %v331_v21  ;;  %v4255_v21 = vmul.f32 %v3362_v13, %v336_v42 }
 0x12c   :  { %5913 = vst [vmem:[#allocation256_spill] sm:$0xff] %v4204_v50  ;;  %5914 = vst [vmem:[#allocation257_spill] sm:$0xff] %v4210_v34  ;;  %v4219_v50 = vmul.f32 %v3362_v13, %v324_v9  ;;  %v348_v4 = vld [vmem:[#allocation2 + $0x9a0] sm:$0x3]  ;;  %v4234_v34 = vmul.f32 %v3362_v13, %v329_v19  ;;  %v4237_v9 = vmul.f32 %v3362_v13, %v330_v20  ;;  %v349_v11 = vld [vmem:[#allocation2 + $0x9a8] sm:$0x3] }
 0x12d   :  { %5915 = vst [vmem:[#allocation258_spill] sm:$0xff] %v4213_v57  ;;  %5916 = vst [vmem:[#allocation259_spill] sm:$0xff] %v4216_v58  ;;  %v347_v57 = vld [vmem:[#allocation2 + $0x998] sm:$0x3]  ;;  %v4231_v58 = vmul.f32 %v3362_v13, %v328_v18  ;;  %v4249_v18 = vmul.f32 %v3362_v13, %v334_v32  ;;  %v4252_v19 = vmul.f32 %v3362_v13, %v335_v33  ;;  %v352_v20 = vld [vmem:[#allocation2 + $0x9c0] sm:$0x3] }
 0x12e   :  { %5917 = vst [vmem:[#allocation260_spill] sm:$0xff] %v4222_v22  ;;  %5918 = vst [vmem:[#allocation261_spill] sm:$0xff] %v4225_v1  ;;  %v350_v1 = vld [vmem:[#allocation2 + $0x9b0] sm:$0x3]  ;;  %v351_v22 = vld [vmem:[#allocation2 + $0x9b8] sm:$0x3]  ;;  %v4267_v33 = vmul.f32 %v3362_v13, %v340_v51  ;;  %v4273_v42 = vmul.f32 %v3362_v13, %v342_v52  ;;  %v4285_v51 = vmul.f32 %v3362_v13, %v346_v3 }
 0x12f   :  { %5919 = vst [vmem:[#allocation262_spill] sm:$0xff] %v4228_v2  ;;  %5920 = vst [vmem:[#allocation263_spill] sm:$0xff] %v4234_v34  ;;  %v4246_v2 = vmul.f32 %v3362_v13, %v333_v35  ;;  %v354_v34 = vld [vmem:[#allocation2 + $0x9d0] sm:$0x3]  ;;  %v4264_v35 = vmul.f32 %v3362_v13, %v339_v25  ;;  %v355_v32 = vld [vmem:[#allocation2 + $0x9d8] sm:$0x3]  ;;  %v4279_v25 = vmul.f32 %v3362_v13, %v344_v49 }
 0x130   :  { %5921 = vst [vmem:[#allocation264_spill] sm:$0xff] %v4237_v9  ;;  %5922 = vst [vmem:[#allocation265_spill] sm:$0xff] %v4240_v10  ;;  %v353_v9 = vld [vmem:[#allocation2 + $0x9c8] sm:$0x3]  ;;  %v4258_v10 = vmul.f32 %v3362_v13, %v337_v48  ;;  %v4276_v48 = vmul.f32 %v3362_v13, %v343_v59  ;;  %v358_v24 = vld [vmem:[#allocation2 + $0x9f0] sm:$0x3]  ;;  %v4291_v59 = vmul.f32 %v3362_v13, %v348_v4 }
 0x131   :  { %5923 = vst [vmem:[#allocation266_spill] sm:$0xff] %v4246_v2  ;;  %5924 = vst [vmem:[#allocation267_spill] sm:$0xff] %v4249_v18  ;;  %v356_v18 = vld [vmem:[#allocation2 + $0x9e0] sm:$0x3]  ;;  %v357_v2 = vld [vmem:[#allocation2 + $0x9e8] sm:$0x3]  ;;  %v4297_v49 = vmul.f32 %v3362_v13, %v350_v1  ;;  %v4303_v3 = vmul.f32 %v3362_v13, %v352_v20  ;;  %v4312_v4 = vmul.f32 %v3362_v13, %v355_v32 }
 0x132   :  { %5925 = vst [vmem:[#allocation268_spill] sm:$0xff] %v4252_v19  ;;  %5926 = vst [vmem:[#allocation269_spill] sm:$0xff] %v4258_v10  ;;  %v4270_v19 = vmul.f32 %v3362_v13, %v341_v40  ;;  %v360_v10 = vld [vmem:[#allocation2 + $0xa00] sm:$0x3]  ;;  %v4288_v40 = vmul.f32 %v3362_v13, %v347_v57  ;;  %v361_v52 = vld [vmem:[#allocation2 + $0xa08] sm:$0x3]  ;;  %v4306_v57 = vmul.f32 %v3362_v13, %v353_v9 }
 0x133   :  { %5927 = vst [vmem:[#allocation270_spill] sm:$0xff] %v4261_v43  ;;  %5928 = vst [vmem:[#allocation271_spill] sm:$0xff] %v4264_v35  ;;  %v359_v43 = vld [vmem:[#allocation2 + $0x9f8] sm:$0x3]  ;;  %v4282_v35 = vmul.f32 %v3362_v13, %v345_v60  ;;  %v4300_v60 = vmul.f32 %v3362_v13, %v351_v22  ;;  %v4318_v1 = vmul.f32 %v3362_v13, %v357_v2  ;;  %v701_v2 = vsel %vm700_vm0, %v3365_v28, 0.0 }
 0x134   :  { %5929 = vst [vmem:[#allocation272_spill] sm:$0xff] %v4270_v19  ;;  %5930 = vst [vmem:[#allocation273_spill] sm:$0xff] %v4273_v42  ;;  %v362_v42 = vld [vmem:[#allocation2 + $0xa10] sm:$0x3]  ;;  %v363_v19 = vld [vmem:[#allocation2 + $0xa18] sm:$0x3]  ;;  %v4321_v22 = vmul.f32 %v3362_v13, %v358_v24  ;;  %v4324_v20 = vmul.f32 %v3362_v13, %v359_v43  ;;  %v4327_v9 = vmul.f32 %v3362_v13, %v360_v10 }
 0x135   :  { %5931 = vst [vmem:[#allocation274_spill] sm:$0xff] %v4276_v48  ;;  %5932 = vst [vmem:[#allocation275_spill] sm:$0xff] %v4288_v40  ;;  %v4294_v48 = vmul.f32 %v3362_v13, %v349_v11  ;;  %v4309_v40 = vmul.f32 %v3362_v13, %v354_v34  ;;  %v4315_v11 = vmul.f32 %v3362_v13, %v356_v18  ;;  %v709_v24 = vsel %vm700_vm0, %v3368_v29, 0.0 }
 0x136   :  { %5933 = vst [vmem:[#allocation276_spill] sm:$0xff] %v4303_v3  ;;  %5934 = vst [vmem:[#allocation277_spill] sm:$0xff] %v4306_v57  ;;  %v4330_v34 = vmul.f32 %v3362_v13, %v361_v52  ;;  %v4333_v32 = vmul.f32 %v3362_v13, %v362_v42  ;;  %v4336_v18 = vmul.f32 %v3362_v13, %v363_v19  ;;  %v717_v43 = vsel %vm700_vm0, %v3371_v30, 0.0 }
 0x137   :  { %5935 = vst [vmem:[#allocation278_spill] sm:$0xff] %v4309_v40  ;;  %5936 = vst [vmem:[#allocation279_spill] sm:$0xff] %v4312_v4  ;;  %v725_v10 = vsel %vm700_vm0, %v3374_v31, 0.0  ;;  %v702_v52 = vadd.f32 %v701_v2, %v3415_v61  ;;  %v710_v42 = vadd.f32 %v709_v24, %v3418_v62  ;;  %v733_v28 = vsel %vm700_vm0, %v3377_v36, 0.0 }
 0x138   :  { %5937 = vst [vmem:[#allocation280_spill] sm:$0xff] %v4315_v11  ;;  %5938 = vst [vmem:[#allocation281_spill] sm:$0xff] %v4318_v1  ;;  %v726_v13 = vadd.f32 %v725_v10, %v3424_v0  ;;  %v741_v29 = vsel %vm700_vm0, %v3380_v37, 0.0  ;;  %v749_v30 = vsel %vm700_vm0, %v3383_v38, 0.0  ;;  %v757_v31 = vsel %vm700_vm0, %v3386_v39, 0.0 }
 0x139   :  { %5939 = vst [vmem:[#allocation282_spill] sm:$0xff] %v4321_v22  ;;  %5940 = vst [vmem:[#allocation283_spill] sm:$0xff] %v4324_v20  ;;  %v703_v19 = vrot.slane %v702_v52, 4  ;;  %v711_v61 = vrot.slane %v710_v42, 4  ;;  %v742_v0 = vadd.f32 %v741_v29, %v3430_v6  ;;  %v750_v24 = vadd.f32 %v749_v30, %v3433_v7 }
 0x13a   :  { %5941 = vst [vmem:[#allocation284_spill] sm:$0xff] %v4327_v9  ;;  %5942 = vst [vmem:[#allocation285_spill] sm:$0xff] %v4330_v34  ;;  %v727_v62 = vrot.slane %v726_v13, 4  ;;  %v758_v36 = vadd.f32 %v757_v31, %v3436_v8 }
 0x13b   :  { %5943 = vst [vmem:[#allocation286_spill] sm:$0xff] %v4333_v32  ;;  %5944 = vst [vmem:[#allocation287_spill] sm:$0xff] %v4336_v18  ;;  %v718_v32 = vadd.f32 %v717_v43, %v3421_v63  ;;  %v734_v63 = vadd.f32 %v733_v28, %v3427_v5  ;;  %v704_v43 = vadd.f32 %v703_v19, %v702_v52  ;;  %v743_v34 = vrot.slane %v742_v0, 4 }
 0x13c   :  { %v712_v37 = vadd.f32 %v711_v61, %v710_v42  ;;  %v728_v18 = vadd.f32 %v727_v62, %v726_v13  ;;  %v751_v9 = vrot.slane %v750_v24, 4  ;;  %v759_v39 = vrot.slane %v758_v36, 4 }
 0x13d   :  { %v719_v2 = vrot.slane %v718_v32, 4  ;;  %v735_v38 = vrot.slane %v734_v63, 4  ;;  %v705_v20 = vrot.slane %v704_v43, 2  ;;  %v744_v5 = vadd.f32 %v743_v34, %v742_v0 }
 0x13e   :  { %v713_v22 = vrot.slane %v712_v37, 2  ;;  %v729_v11 = vrot.slane %v728_v18, 2  ;;  %v752_v28 = vadd.f32 %v751_v9, %v750_v24  ;;  %v760_v6 = vadd.f32 %v759_v39, %v758_v36 }
 0x13f   :  { %v720_v10 = vadd.f32 %v719_v2, %v718_v32  ;;  %v736_v4 = vadd.f32 %v735_v38, %v734_v63  ;;  %v706_v29 = vadd.f32 %v705_v20, %v704_v43  ;;  %v745_v42 = vrot.slane %v744_v5, 2 }
 0x140   :  { %v714_v7 = vadd.f32 %v713_v22, %v712_v37  ;;  %v730_v8 = vadd.f32 %v729_v11, %v728_v18  ;;  %v753_v32 = vrot.slane %v752_v28, 2  ;;  %v761_v13 = vrot.slane %v760_v6, 2 }
 0x141   :  { %v721_v1 = vrot.slane %v720_v10, 2  ;;  %v737_v52 = vrot.slane %v736_v4, 2  ;;  %v707_v31 = vrot.slane %v706_v29, 1  ;;  %v746_v40 = vadd.f32 %v745_v42, %v744_v5 }
 0x142   :  { %v715_v19 = vrot.slane %v714_v7, 1  ;;  %v731_v2 = vrot.slane %v730_v8, 1  ;;  %v754_v57 = vadd.f32 %v753_v32, %v752_v28  ;;  %v762_v3 = vadd.f32 %v761_v13, %v760_v6  ;;  %v5945_v6 = vld [vmem:[#allocation8_spill] sm:$0xff] }
 0x143   :  { %v722_v30 = vadd.f32 %v721_v1, %v720_v10  ;;  %v738_v62 = vadd.f32 %v737_v52, %v736_v4  ;;  %v4362_v63 = vadd.f32 %v707_v31, %v706_v29  ;;  %v747_v22 = vrot.slane %v746_v40, 1  ;;  %v5946_v29 = vld [vmem:[#allocation9_spill] sm:$0xff] }
 0x144   :  { %v4364_v9 = vadd.f32 %v715_v19, %v714_v7  ;;  %v4368_v1 = vadd.f32 %v731_v2, %v730_v8  ;;  %v755_v34 = vrot.slane %v754_v57, 1  ;;  %v763_v18 = vrot.slane %v762_v3, 1  ;;  %v5947_v7 = vld [vmem:[#allocation10_spill] sm:$0xff] }
 0x145   :  { %v723_v61 = vrot.slane %v722_v30, 1  ;;  %v739_v11 = vrot.slane %v738_v62, 1  ;;  %v765_v0 = vsel %vm700_vm0, %v3389_v44, 0.0  ;;  %v773_v4 = vsel %vm700_vm0, %v3392_v45, 0.0 }
 0x146   :  { %v781_v24 = vsel %vm700_vm0, %v3395_v46, 0.0  ;;  %v789_v36 = vsel %vm700_vm0, %v3398_v47, 0.0  ;;  %v4380_v37 = vadd.f32 %v747_v22, %v746_v40  ;;  %v4382_v10 = vadd.f32 %v755_v34, %v754_v57 }
 0x147   :  { %v4366_v20 = vadd.f32 %v723_v61, %v722_v30  ;;  %v4378_v43 = vadd.f32 %v739_v11, %v738_v62  ;;  %v4384_v38 = vadd.f32 %v763_v18, %v762_v3  ;;  %v766_v39 = vadd.f32 %v765_v0, %v3439_v14 }
 0x148   :  { %v774_v44 = vadd.f32 %v773_v4, %v3442_v15  ;;  %v782_v45 = vadd.f32 %v781_v24, %v3445_v16  ;;  %v790_v5 = vadd.f32 %v789_v36, %v3448_v17  ;;  %v797_v46 = vsel %vm700_vm0, %v3403_v53, 0.0  ;;  %v5948_v53 = vld [vmem:[#allocation11_spill] sm:$0xff] }
 0x149   :  { %v805_v47 = vsel %vm700_vm0, %v3406_v54, 0.0  ;;  %v813_v40 = vsel %vm700_vm0, %v3409_v55, 0.0  ;;  %v821_v3 = vsel %vm700_vm0, %v3412_v56, 0.0  ;;  %v767_v57 = vrot.slane %v766_v39, 4 }
 0x14a   :  { %v775_v14 = vrot.slane %v774_v44, 4  ;;  %v783_v28 = vrot.slane %v782_v45, 4  ;;  %v791_v15 = vrot.slane %v790_v5, 4  ;;  %v798_v16 = vadd.f32 %v797_v46, %v5945_v6 }
 0x14b   :  { %v806_v17 = vadd.f32 %v805_v47, %v5946_v29  ;;  %v814_v30 = vadd.f32 %v813_v40, %v5947_v7  ;;  %v822_v8 = vadd.f32 %v821_v3, %v5948_v53  ;;  %v768_v52 = vadd.f32 %v767_v57, %v766_v39 }
 0x14c   :  { %v776_v54 = vadd.f32 %v775_v14, %v774_v44  ;;  %v784_v42 = vadd.f32 %v783_v28, %v782_v45  ;;  %v792_v32 = vadd.f32 %v791_v15, %v790_v5  ;;  %v799_v55 = vrot.slane %v798_v16, 4 }
 0x14d   :  { %v807_v13 = vrot.slane %v806_v17, 4  ;;  %v815_v31 = vrot.slane %v814_v30, 4  ;;  %v823_v56 = vrot.slane %v822_v8, 4  ;;  %v769_v19 = vrot.slane %v768_v52, 2 }
 0x14e   :  { %v777_v61 = vrot.slane %v776_v54, 2  ;;  %v785_v2 = vrot.slane %v784_v42, 2  ;;  %v793_v62 = vrot.slane %v792_v32, 2  ;;  %v800_v11 = vadd.f32 %v799_v55, %v798_v16 }
 0x14f   :  { %v808_v22 = vadd.f32 %v807_v13, %v806_v17  ;;  %v816_v34 = vadd.f32 %v815_v31, %v814_v30  ;;  %v824_v18 = vadd.f32 %v823_v56, %v822_v8  ;;  %v770_v0 = vadd.f32 %v769_v19, %v768_v52  ;;  %v5951_v13 = vld [vmem:[#allocation160_spill] sm:$0xff] }
 0x150   :  { %v778_v4 = vadd.f32 %v777_v61, %v776_v54  ;;  %v786_v24 = vadd.f32 %v785_v2, %v784_v42  ;;  %v794_v36 = vadd.f32 %v793_v62, %v792_v32  ;;  %v801_v39 = vrot.slane %v800_v11, 2  ;;  %v5949_v54 = vld [vmem:[#allocation158_spill] sm:$0xff]  ;;  %v5950_v32 = vld [vmem:[#allocation159_spill] sm:$0xff]  ;;  %v5955_v62 = vld [vmem:[#allocation12_spill] sm:$0xff] }
 0x151   :  { %v809_v44 = vrot.slane %v808_v22, 2  ;;  %v817_v45 = vrot.slane %v816_v34, 2  ;;  %v825_v5 = vrot.slane %v824_v18, 2  ;;  %v771_v46 = vrot.slane %v770_v0, 1 }
 0x152   :  { %v779_v47 = vrot.slane %v778_v4, 1  ;;  %v787_v40 = vrot.slane %v786_v24, 1  ;;  %v795_v3 = vrot.slane %v794_v36, 1  ;;  %v802_v57 = vadd.f32 %v801_v39, %v800_v11  ;;  %v5960_v39 = vld [vmem:[#allocation162_spill] sm:$0xff] }
 0x153   :  { %v810_v14 = vadd.f32 %v809_v44, %v808_v22  ;;  %v818_v28 = vadd.f32 %v817_v45, %v816_v34  ;;  %v826_v15 = vadd.f32 %v825_v5, %v824_v18  ;;  %v4402_v6 = vadd.f32 %v771_v46, %v770_v0  ;;  %v5957_v34 = vld [vmem:[#allocation14_spill] sm:$0xff]  ;;  %v5958_v0 = vld [vmem:[#allocation15_spill] sm:$0xff]  ;;  %v5962_v46 = vld [vmem:[#allocation164_spill] sm:$0xff] }
 0x154   :  { %v4404_v16 = vadd.f32 %v779_v47, %v778_v4  ;;  %v4406_v29 = vadd.f32 %v787_v40, %v786_v24  ;;  %v4408_v17 = vadd.f32 %v795_v3, %v794_v36  ;;  %v803_v7 = vrot.slane %v802_v57, 1  ;;  %v5959_v24 = vld [vmem:[#allocation161_spill] sm:$0xff]  ;;  %v5961_v45 = vld [vmem:[#allocation163_spill] sm:$0xff] }
 0x155   :  { %v811_v30 = vrot.slane %v810_v14, 1  ;;  %v819_v53 = vrot.slane %v818_v28, 1  ;;  %v827_v8 = vrot.slane %v826_v15, 1  ;;  %v829_v52 = vsel %vm700_vm0, %v3901_v26, 0.0  ;;  %v5956_v26 = vld [vmem:[#allocation13_spill] sm:$0xff] }
 0x156   :  { %v837_v42 = vsel %vm700_vm0, %v5949_v54, 0.0  ;;  %v845_v55 = vsel %vm700_vm0, %v5950_v32, 0.0  ;;  %v853_v31 = vsel %vm700_vm0, %v5951_v13, 0.0  ;;  %v4418_v56 = vadd.f32 %v803_v7, %v802_v57  ;;  %v5964_v7 = vld [vmem:[#allocation17_spill] sm:$0xff] }
 0x157   :  { %v4420_v19 = vadd.f32 %v811_v30, %v810_v14  ;;  %v4422_v61 = vadd.f32 %v819_v53, %v818_v28  ;;  %v4424_v2 = vadd.f32 %v827_v8, %v826_v15  ;;  %v830_v11 = vadd.f32 %v829_v52, %v5955_v62  ;;  %v5963_v28 = vld [vmem:[#allocation16_spill] sm:$0xff]  ;;  %v5965_v53 = vld [vmem:[#allocation18_spill] sm:$0xff]  ;;  %v5966_v52 = vld [vmem:[#allocation19_spill] sm:$0xff] }
 0x158   :  { %5952 = vst [vmem:[#allocation8_spill] sm:$0xff] %v4418_v56  ;;  %v838_v22 = vadd.f32 %v837_v42, %v5956_v26  ;;  %v846_v18 = vadd.f32 %v845_v55, %v5957_v34  ;;  %v854_v4 = vadd.f32 %v853_v31, %v5958_v0  ;;  %v861_v36 = vsel %vm700_vm0, %v5959_v24, 0.0 }
 0x159   :  { %5953 = vst [vmem:[#allocation9_spill] sm:$0xff] %v4422_v61  ;;  %5954 = vst [vmem:[#allocation10_spill] sm:$0xff] %v4424_v2  ;;  %v869_v44 = vsel %vm700_vm0, %v5960_v39, 0.0  ;;  %v877_v5 = vsel %vm700_vm0, %v5961_v45, 0.0  ;;  %v885_v47 = vsel %vm700_vm0, %v5962_v46, 0.0  ;;  %v831_v40 = vrot.slane %v830_v11, 4 }
 0x15a   :  { %v839_v3 = vrot.slane %v838_v22, 4  ;;  %v847_v57 = vrot.slane %v846_v18, 4  ;;  %v855_v14 = vrot.slane %v854_v4, 4  ;;  %v862_v15 = vadd.f32 %v861_v36, %v5963_v28 }
 0x15b   :  { %v870_v30 = vadd.f32 %v869_v44, %v5964_v7  ;;  %v878_v8 = vadd.f32 %v877_v5, %v5965_v53  ;;  %v886_v54 = vadd.f32 %v885_v47, %v5966_v52  ;;  %v832_v42 = vadd.f32 %v831_v40, %v830_v11 }
 0x15c   :  { %v840_v32 = vadd.f32 %v839_v3, %v838_v22  ;;  %v848_v55 = vadd.f32 %v847_v57, %v846_v18  ;;  %v856_v13 = vadd.f32 %v855_v14, %v854_v4  ;;  %v863_v31 = vrot.slane %v862_v15, 4 }
 0x15d   :  { %v871_v62 = vrot.slane %v870_v30, 4  ;;  %v879_v26 = vrot.slane %v878_v8, 4  ;;  %v887_v34 = vrot.slane %v886_v54, 4  ;;  %v833_v0 = vrot.slane %v832_v42, 2 }
 0x15e   :  { %v841_v24 = vrot.slane %v840_v32, 2  ;;  %v849_v39 = vrot.slane %v848_v55, 2  ;;  %v857_v45 = vrot.slane %v856_v13, 2  ;;  %v864_v46 = vadd.f32 %v863_v31, %v862_v15  ;;  %v5971_v31 = vld [vmem:[#allocation165_spill] sm:$0xff] }
 0x15f   :  { %v872_v36 = vadd.f32 %v871_v62, %v870_v30  ;;  %v880_v28 = vadd.f32 %v879_v26, %v878_v8  ;;  %v888_v44 = vadd.f32 %v887_v34, %v886_v54  ;;  %v834_v7 = vadd.f32 %v833_v0, %v832_v42  ;;  %v5972_v26 = vld [vmem:[#allocation166_spill] sm:$0xff]  ;;  %v5973_v0 = vld [vmem:[#allocation167_spill] sm:$0xff] }
 0x160   :  { %v842_v5 = vadd.f32 %v841_v24, %v840_v32  ;;  %v850_v53 = vadd.f32 %v849_v39, %v848_v55  ;;  %v858_v47 = vadd.f32 %v857_v45, %v856_v13  ;;  %v865_v11 = vrot.slane %v864_v46, 2  ;;  %v5974_v39 = vld [vmem:[#allocation168_spill] sm:$0xff] }
 0x161   :  { %v873_v22 = vrot.slane %v872_v36, 2  ;;  %v881_v18 = vrot.slane %v880_v28, 2  ;;  %v889_v4 = vrot.slane %v888_v44, 2  ;;  %v835_v40 = vrot.slane %v834_v7, 1 }
 0x162   :  { %v843_v3 = vrot.slane %v842_v5, 1  ;;  %v851_v57 = vrot.slane %v850_v53, 1  ;;  %v859_v14 = vrot.slane %v858_v47, 1  ;;  %v866_v52 = vadd.f32 %v865_v11, %v864_v46  ;;  %v5981_v11 = vld [vmem:[#allocation22_spill] sm:$0xff] }
 0x163   :  { %v874_v61 = vadd.f32 %v873_v22, %v872_v36  ;;  %v882_v2 = vadd.f32 %v881_v18, %v880_v28  ;;  %v890_v56 = vadd.f32 %v889_v4, %v888_v44  ;;  %v4442_v15 = vadd.f32 %v835_v40, %v834_v7  ;;  %v5979_v7 = vld [vmem:[#allocation20_spill] sm:$0xff]  ;;  %v5982_v18 = vld [vmem:[#allocation23_spill] sm:$0xff]  ;;  %v5983_v40 = vld [vmem:[#allocation169_spill] sm:$0xff] }
 0x164   :  { %v4444_v30 = vadd.f32 %v843_v3, %v842_v5  ;;  %v4446_v8 = vadd.f32 %v851_v57, %v850_v53  ;;  %v4448_v54 = vadd.f32 %v859_v14, %v858_v47  ;;  %v867_v42 = vrot.slane %v866_v52, 1  ;;  %v5980_v53 = vld [vmem:[#allocation21_spill] sm:$0xff]  ;;  %v5984_v57 = vld [vmem:[#allocation170_spill] sm:$0xff] }
 0x165   :  { %5967 = vst [vmem:[#allocation11_spill] sm:$0xff] %v4442_v15  ;;  %v875_v32 = vrot.slane %v874_v61, 1  ;;  %v883_v55 = vrot.slane %v882_v2, 1  ;;  %v891_v13 = vrot.slane %v890_v56, 1  ;;  %v893_v62 = vsel %vm700_vm0, %v5971_v31, 0.0  ;;  %v5987_v31 = vld [vmem:[#allocation24_spill] sm:$0xff] }
 0x166   :  { %5968 = vst [vmem:[#allocation158_spill] sm:$0xff] %v4444_v30  ;;  %5969 = vst [vmem:[#allocation159_spill] sm:$0xff] %v4446_v8  ;;  %v901_v34 = vsel %vm700_vm0, %v5972_v26, 0.0  ;;  %v909_v24 = vsel %vm700_vm0, %v5973_v0, 0.0  ;;  %v917_v45 = vsel %vm700_vm0, %v5974_v39, 0.0  ;;  %v4458_v46 = vadd.f32 %v867_v42, %v866_v52  ;;  %v5986_v52 = vld [vmem:[#allocation172_spill] sm:$0xff] }
 0x167   :  { %5970 = vst [vmem:[#allocation160_spill] sm:$0xff] %v4448_v54  ;;  %v4460_v36 = vadd.f32 %v875_v32, %v874_v61  ;;  %v4462_v28 = vadd.f32 %v883_v55, %v882_v2  ;;  %v4464_v44 = vadd.f32 %v891_v13, %v890_v56  ;;  %v894_v5 = vadd.f32 %v893_v62, %v5979_v7  ;;  %v5985_v61 = vld [vmem:[#allocation171_spill] sm:$0xff]  ;;  %v5988_v26 = vld [vmem:[#allocation25_spill] sm:$0xff]  ;;  %v5989_v0 = vld [vmem:[#allocation26_spill] sm:$0xff] }
 0x168   :  { %5975 = vst [vmem:[#allocation12_spill] sm:$0xff] %v4458_v46  ;;  %v902_v47 = vadd.f32 %v901_v34, %v5980_v53  ;;  %v910_v22 = vadd.f32 %v909_v24, %v5981_v11  ;;  %v918_v4 = vadd.f32 %v917_v45, %v5982_v18  ;;  %v925_v3 = vsel %vm700_vm0, %v5983_v40, 0.0  ;;  %v5990_v39 = vld [vmem:[#allocation27_spill] sm:$0xff] }
 0x169   :  { %5976 = vst [vmem:[#allocation13_spill] sm:$0xff] %v4460_v36  ;;  %5977 = vst [vmem:[#allocation14_spill] sm:$0xff] %v4462_v28  ;;  %v933_v14 = vsel %vm700_vm0, %v5984_v57, 0.0  ;;  %v941_v2 = vsel %vm700_vm0, %v5985_v61, 0.0  ;;  %v949_v56 = vsel %vm700_vm0, %v5986_v52, 0.0  ;;  %v895_v42 = vrot.slane %v894_v5, 4 }
 0x16a   :  { %5978 = vst [vmem:[#allocation15_spill] sm:$0xff] %v4464_v44  ;;  %v903_v32 = vrot.slane %v902_v47, 4  ;;  %v911_v55 = vrot.slane %v910_v22, 4  ;;  %v919_v13 = vrot.slane %v918_v4, 4  ;;  %v926_v62 = vadd.f32 %v925_v3, %v5987_v31 }
 0x16b   :  { %v934_v34 = vadd.f32 %v933_v14, %v5988_v26  ;;  %v942_v24 = vadd.f32 %v941_v2, %v5989_v0  ;;  %v950_v45 = vadd.f32 %v949_v56, %v5990_v39  ;;  %v896_v7 = vadd.f32 %v895_v42, %v894_v5 }
 0x16c   :  { %v904_v53 = vadd.f32 %v903_v32, %v902_v47  ;;  %v912_v11 = vadd.f32 %v911_v55, %v910_v22  ;;  %v920_v18 = vadd.f32 %v919_v13, %v918_v4  ;;  %v927_v40 = vrot.slane %v926_v62, 4 }
 0x16d   :  { %v935_v57 = vrot.slane %v934_v34, 4  ;;  %v943_v61 = vrot.slane %v942_v24, 4  ;;  %v951_v52 = vrot.slane %v950_v45, 4  ;;  %v897_v28 = vrot.slane %v896_v7, 2 }
 0x16e   :  { %v905_v44 = vrot.slane %v904_v53, 2  ;;  %v913_v46 = vrot.slane %v912_v11, 2  ;;  %v921_v36 = vrot.slane %v920_v18, 2  ;;  %v928_v8 = vadd.f32 %v927_v40, %v926_v62 }
 0x16f   :  { %v936_v3 = vadd.f32 %v935_v57, %v934_v34  ;;  %v944_v31 = vadd.f32 %v943_v61, %v942_v24  ;;  %v952_v14 = vadd.f32 %v951_v52, %v950_v45  ;;  %v898_v26 = vadd.f32 %v897_v28, %v896_v7  ;;  %v5995_v7 = vld [vmem:[#allocation173_spill] sm:$0xff]  ;;  %v5998_v57 = vld [vmem:[#allocation176_spill] sm:$0xff] }
 0x170   :  { %v906_v2 = vadd.f32 %v905_v44, %v904_v53  ;;  %v914_v0 = vadd.f32 %v913_v46, %v912_v11  ;;  %v922_v56 = vadd.f32 %v921_v36, %v920_v18  ;;  %v929_v5 = vrot.slane %v928_v8, 2  ;;  %v5996_v11 = vld [vmem:[#allocation174_spill] sm:$0xff]  ;;  %v5997_v18 = vld [vmem:[#allocation175_spill] sm:$0xff] }
 0x171   :  { %v937_v47 = vrot.slane %v936_v3, 2  ;;  %v945_v22 = vrot.slane %v944_v31, 2  ;;  %v953_v4 = vrot.slane %v952_v14, 2  ;;  %v899_v42 = vrot.slane %v898_v26, 1 }
 0x172   :  { %v907_v32 = vrot.slane %v906_v2, 1  ;;  %v915_v55 = vrot.slane %v914_v0, 1  ;;  %v923_v13 = vrot.slane %v922_v56, 1  ;;  %v930_v39 = vadd.f32 %v929_v5, %v928_v8  ;;  %v6005_v5 = vld [vmem:[#allocation30_spill] sm:$0xff] }
 0x173   :  { %v938_v54 = vadd.f32 %v937_v47, %v936_v3  ;;  %v946_v15 = vadd.f32 %v945_v22, %v944_v31  ;;  %v954_v30 = vadd.f32 %v953_v4, %v952_v14  ;;  %v4482_v62 = vadd.f32 %v899_v42, %v898_v26  ;;  %v6003_v26 = vld [vmem:[#allocation28_spill] sm:$0xff]  ;;  %v6006_v22 = vld [vmem:[#allocation31_spill] sm:$0xff]  ;;  %v6007_v42 = vld [vmem:[#allocation177_spill] sm:$0xff] }
 0x174   :  { %v4484_v34 = vadd.f32 %v907_v32, %v906_v2  ;;  %v4486_v28 = vadd.f32 %v915_v55, %v914_v0  ;;  %v4488_v46 = vadd.f32 %v923_v13, %v922_v56  ;;  %v931_v36 = vrot.slane %v930_v39, 1  ;;  %v6004_v0 = vld [vmem:[#allocation29_spill] sm:$0xff]  ;;  %v6008_v55 = vld [vmem:[#allocation178_spill] sm:$0xff] }
 0x175   :  { %5991 = vst [vmem:[#allocation161_spill] sm:$0xff] %v4482_v62  ;;  %v939_v44 = vrot.slane %v938_v54, 1  ;;  %v947_v24 = vrot.slane %v946_v15, 1  ;;  %v955_v45 = vrot.slane %v954_v30, 1  ;;  %v957_v53 = vsel %vm700_vm0, %v5995_v7, 0.0  ;;  %v6011_v7 = vld [vmem:[#allocation32_spill] sm:$0xff] }
 0x176   :  { %5992 = vst [vmem:[#allocation162_spill] sm:$0xff] %v4484_v34  ;;  %5993 = vst [vmem:[#allocation163_spill] sm:$0xff] %v4486_v28  ;;  %v965_v8 = vsel %vm700_vm0, %v5996_v11, 0.0  ;;  %v973_v40 = vsel %vm700_vm0, %v5997_v18, 0.0  ;;  %v981_v61 = vsel %vm700_vm0, %v5998_v57, 0.0  ;;  %v4498_v52 = vadd.f32 %v931_v36, %v930_v39  ;;  %v6010_v39 = vld [vmem:[#allocation180_spill] sm:$0xff] }
 0x177   :  { %5994 = vst [vmem:[#allocation164_spill] sm:$0xff] %v4488_v46  ;;  %v4500_v3 = vadd.f32 %v939_v44, %v938_v54  ;;  %v4502_v31 = vadd.f32 %v947_v24, %v946_v15  ;;  %v4504_v14 = vadd.f32 %v955_v45, %v954_v30  ;;  %v958_v2 = vadd.f32 %v957_v53, %v6003_v26  ;;  %v6009_v54 = vld [vmem:[#allocation179_spill] sm:$0xff]  ;;  %v6012_v11 = vld [vmem:[#allocation33_spill] sm:$0xff]  ;;  %v6013_v18 = vld [vmem:[#allocation34_spill] sm:$0xff] }
 0x178   :  { %5999 = vst [vmem:[#allocation16_spill] sm:$0xff] %v4498_v52  ;;  %v966_v56 = vadd.f32 %v965_v8, %v6004_v0  ;;  %v974_v47 = vadd.f32 %v973_v40, %v6005_v5  ;;  %v982_v4 = vadd.f32 %v981_v61, %v6006_v22  ;;  %v989_v32 = vsel %vm700_vm0, %v6007_v42, 0.0  ;;  %v6014_v57 = vld [vmem:[#allocation35_spill] sm:$0xff] }
 0x179   :  { %6000 = vst [vmem:[#allocation17_spill] sm:$0xff] %v4500_v3  ;;  %6001 = vst [vmem:[#allocation18_spill] sm:$0xff] %v4502_v31  ;;  %v997_v13 = vsel %vm700_vm0, %v6008_v55, 0.0  ;;  %v1005_v15 = vsel %vm700_vm0, %v6009_v54, 0.0  ;;  %v1013_v30 = vsel %vm700_vm0, %v6010_v39, 0.0  ;;  %v959_v36 = vrot.slane %v958_v2, 4 }
 0x17a   :  { %6002 = vst [vmem:[#allocation19_spill] sm:$0xff] %v4504_v14  ;;  %v967_v44 = vrot.slane %v966_v56, 4  ;;  %v975_v24 = vrot.slane %v974_v47, 4  ;;  %v983_v45 = vrot.slane %v982_v4, 4  ;;  %v990_v53 = vadd.f32 %v989_v32, %v6011_v7 }
 0x17b   :  { %v998_v8 = vadd.f32 %v997_v13, %v6012_v11  ;;  %v1006_v40 = vadd.f32 %v1005_v15, %v6013_v18  ;;  %v1014_v61 = vadd.f32 %v1013_v30, %v6014_v57  ;;  %v960_v26 = vadd.f32 %v959_v36, %v958_v2 }
 0x17c   :  { %v968_v0 = vadd.f32 %v967_v44, %v966_v56  ;;  %v976_v5 = vadd.f32 %v975_v24, %v974_v47  ;;  %v984_v22 = vadd.f32 %v983_v45, %v982_v4  ;;  %v991_v42 = vrot.slane %v990_v53, 4 }
 0x17d   :  { %v999_v55 = vrot.slane %v998_v8, 4  ;;  %v1007_v54 = vrot.slane %v1006_v40, 4  ;;  %v1015_v39 = vrot.slane %v1014_v61, 4  ;;  %v961_v31 = vrot.slane %v960_v26, 2 }
 0x17e   :  { %v969_v14 = vrot.slane %v968_v0, 2  ;;  %v977_v52 = vrot.slane %v976_v5, 2  ;;  %v985_v3 = vrot.slane %v984_v22, 2  ;;  %v992_v28 = vadd.f32 %v991_v42, %v990_v53 }
 0x17f   :  { %v1000_v32 = vadd.f32 %v999_v55, %v998_v8  ;;  %v1008_v7 = vadd.f32 %v1007_v54, %v1006_v40  ;;  %v1016_v13 = vadd.f32 %v1015_v39, %v1014_v61  ;;  %v962_v11 = vadd.f32 %v961_v31, %v960_v26  ;;  %v6019_v26 = vld [vmem:[#allocation181_spill] sm:$0xff]  ;;  %v6022_v55 = vld [vmem:[#allocation184_spill] sm:$0xff] }
 0x180   :  { %v970_v15 = vadd.f32 %v969_v14, %v968_v0  ;;  %v978_v18 = vadd.f32 %v977_v52, %v976_v5  ;;  %v986_v30 = vadd.f32 %v985_v3, %v984_v22  ;;  %v993_v2 = vrot.slane %v992_v28, 2  ;;  %v6020_v5 = vld [vmem:[#allocation182_spill] sm:$0xff]  ;;  %v6021_v22 = vld [vmem:[#allocation183_spill] sm:$0xff] }
 0x181   :  { %v1001_v56 = vrot.slane %v1000_v32, 2  ;;  %v1009_v47 = vrot.slane %v1008_v7, 2  ;;  %v1017_v4 = vrot.slane %v1016_v13, 2  ;;  %v963_v36 = vrot.slane %v962_v11, 1 }
 0x182   :  { %v971_v44 = vrot.slane %v970_v15, 1  ;;  %v979_v24 = vrot.slane %v978_v18, 1  ;;  %v987_v45 = vrot.slane %v986_v30, 1  ;;  %v994_v57 = vadd.f32 %v993_v2, %v992_v28  ;;  %v6029_v2 = vld [vmem:[#allocation38_spill] sm:$0xff] }
 0x183   :  { %v1002_v46 = vadd.f32 %v1001_v56, %v1000_v32  ;;  %v1010_v62 = vadd.f32 %v1009_v47, %v1008_v7  ;;  %v1018_v34 = vadd.f32 %v1017_v4, %v1016_v13  ;;  %v4522_v53 = vadd.f32 %v963_v36, %v962_v11  ;;  %v6027_v11 = vld [vmem:[#allocation36_spill] sm:$0xff]  ;;  %v6030_v47 = vld [vmem:[#allocation39_spill] sm:$0xff]  ;;  %v6031_v36 = vld [vmem:[#allocation185_spill] sm:$0xff] }
 0x184   :  { %v4524_v8 = vadd.f32 %v971_v44, %v970_v15  ;;  %v4526_v31 = vadd.f32 %v979_v24, %v978_v18  ;;  %v4528_v52 = vadd.f32 %v987_v45, %v986_v30  ;;  %v995_v3 = vrot.slane %v994_v57, 1  ;;  %v6028_v18 = vld [vmem:[#allocation37_spill] sm:$0xff]  ;;  %v6032_v24 = vld [vmem:[#allocation186_spill] sm:$0xff] }
 0x185   :  { %6015 = vst [vmem:[#allocation165_spill] sm:$0xff] %v4522_v53  ;;  %v1003_v14 = vrot.slane %v1002_v46, 1  ;;  %v1011_v40 = vrot.slane %v1010_v62, 1  ;;  %v1019_v61 = vrot.slane %v1018_v34, 1  ;;  %v1021_v0 = vsel %vm700_vm0, %v6019_v26, 0.0  ;;  %v6035_v26 = vld [vmem:[#allocation40_spill] sm:$0xff] }
 0x186   :  { %6016 = vst [vmem:[#allocation166_spill] sm:$0xff] %v4524_v8  ;;  %6017 = vst [vmem:[#allocation167_spill] sm:$0xff] %v4526_v31  ;;  %v1029_v28 = vsel %vm700_vm0, %v6020_v5, 0.0  ;;  %v1037_v42 = vsel %vm700_vm0, %v6021_v22, 0.0  ;;  %v1045_v54 = vsel %vm700_vm0, %v6022_v55, 0.0  ;;  %v4538_v39 = vadd.f32 %v995_v3, %v994_v57  ;;  %v6034_v57 = vld [vmem:[#allocation188_spill] sm:$0xff] }
 0x187   :  { %6018 = vst [vmem:[#allocation168_spill] sm:$0xff] %v4528_v52  ;;  %v4540_v32 = vadd.f32 %v1003_v14, %v1002_v46  ;;  %v4542_v7 = vadd.f32 %v1011_v40, %v1010_v62  ;;  %v4544_v13 = vadd.f32 %v1019_v61, %v1018_v34  ;;  %v1022_v15 = vadd.f32 %v1021_v0, %v6027_v11  ;;  %v6033_v46 = vld [vmem:[#allocation187_spill] sm:$0xff]  ;;  %v6036_v5 = vld [vmem:[#allocation41_spill] sm:$0xff]  ;;  %v6037_v22 = vld [vmem:[#allocation42_spill] sm:$0xff] }
 0x188   :  { %6023 = vst [vmem:[#allocation20_spill] sm:$0xff] %v4538_v39  ;;  %v1030_v30 = vadd.f32 %v1029_v28, %v6028_v18  ;;  %v1038_v56 = vadd.f32 %v1037_v42, %v6029_v2  ;;  %v1046_v4 = vadd.f32 %v1045_v54, %v6030_v47  ;;  %v1053_v44 = vsel %vm700_vm0, %v6031_v36, 0.0  ;;  %v6038_v55 = vld [vmem:[#allocation43_spill] sm:$0xff] }
 0x189   :  { %6024 = vst [vmem:[#allocation21_spill] sm:$0xff] %v4540_v32  ;;  %6025 = vst [vmem:[#allocation22_spill] sm:$0xff] %v4542_v7  ;;  %v1061_v45 = vsel %vm700_vm0, %v6032_v24, 0.0  ;;  %v1069_v62 = vsel %vm700_vm0, %v6033_v46, 0.0  ;;  %v1077_v34 = vsel %vm700_vm0, %v6034_v57, 0.0  ;;  %v1023_v3 = vrot.slane %v1022_v15, 4 }
 0x18a   :  { %6026 = vst [vmem:[#allocation23_spill] sm:$0xff] %v4544_v13  ;;  %v1031_v14 = vrot.slane %v1030_v30, 4  ;;  %v1039_v40 = vrot.slane %v1038_v56, 4  ;;  %v1047_v61 = vrot.slane %v1046_v4, 4  ;;  %v1054_v0 = vadd.f32 %v1053_v44, %v6035_v26 }
 0x18b   :  { %v1062_v28 = vadd.f32 %v1061_v45, %v6036_v5  ;;  %v1070_v42 = vadd.f32 %v1069_v62, %v6037_v22  ;;  %v1078_v54 = vadd.f32 %v1077_v34, %v6038_v55  ;;  %v1024_v11 = vadd.f32 %v1023_v3, %v1022_v15 }
 0x18c   :  { %v1032_v18 = vadd.f32 %v1031_v14, %v1030_v30  ;;  %v1040_v2 = vadd.f32 %v1039_v40, %v1038_v56  ;;  %v1048_v47 = vadd.f32 %v1047_v61, %v1046_v4  ;;  %v1055_v36 = vrot.slane %v1054_v0, 4 }
 0x18d   :  { %v1063_v24 = vrot.slane %v1062_v28, 4  ;;  %v1071_v46 = vrot.slane %v1070_v42, 4  ;;  %v1079_v57 = vrot.slane %v1078_v54, 4  ;;  %v1025_v7 = vrot.slane %v1024_v11, 2 }
 0x18e   :  { %v1033_v13 = vrot.slane %v1032_v18, 2  ;;  %v1041_v39 = vrot.slane %v1040_v2, 2  ;;  %v1049_v32 = vrot.slane %v1048_v47, 2  ;;  %v1056_v31 = vadd.f32 %v1055_v36, %v1054_v0 }
 0x18f   :  { %v1064_v44 = vadd.f32 %v1063_v24, %v1062_v28  ;;  %v1072_v26 = vadd.f32 %v1071_v46, %v1070_v42  ;;  %v1080_v45 = vadd.f32 %v1079_v57, %v1078_v54  ;;  %v1026_v5 = vadd.f32 %v1025_v7, %v1024_v11  ;;  %v6043_v11 = vld [vmem:[#allocation189_spill] sm:$0xff]  ;;  %v6046_v24 = vld [vmem:[#allocation192_spill] sm:$0xff] }
 0x190   :  { %v1034_v62 = vadd.f32 %v1033_v13, %v1032_v18  ;;  %v1042_v22 = vadd.f32 %v1041_v39, %v1040_v2  ;;  %v1050_v34 = vadd.f32 %v1049_v32, %v1048_v47  ;;  %v1057_v15 = vrot.slane %v1056_v31, 2  ;;  %v6044_v2 = vld [vmem:[#allocation190_spill] sm:$0xff]  ;;  %v6045_v47 = vld [vmem:[#allocation191_spill] sm:$0xff] }
 0x191   :  { %v1065_v30 = vrot.slane %v1064_v44, 2  ;;  %v1073_v56 = vrot.slane %v1072_v26, 2  ;;  %v1081_v4 = vrot.slane %v1080_v45, 2  ;;  %v1027_v3 = vrot.slane %v1026_v5, 1 }
 0x192   :  { %v1035_v14 = vrot.slane %v1034_v62, 1  ;;  %v1043_v40 = vrot.slane %v1042_v22, 1  ;;  %v1051_v61 = vrot.slane %v1050_v34, 1  ;;  %v1058_v55 = vadd.f32 %v1057_v15, %v1056_v31  ;;  %v6053_v15 = vld [vmem:[#allocation46_spill] sm:$0xff] }
 0x193   :  { %v1066_v52 = vadd.f32 %v1065_v30, %v1064_v44  ;;  %v1074_v53 = vadd.f32 %v1073_v56, %v1072_v26  ;;  %v1082_v8 = vadd.f32 %v1081_v4, %v1080_v45  ;;  %v4562_v0 = vadd.f32 %v1027_v3, %v1026_v5  ;;  %v6051_v5 = vld [vmem:[#allocation44_spill] sm:$0xff]  ;;  %v6054_v56 = vld [vmem:[#allocation47_spill] sm:$0xff]  ;;  %v6055_v3 = vld [vmem:[#allocation193_spill] sm:$0xff] }
 0x194   :  { %v4564_v28 = vadd.f32 %v1035_v14, %v1034_v62  ;;  %v4566_v7 = vadd.f32 %v1043_v40, %v1042_v22  ;;  %v4568_v39 = vadd.f32 %v1051_v61, %v1050_v34  ;;  %v1059_v32 = vrot.slane %v1058_v55, 1  ;;  %v6052_v22 = vld [vmem:[#allocation45_spill] sm:$0xff]  ;;  %v6056_v40 = vld [vmem:[#allocation194_spill] sm:$0xff] }
 0x195   :  { %6039 = vst [vmem:[#allocation169_spill] sm:$0xff] %v4562_v0  ;;  %v1067_v13 = vrot.slane %v1066_v52, 1  ;;  %v1075_v42 = vrot.slane %v1074_v53, 1  ;;  %v1083_v54 = vrot.slane %v1082_v8, 1  ;;  %v1085_v18 = vsel %vm700_vm0, %v6043_v11, 0.0  ;;  %v6059_v11 = vld [vmem:[#allocation48_spill] sm:$0xff] }
 0x196   :  { %6040 = vst [vmem:[#allocation170_spill] sm:$0xff] %v4564_v28  ;;  %6041 = vst [vmem:[#allocation171_spill] sm:$0xff] %v4566_v7  ;;  %v1093_v31 = vsel %vm700_vm0, %v6044_v2, 0.0  ;;  %v1101_v36 = vsel %vm700_vm0, %v6045_v47, 0.0  ;;  %v1109_v46 = vsel %vm700_vm0, %v6046_v24, 0.0  ;;  %v4578_v57 = vadd.f32 %v1059_v32, %v1058_v55  ;;  %v6058_v55 = vld [vmem:[#allocation196_spill] sm:$0xff] }
 0x197   :  { %6042 = vst [vmem:[#allocation172_spill] sm:$0xff] %v4568_v39  ;;  %v4580_v44 = vadd.f32 %v1067_v13, %v1066_v52  ;;  %v4582_v26 = vadd.f32 %v1075_v42, %v1074_v53  ;;  %v4584_v45 = vadd.f32 %v1083_v54, %v1082_v8  ;;  %v1086_v62 = vadd.f32 %v1085_v18, %v6051_v5  ;;  %v6057_v52 = vld [vmem:[#allocation195_spill] sm:$0xff]  ;;  %v6060_v2 = vld [vmem:[#allocation49_spill] sm:$0xff]  ;;  %v6061_v47 = vld [vmem:[#allocation50_spill] sm:$0xff] }
 0x198   :  { %6047 = vst [vmem:[#allocation24_spill] sm:$0xff] %v4578_v57  ;;  %v1094_v34 = vadd.f32 %v1093_v31, %v6052_v22  ;;  %v1102_v30 = vadd.f32 %v1101_v36, %v6053_v15  ;;  %v1110_v4 = vadd.f32 %v1109_v46, %v6054_v56  ;;  %v1117_v14 = vsel %vm700_vm0, %v6055_v3, 0.0  ;;  %v6062_v24 = vld [vmem:[#allocation51_spill] sm:$0xff] }
 0x199   :  { %6048 = vst [vmem:[#allocation25_spill] sm:$0xff] %v4580_v44  ;;  %6049 = vst [vmem:[#allocation26_spill] sm:$0xff] %v4582_v26  ;;  %v1125_v61 = vsel %vm700_vm0, %v6056_v40, 0.0  ;;  %v1133_v53 = vsel %vm700_vm0, %v6057_v52, 0.0  ;;  %v1141_v8 = vsel %vm700_vm0, %v6058_v55, 0.0  ;;  %v1087_v32 = vrot.slane %v1086_v62, 4 }
 0x19a   :  { %6050 = vst [vmem:[#allocation27_spill] sm:$0xff] %v4584_v45  ;;  %v1095_v13 = vrot.slane %v1094_v34, 4  ;;  %v1103_v42 = vrot.slane %v1102_v30, 4  ;;  %v1111_v54 = vrot.slane %v1110_v4, 4  ;;  %v1118_v18 = vadd.f32 %v1117_v14, %v6059_v11 }
 0x19b   :  { %v1126_v31 = vadd.f32 %v1125_v61, %v6060_v2  ;;  %v1134_v36 = vadd.f32 %v1133_v53, %v6061_v47  ;;  %v1142_v46 = vadd.f32 %v1141_v8, %v6062_v24  ;;  %v1088_v5 = vadd.f32 %v1087_v32, %v1086_v62 }
 0x19c   :  { %v1096_v22 = vadd.f32 %v1095_v13, %v1094_v34  ;;  %v1104_v15 = vadd.f32 %v1103_v42, %v1102_v30  ;;  %v1112_v56 = vadd.f32 %v1111_v54, %v1110_v4  ;;  %v1119_v3 = vrot.slane %v1118_v18, 4 }
 0x19d   :  { %v1127_v40 = vrot.slane %v1126_v31, 4  ;;  %v1135_v52 = vrot.slane %v1134_v36, 4  ;;  %v1143_v55 = vrot.slane %v1142_v46, 4  ;;  %v1089_v26 = vrot.slane %v1088_v5, 2 }
 0x19e   :  { %v1097_v45 = vrot.slane %v1096_v22, 2  ;;  %v1105_v57 = vrot.slane %v1104_v15, 2  ;;  %v1113_v44 = vrot.slane %v1112_v56, 2  ;;  %v1120_v7 = vadd.f32 %v1119_v3, %v1118_v18 }
 0x19f   :  { %v1128_v14 = vadd.f32 %v1127_v40, %v1126_v31  ;;  %v1136_v11 = vadd.f32 %v1135_v52, %v1134_v36  ;;  %v1144_v61 = vadd.f32 %v1143_v55, %v1142_v46  ;;  %v1090_v2 = vadd.f32 %v1089_v26, %v1088_v5  ;;  %v6067_v5 = vld [vmem:[#allocation197_spill] sm:$0xff]  ;;  %v6070_v40 = vld [vmem:[#allocation200_spill] sm:$0xff] }
 0x1a0   :  { %v1098_v53 = vadd.f32 %v1097_v45, %v1096_v22  ;;  %v1106_v47 = vadd.f32 %v1105_v57, %v1104_v15  ;;  %v1114_v8 = vadd.f32 %v1113_v44, %v1112_v56  ;;  %v1121_v62 = vrot.slane %v1120_v7, 2  ;;  %v6068_v15 = vld [vmem:[#allocation198_spill] sm:$0xff]  ;;  %v6069_v56 = vld [vmem:[#allocation199_spill] sm:$0xff] }
 0x1a1   :  { %v1129_v34 = vrot.slane %v1128_v14, 2  ;;  %v1137_v30 = vrot.slane %v1136_v11, 2  ;;  %v1145_v4 = vrot.slane %v1144_v61, 2  ;;  %v1091_v32 = vrot.slane %v1090_v2, 1 }
 0x1a2   :  { %v1099_v13 = vrot.slane %v1098_v53, 1  ;;  %v1107_v42 = vrot.slane %v1106_v47, 1  ;;  %v1115_v54 = vrot.slane %v1114_v8, 1  ;;  %v1122_v24 = vadd.f32 %v1121_v62, %v1120_v7  ;;  %v6077_v62 = vld [vmem:[#allocation54_spill] sm:$0xff] }
 0x1a3   :  { %v1130_v39 = vadd.f32 %v1129_v34, %v1128_v14  ;;  %v1138_v0 = vadd.f32 %v1137_v30, %v1136_v11  ;;  %v1146_v28 = vadd.f32 %v1145_v4, %v1144_v61  ;;  %v4602_v18 = vadd.f32 %v1091_v32, %v1090_v2  ;;  %v6075_v2 = vld [vmem:[#allocation52_spill] sm:$0xff]  ;;  %v6078_v30 = vld [vmem:[#allocation55_spill] sm:$0xff]  ;;  %v6079_v32 = vld [vmem:[#allocation201_spill] sm:$0xff] }
 0x1a4   :  { %v4604_v31 = vadd.f32 %v1099_v13, %v1098_v53  ;;  %v4606_v26 = vadd.f32 %v1107_v42, %v1106_v47  ;;  %v4608_v57 = vadd.f32 %v1115_v54, %v1114_v8  ;;  %v1123_v44 = vrot.slane %v1122_v24, 1  ;;  %v6076_v47 = vld [vmem:[#allocation53_spill] sm:$0xff]  ;;  %v6080_v42 = vld [vmem:[#allocation202_spill] sm:$0xff] }
 0x1a5   :  { %6063 = vst [vmem:[#allocation173_spill] sm:$0xff] %v4602_v18  ;;  %v1131_v45 = vrot.slane %v1130_v39, 1  ;;  %v1139_v36 = vrot.slane %v1138_v0, 1  ;;  %v1147_v46 = vrot.slane %v1146_v28, 1  ;;  %v1149_v22 = vsel %vm700_vm0, %v6067_v5, 0.0  ;;  %v6083_v5 = vld [vmem:[#allocation56_spill] sm:$0xff] }
 0x1a6   :  { %6064 = vst [vmem:[#allocation174_spill] sm:$0xff] %v4604_v31  ;;  %6065 = vst [vmem:[#allocation175_spill] sm:$0xff] %v4606_v26  ;;  %v1157_v7 = vsel %vm700_vm0, %v6068_v15, 0.0  ;;  %v1165_v3 = vsel %vm700_vm0, %v6069_v56, 0.0  ;;  %v1173_v52 = vsel %vm700_vm0, %v6070_v40, 0.0  ;;  %v4618_v55 = vadd.f32 %v1123_v44, %v1122_v24  ;;  %v6082_v24 = vld [vmem:[#allocation204_spill] sm:$0xff] }
 0x1a7   :  { %6066 = vst [vmem:[#allocation176_spill] sm:$0xff] %v4608_v57  ;;  %v4620_v14 = vadd.f32 %v1131_v45, %v1130_v39  ;;  %v4622_v11 = vadd.f32 %v1139_v36, %v1138_v0  ;;  %v4624_v61 = vadd.f32 %v1147_v46, %v1146_v28  ;;  %v1150_v53 = vadd.f32 %v1149_v22, %v6075_v2  ;;  %v6081_v39 = vld [vmem:[#allocation203_spill] sm:$0xff]  ;;  %v6084_v15 = vld [vmem:[#allocation57_spill] sm:$0xff]  ;;  %v6085_v56 = vld [vmem:[#allocation58_spill] sm:$0xff] }
 0x1a8   :  { %6071 = vst [vmem:[#allocation28_spill] sm:$0xff] %v4618_v55  ;;  %v1158_v8 = vadd.f32 %v1157_v7, %v6076_v47  ;;  %v1166_v34 = vadd.f32 %v1165_v3, %v6077_v62  ;;  %v1174_v4 = vadd.f32 %v1173_v52, %v6078_v30  ;;  %v1181_v13 = vsel %vm700_vm0, %v6079_v32, 0.0  ;;  %v6086_v40 = vld [vmem:[#allocation59_spill] sm:$0xff] }
 0x1a9   :  { %6072 = vst [vmem:[#allocation29_spill] sm:$0xff] %v4620_v14  ;;  %6073 = vst [vmem:[#allocation30_spill] sm:$0xff] %v4622_v11  ;;  %v1189_v54 = vsel %vm700_vm0, %v6080_v42, 0.0  ;;  %v1197_v0 = vsel %vm700_vm0, %v6081_v39, 0.0  ;;  %v1205_v28 = vsel %vm700_vm0, %v6082_v24, 0.0  ;;  %v1151_v44 = vrot.slane %v1150_v53, 4 }
 0x1aa   :  { %6074 = vst [vmem:[#allocation31_spill] sm:$0xff] %v4624_v61  ;;  %v1159_v45 = vrot.slane %v1158_v8, 4  ;;  %v1167_v36 = vrot.slane %v1166_v34, 4  ;;  %v1175_v46 = vrot.slane %v1174_v4, 4  ;;  %v1182_v22 = vadd.f32 %v1181_v13, %v6083_v5 }
 0x1ab   :  { %v1190_v7 = vadd.f32 %v1189_v54, %v6084_v15  ;;  %v1198_v3 = vadd.f32 %v1197_v0, %v6085_v56  ;;  %v1206_v52 = vadd.f32 %v1205_v28, %v6086_v40  ;;  %v1152_v2 = vadd.f32 %v1151_v44, %v1150_v53 }
 0x1ac   :  { %v1160_v47 = vadd.f32 %v1159_v45, %v1158_v8  ;;  %v1168_v62 = vadd.f32 %v1167_v36, %v1166_v34  ;;  %v1176_v30 = vadd.f32 %v1175_v46, %v1174_v4  ;;  %v1183_v32 = vrot.slane %v1182_v22, 4 }
 0x1ad   :  { %v1191_v42 = vrot.slane %v1190_v7, 4  ;;  %v1199_v39 = vrot.slane %v1198_v3, 4  ;;  %v1207_v24 = vrot.slane %v1206_v52, 4  ;;  %v1153_v11 = vrot.slane %v1152_v2, 2 }
 0x1ae   :  { %v1161_v61 = vrot.slane %v1160_v47, 2  ;;  %v1169_v55 = vrot.slane %v1168_v62, 2  ;;  %v1177_v14 = vrot.slane %v1176_v30, 2  ;;  %v1184_v26 = vadd.f32 %v1183_v32, %v1182_v22 }
 0x1af   :  { %v1192_v13 = vadd.f32 %v1191_v42, %v1190_v7  ;;  %v1200_v5 = vadd.f32 %v1199_v39, %v1198_v3  ;;  %v1208_v54 = vadd.f32 %v1207_v24, %v1206_v52  ;;  %v1154_v15 = vadd.f32 %v1153_v11, %v1152_v2  ;;  %v6091_v2 = vld [vmem:[#allocation205_spill] sm:$0xff]  ;;  %v6094_v42 = vld [vmem:[#allocation208_spill] sm:$0xff] }
 0x1b0   :  { %v1162_v0 = vadd.f32 %v1161_v61, %v1160_v47  ;;  %v1170_v56 = vadd.f32 %v1169_v55, %v1168_v62  ;;  %v1178_v28 = vadd.f32 %v1177_v14, %v1176_v30  ;;  %v1185_v53 = vrot.slane %v1184_v26, 2  ;;  %v6092_v62 = vld [vmem:[#allocation206_spill] sm:$0xff]  ;;  %v6093_v30 = vld [vmem:[#allocation207_spill] sm:$0xff] }
 0x1b1   :  { %v1193_v8 = vrot.slane %v1192_v13, 2  ;;  %v1201_v34 = vrot.slane %v1200_v5, 2  ;;  %v1209_v4 = vrot.slane %v1208_v54, 2  ;;  %v1155_v44 = vrot.slane %v1154_v15, 1 }
 0x1b2   :  { %v1163_v45 = vrot.slane %v1162_v0, 1  ;;  %v1171_v36 = vrot.slane %v1170_v56, 1  ;;  %v1179_v46 = vrot.slane %v1178_v28, 1  ;;  %v1186_v40 = vadd.f32 %v1185_v53, %v1184_v26  ;;  %v6101_v53 = vld [vmem:[#allocation62_spill] sm:$0xff] }
 0x1b3   :  { %v1194_v57 = vadd.f32 %v1193_v8, %v1192_v13  ;;  %v1202_v18 = vadd.f32 %v1201_v34, %v1200_v5  ;;  %v1210_v31 = vadd.f32 %v1209_v4, %v1208_v54  ;;  %v4642_v22 = vadd.f32 %v1155_v44, %v1154_v15  ;;  %v6099_v15 = vld [vmem:[#allocation60_spill] sm:$0xff]  ;;  %v6102_v34 = vld [vmem:[#allocation63_spill] sm:$0xff]  ;;  %v6103_v44 = vld [vmem:[#allocation209_spill] sm:$0xff] }
 0x1b4   :  { %v4644_v7 = vadd.f32 %v1163_v45, %v1162_v0  ;;  %v4646_v11 = vadd.f32 %v1171_v36, %v1170_v56  ;;  %v4648_v55 = vadd.f32 %v1179_v46, %v1178_v28  ;;  %v1187_v14 = vrot.slane %v1186_v40, 1  ;;  %v6100_v56 = vld [vmem:[#allocation61_spill] sm:$0xff]  ;;  %v6104_v36 = vld [vmem:[#allocation210_spill] sm:$0xff] }
 0x1b5   :  { %6087 = vst [vmem:[#allocation177_spill] sm:$0xff] %v4642_v22  ;;  %v1195_v61 = vrot.slane %v1194_v57, 1  ;;  %v1203_v3 = vrot.slane %v1202_v18, 1  ;;  %v1211_v52 = vrot.slane %v1210_v31, 1  ;;  %v1213_v47 = vsel %vm700_vm0, %v6091_v2, 0.0  ;;  %v6107_v2 = vld [vmem:[#allocation64_spill] sm:$0xff] }
 0x1b6   :  { %6088 = vst [vmem:[#allocation178_spill] sm:$0xff] %v4644_v7  ;;  %6089 = vst [vmem:[#allocation179_spill] sm:$0xff] %v4646_v11  ;;  %v1221_v26 = vsel %vm700_vm0, %v6092_v62, 0.0  ;;  %v1229_v32 = vsel %vm700_vm0, %v6093_v30, 0.0  ;;  %v1237_v39 = vsel %vm700_vm0, %v6094_v42, 0.0  ;;  %v4658_v24 = vadd.f32 %v1187_v14, %v1186_v40  ;;  %v6106_v40 = vld [vmem:[#allocation212_spill] sm:$0xff] }
 0x1b7   :  { %6090 = vst [vmem:[#allocation180_spill] sm:$0xff] %v4648_v55  ;;  %v4660_v13 = vadd.f32 %v1195_v61, %v1194_v57  ;;  %v4662_v5 = vadd.f32 %v1203_v3, %v1202_v18  ;;  %v4664_v54 = vadd.f32 %v1211_v52, %v1210_v31  ;;  %v1214_v0 = vadd.f32 %v1213_v47, %v6099_v15  ;;  %v6105_v57 = vld [vmem:[#allocation211_spill] sm:$0xff]  ;;  %v6108_v62 = vld [vmem:[#allocation65_spill] sm:$0xff]  ;;  %v6109_v30 = vld [vmem:[#allocation66_spill] sm:$0xff] }
 0x1b8   :  { %6095 = vst [vmem:[#allocation32_spill] sm:$0xff] %v4658_v24  ;;  %v1222_v28 = vadd.f32 %v1221_v26, %v6100_v56  ;;  %v1230_v8 = vadd.f32 %v1229_v32, %v6101_v53  ;;  %v1238_v4 = vadd.f32 %v1237_v39, %v6102_v34  ;;  %v1245_v45 = vsel %vm700_vm0, %v6103_v44, 0.0  ;;  %v6110_v42 = vld [vmem:[#allocation67_spill] sm:$0xff] }
 0x1b9   :  { %6096 = vst [vmem:[#allocation33_spill] sm:$0xff] %v4660_v13  ;;  %6097 = vst [vmem:[#allocation34_spill] sm:$0xff] %v4662_v5  ;;  %v1253_v46 = vsel %vm700_vm0, %v6104_v36, 0.0  ;;  %v1261_v18 = vsel %vm700_vm0, %v6105_v57, 0.0  ;;  %v1269_v31 = vsel %vm700_vm0, %v6106_v40, 0.0  ;;  %v1215_v14 = vrot.slane %v1214_v0, 4 }
 0x1ba   :  { %6098 = vst [vmem:[#allocation35_spill] sm:$0xff] %v4664_v54  ;;  %v1223_v61 = vrot.slane %v1222_v28, 4  ;;  %v1231_v3 = vrot.slane %v1230_v8, 4  ;;  %v1239_v52 = vrot.slane %v1238_v4, 4  ;;  %v1246_v47 = vadd.f32 %v1245_v45, %v6107_v2 }
 0x1bb   :  { %v1254_v26 = vadd.f32 %v1253_v46, %v6108_v62  ;;  %v1262_v32 = vadd.f32 %v1261_v18, %v6109_v30  ;;  %v1270_v39 = vadd.f32 %v1269_v31, %v6110_v42  ;;  %v1216_v15 = vadd.f32 %v1215_v14, %v1214_v0 }
 0x1bc   :  { %v1224_v56 = vadd.f32 %v1223_v61, %v1222_v28  ;;  %v1232_v53 = vadd.f32 %v1231_v3, %v1230_v8  ;;  %v1240_v34 = vadd.f32 %v1239_v52, %v1238_v4  ;;  %v1247_v44 = vrot.slane %v1246_v47, 4 }
 0x1bd   :  { %v1255_v36 = vrot.slane %v1254_v26, 4  ;;  %v1263_v57 = vrot.slane %v1262_v32, 4  ;;  %v1271_v40 = vrot.slane %v1270_v39, 4  ;;  %v1217_v5 = vrot.slane %v1216_v15, 2 }
 0x1be   :  { %v1225_v54 = vrot.slane %v1224_v56, 2  ;;  %v1233_v24 = vrot.slane %v1232_v53, 2  ;;  %v1241_v13 = vrot.slane %v1240_v34, 2  ;;  %v1248_v11 = vadd.f32 %v1247_v44, %v1246_v47 }
 0x1bf   :  { %v1256_v45 = vadd.f32 %v1255_v36, %v1254_v26  ;;  %v1264_v2 = vadd.f32 %v1263_v57, %v1262_v32  ;;  %v1272_v46 = vadd.f32 %v1271_v40, %v1270_v39  ;;  %v1218_v62 = vadd.f32 %v1217_v5, %v1216_v15  ;;  %v6115_v15 = vld [vmem:[#allocation213_spill] sm:$0xff]  ;;  %v6118_v36 = vld [vmem:[#allocation216_spill] sm:$0xff] }
 0x1c0   :  { %v1226_v18 = vadd.f32 %v1225_v54, %v1224_v56  ;;  %v1234_v30 = vadd.f32 %v1233_v24, %v1232_v53  ;;  %v1242_v31 = vadd.f32 %v1241_v13, %v1240_v34  ;;  %v1249_v0 = vrot.slane %v1248_v11, 2  ;;  %v6116_v53 = vld [vmem:[#allocation214_spill] sm:$0xff]  ;;  %v6117_v34 = vld [vmem:[#allocation215_spill] sm:$0xff] }
 0x1c1   :  { %v1257_v28 = vrot.slane %v1256_v45, 2  ;;  %v1265_v8 = vrot.slane %v1264_v2, 2  ;;  %v1273_v4 = vrot.slane %v1272_v46, 2  ;;  %v1219_v14 = vrot.slane %v1218_v62, 1 }
 0x1c2   :  { %v1227_v61 = vrot.slane %v1226_v18, 1  ;;  %v1235_v3 = vrot.slane %v1234_v30, 1  ;;  %v1243_v52 = vrot.slane %v1242_v31, 1  ;;  %v1250_v42 = vadd.f32 %v1249_v0, %v1248_v11  ;;  %v6125_v0 = vld [vmem:[#allocation70_spill] sm:$0xff] }
 0x1c3   :  { %v1258_v55 = vadd.f32 %v1257_v28, %v1256_v45  ;;  %v1266_v22 = vadd.f32 %v1265_v8, %v1264_v2  ;;  %v1274_v7 = vadd.f32 %v1273_v4, %v1272_v46  ;;  %v4682_v47 = vadd.f32 %v1219_v14, %v1218_v62  ;;  %v6123_v62 = vld [vmem:[#allocation68_spill] sm:$0xff]  ;;  %v6126_v8 = vld [vmem:[#allocation71_spill] sm:$0xff]  ;;  %v6127_v14 = vld [vmem:[#allocation217_spill] sm:$0xff] }
 0x1c4   :  { %v4684_v26 = vadd.f32 %v1227_v61, %v1226_v18  ;;  %v4686_v5 = vadd.f32 %v1235_v3, %v1234_v30  ;;  %v4688_v24 = vadd.f32 %v1243_v52, %v1242_v31  ;;  %v1251_v13 = vrot.slane %v1250_v42, 1  ;;  %v6124_v30 = vld [vmem:[#allocation69_spill] sm:$0xff]  ;;  %v6128_v3 = vld [vmem:[#allocation218_spill] sm:$0xff] }
 0x1c5   :  { %6111 = vst [vmem:[#allocation181_spill] sm:$0xff] %v4682_v47  ;;  %v1259_v54 = vrot.slane %v1258_v55, 1  ;;  %v1267_v32 = vrot.slane %v1266_v22, 1  ;;  %v1275_v39 = vrot.slane %v1274_v7, 1  ;;  %v1277_v56 = vsel %vm700_vm0, %v6115_v15, 0.0  ;;  %v6131_v15 = vld [vmem:[#allocation72_spill] sm:$0xff] }
 0x1c6   :  { %6112 = vst [vmem:[#allocation182_spill] sm:$0xff] %v4684_v26  ;;  %6113 = vst [vmem:[#allocation183_spill] sm:$0xff] %v4686_v5  ;;  %v1285_v11 = vsel %vm700_vm0, %v6116_v53, 0.0  ;;  %v1293_v44 = vsel %vm700_vm0, %v6117_v34, 0.0  ;;  %v1301_v57 = vsel %vm700_vm0, %v6118_v36, 0.0  ;;  %v4698_v40 = vadd.f32 %v1251_v13, %v1250_v42  ;;  %v6130_v42 = vld [vmem:[#allocation220_spill] sm:$0xff] }
 0x1c7   :  { %6114 = vst [vmem:[#allocation184_spill] sm:$0xff] %v4688_v24  ;;  %v4700_v45 = vadd.f32 %v1259_v54, %v1258_v55  ;;  %v4702_v2 = vadd.f32 %v1267_v32, %v1266_v22  ;;  %v4704_v46 = vadd.f32 %v1275_v39, %v1274_v7  ;;  %v1278_v18 = vadd.f32 %v1277_v56, %v6123_v62  ;;  %v6129_v55 = vld [vmem:[#allocation219_spill] sm:$0xff]  ;;  %v6132_v53 = vld [vmem:[#allocation73_spill] sm:$0xff]  ;;  %v6133_v34 = vld [vmem:[#allocation74_spill] sm:$0xff] }
 0x1c8   :  { %6119 = vst [vmem:[#allocation36_spill] sm:$0xff] %v4698_v40  ;;  %v1286_v31 = vadd.f32 %v1285_v11, %v6124_v30  ;;  %v1294_v28 = vadd.f32 %v1293_v44, %v6125_v0  ;;  %v1302_v4 = vadd.f32 %v1301_v57, %v6126_v8  ;;  %v1309_v61 = vsel %vm700_vm0, %v6127_v14, 0.0  ;;  %v6134_v36 = vld [vmem:[#allocation75_spill] sm:$0xff] }
 0x1c9   :  { %6120 = vst [vmem:[#allocation37_spill] sm:$0xff] %v4700_v45  ;;  %6121 = vst [vmem:[#allocation38_spill] sm:$0xff] %v4702_v2  ;;  %v1317_v52 = vsel %vm700_vm0, %v6128_v3, 0.0  ;;  %v1325_v22 = vsel %vm700_vm0, %v6129_v55, 0.0  ;;  %v1333_v7 = vsel %vm700_vm0, %v6130_v42, 0.0  ;;  %v1279_v13 = vrot.slane %v1278_v18, 4 }
 0x1ca   :  { %6122 = vst [vmem:[#allocation39_spill] sm:$0xff] %v4704_v46  ;;  %v1287_v54 = vrot.slane %v1286_v31, 4  ;;  %v1295_v32 = vrot.slane %v1294_v28, 4  ;;  %v1303_v39 = vrot.slane %v1302_v4, 4  ;;  %v1310_v56 = vadd.f32 %v1309_v61, %v6131_v15 }
 0x1cb   :  { %v1318_v11 = vadd.f32 %v1317_v52, %v6132_v53  ;;  %v1326_v44 = vadd.f32 %v1325_v22, %v6133_v34  ;;  %v1334_v57 = vadd.f32 %v1333_v7, %v6134_v36  ;;  %v1280_v62 = vadd.f32 %v1279_v13, %v1278_v18 }
 0x1cc   :  { %v1288_v30 = vadd.f32 %v1287_v54, %v1286_v31  ;;  %v1296_v0 = vadd.f32 %v1295_v32, %v1294_v28  ;;  %v1304_v8 = vadd.f32 %v1303_v39, %v1302_v4  ;;  %v1311_v14 = vrot.slane %v1310_v56, 4 }
 0x1cd   :  { %v1319_v3 = vrot.slane %v1318_v11, 4  ;;  %v1327_v55 = vrot.slane %v1326_v44, 4  ;;  %v1335_v42 = vrot.slane %v1334_v57, 4  ;;  %v1281_v2 = vrot.slane %v1280_v62, 2 }
 0x1ce   :  { %v1289_v46 = vrot.slane %v1288_v30, 2  ;;  %v1297_v40 = vrot.slane %v1296_v0, 2  ;;  %v1305_v45 = vrot.slane %v1304_v8, 2  ;;  %v1312_v5 = vadd.f32 %v1311_v14, %v1310_v56 }
 0x1cf   :  { %v1320_v61 = vadd.f32 %v1319_v3, %v1318_v11  ;;  %v1328_v15 = vadd.f32 %v1327_v55, %v1326_v44  ;;  %v1336_v52 = vadd.f32 %v1335_v42, %v1334_v57  ;;  %v1282_v53 = vadd.f32 %v1281_v2, %v1280_v62  ;;  %v6139_v62 = vld [vmem:[#allocation221_spill] sm:$0xff]  ;;  %v6142_v3 = vld [vmem:[#allocation224_spill] sm:$0xff] }
 0x1d0   :  { %v1290_v22 = vadd.f32 %v1289_v46, %v1288_v30  ;;  %v1298_v34 = vadd.f32 %v1297_v40, %v1296_v0  ;;  %v1306_v7 = vadd.f32 %v1305_v45, %v1304_v8  ;;  %v1313_v18 = vrot.slane %v1312_v5, 2  ;;  %v6140_v0 = vld [vmem:[#allocation222_spill] sm:$0xff]  ;;  %v6141_v8 = vld [vmem:[#allocation223_spill] sm:$0xff] }
 0x1d1   :  { %v1321_v31 = vrot.slane %v1320_v61, 2  ;;  %v1329_v28 = vrot.slane %v1328_v15, 2  ;;  %v1337_v4 = vrot.slane %v1336_v52, 2  ;;  %v1283_v13 = vrot.slane %v1282_v53, 1 }
 0x1d2   :  { %v1291_v54 = vrot.slane %v1290_v22, 1  ;;  %v1299_v32 = vrot.slane %v1298_v34, 1  ;;  %v1307_v39 = vrot.slane %v1306_v7, 1  ;;  %v1314_v36 = vadd.f32 %v1313_v18, %v1312_v5  ;;  %v6149_v18 = vld [vmem:[#allocation78_spill] sm:$0xff] }
 0x1d3   :  { %v1322_v24 = vadd.f32 %v1321_v31, %v1320_v61  ;;  %v1330_v47 = vadd.f32 %v1329_v28, %v1328_v15  ;;  %v1338_v26 = vadd.f32 %v1337_v4, %v1336_v52  ;;  %v4722_v56 = vadd.f32 %v1283_v13, %v1282_v53  ;;  %v6147_v53 = vld [vmem:[#allocation76_spill] sm:$0xff]  ;;  %v6150_v28 = vld [vmem:[#allocation79_spill] sm:$0xff]  ;;  %v6151_v13 = vld [vmem:[#allocation225_spill] sm:$0xff] }
 0x1d4   :  { %v4724_v11 = vadd.f32 %v1291_v54, %v1290_v22  ;;  %v4726_v2 = vadd.f32 %v1299_v32, %v1298_v34  ;;  %v4728_v40 = vadd.f32 %v1307_v39, %v1306_v7  ;;  %v1315_v45 = vrot.slane %v1314_v36, 1  ;;  %v6148_v34 = vld [vmem:[#allocation77_spill] sm:$0xff]  ;;  %v6152_v32 = vld [vmem:[#allocation226_spill] sm:$0xff] }
 0x1d5   :  { %6135 = vst [vmem:[#allocation185_spill] sm:$0xff] %v4722_v56  ;;  %v1323_v46 = vrot.slane %v1322_v24, 1  ;;  %v1331_v44 = vrot.slane %v1330_v47, 1  ;;  %v1339_v57 = vrot.slane %v1338_v26, 1  ;;  %v1341_v30 = vsel %vm700_vm0, %v6139_v62, 0.0  ;;  %v6155_v62 = vld [vmem:[#allocation80_spill] sm:$0xff] }
 0x1d6   :  { %6136 = vst [vmem:[#allocation186_spill] sm:$0xff] %v4724_v11  ;;  %6137 = vst [vmem:[#allocation187_spill] sm:$0xff] %v4726_v2  ;;  %v1349_v5 = vsel %vm700_vm0, %v6140_v0, 0.0  ;;  %v1357_v14 = vsel %vm700_vm0, %v6141_v8, 0.0  ;;  %v1365_v55 = vsel %vm700_vm0, %v6142_v3, 0.0  ;;  %v4738_v42 = vadd.f32 %v1315_v45, %v1314_v36  ;;  %v6154_v36 = vld [vmem:[#allocation228_spill] sm:$0xff] }
 0x1d7   :  { %6138 = vst [vmem:[#allocation188_spill] sm:$0xff] %v4728_v40  ;;  %v4740_v61 = vadd.f32 %v1323_v46, %v1322_v24  ;;  %v4742_v15 = vadd.f32 %v1331_v44, %v1330_v47  ;;  %v4744_v52 = vadd.f32 %v1339_v57, %v1338_v26  ;;  %v1342_v22 = vadd.f32 %v1341_v30, %v6147_v53  ;;  %v6153_v24 = vld [vmem:[#allocation227_spill] sm:$0xff]  ;;  %v6156_v0 = vld [vmem:[#allocation81_spill] sm:$0xff]  ;;  %v6157_v8 = vld [vmem:[#allocation82_spill] sm:$0xff] }
 0x1d8   :  { %6143 = vst [vmem:[#allocation40_spill] sm:$0xff] %v4738_v42  ;;  %v1350_v7 = vadd.f32 %v1349_v5, %v6148_v34  ;;  %v1358_v31 = vadd.f32 %v1357_v14, %v6149_v18  ;;  %v1366_v4 = vadd.f32 %v1365_v55, %v6150_v28  ;;  %v1373_v54 = vsel %vm700_vm0, %v6151_v13, 0.0  ;;  %v6158_v3 = vld [vmem:[#allocation83_spill] sm:$0xff] }
 0x1d9   :  { %6144 = vst [vmem:[#allocation41_spill] sm:$0xff] %v4740_v61  ;;  %6145 = vst [vmem:[#allocation42_spill] sm:$0xff] %v4742_v15  ;;  %v1381_v39 = vsel %vm700_vm0, %v6152_v32, 0.0  ;;  %v1389_v47 = vsel %vm700_vm0, %v6153_v24, 0.0  ;;  %v1397_v26 = vsel %vm700_vm0, %v6154_v36, 0.0  ;;  %v1343_v45 = vrot.slane %v1342_v22, 4 }
 0x1da   :  { %6146 = vst [vmem:[#allocation43_spill] sm:$0xff] %v4744_v52  ;;  %v1351_v46 = vrot.slane %v1350_v7, 4  ;;  %v1359_v44 = vrot.slane %v1358_v31, 4  ;;  %v1367_v57 = vrot.slane %v1366_v4, 4  ;;  %v1374_v30 = vadd.f32 %v1373_v54, %v6155_v62 }
 0x1db   :  { %v1382_v5 = vadd.f32 %v1381_v39, %v6156_v0  ;;  %v1390_v14 = vadd.f32 %v1389_v47, %v6157_v8  ;;  %v1398_v55 = vadd.f32 %v1397_v26, %v6158_v3  ;;  %v1344_v53 = vadd.f32 %v1343_v45, %v1342_v22 }
 0x1dc   :  { %v1352_v34 = vadd.f32 %v1351_v46, %v1350_v7  ;;  %v1360_v18 = vadd.f32 %v1359_v44, %v1358_v31  ;;  %v1368_v28 = vadd.f32 %v1367_v57, %v1366_v4  ;;  %v1375_v13 = vrot.slane %v1374_v30, 4 }
 0x1dd   :  { %v1383_v32 = vrot.slane %v1382_v5, 4  ;;  %v1391_v24 = vrot.slane %v1390_v14, 4  ;;  %v1399_v36 = vrot.slane %v1398_v55, 4  ;;  %v1345_v15 = vrot.slane %v1344_v53, 2 }
 0x1de   :  { %v1353_v52 = vrot.slane %v1352_v34, 2  ;;  %v1361_v42 = vrot.slane %v1360_v18, 2  ;;  %v1369_v61 = vrot.slane %v1368_v28, 2  ;;  %v1376_v2 = vadd.f32 %v1375_v13, %v1374_v30 }
 0x1df   :  { %v1384_v54 = vadd.f32 %v1383_v32, %v1382_v5  ;;  %v1392_v62 = vadd.f32 %v1391_v24, %v1390_v14  ;;  %v1400_v39 = vadd.f32 %v1399_v36, %v1398_v55  ;;  %v1346_v0 = vadd.f32 %v1345_v15, %v1344_v53  ;;  %v6163_v53 = vld [vmem:[#allocation229_spill] sm:$0xff]  ;;  %v6166_v32 = vld [vmem:[#allocation232_spill] sm:$0xff] }
 0x1e0   :  { %v1354_v47 = vadd.f32 %v1353_v52, %v1352_v34  ;;  %v1362_v8 = vadd.f32 %v1361_v42, %v1360_v18  ;;  %v1370_v26 = vadd.f32 %v1369_v61, %v1368_v28  ;;  %v1377_v22 = vrot.slane %v1376_v2, 2  ;;  %v6164_v18 = vld [vmem:[#allocation230_spill] sm:$0xff]  ;;  %v6165_v28 = vld [vmem:[#allocation231_spill] sm:$0xff] }
 0x1e1   :  { %v1385_v7 = vrot.slane %v1384_v54, 2  ;;  %v1393_v31 = vrot.slane %v1392_v62, 2  ;;  %v1401_v4 = vrot.slane %v1400_v39, 2  ;;  %v1347_v45 = vrot.slane %v1346_v0, 1 }
 0x1e2   :  { %v1355_v46 = vrot.slane %v1354_v47, 1  ;;  %v1363_v44 = vrot.slane %v1362_v8, 1  ;;  %v1371_v57 = vrot.slane %v1370_v26, 1  ;;  %v1378_v3 = vadd.f32 %v1377_v22, %v1376_v2  ;;  %v6173_v22 = vld [vmem:[#allocation86_spill] sm:$0xff] }
 0x1e3   :  { %v1386_v40 = vadd.f32 %v1385_v7, %v1384_v54  ;;  %v1394_v56 = vadd.f32 %v1393_v31, %v1392_v62  ;;  %v1402_v11 = vadd.f32 %v1401_v4, %v1400_v39  ;;  %v4762_v30 = vadd.f32 %v1347_v45, %v1346_v0  ;;  %v6171_v0 = vld [vmem:[#allocation84_spill] sm:$0xff]  ;;  %v6174_v31 = vld [vmem:[#allocation87_spill] sm:$0xff]  ;;  %v6175_v45 = vld [vmem:[#allocation233_spill] sm:$0xff] }
 0x1e4   :  { %v4764_v5 = vadd.f32 %v1355_v46, %v1354_v47  ;;  %v4766_v15 = vadd.f32 %v1363_v44, %v1362_v8  ;;  %v4768_v42 = vadd.f32 %v1371_v57, %v1370_v26  ;;  %v1379_v61 = vrot.slane %v1378_v3, 1  ;;  %v6172_v8 = vld [vmem:[#allocation85_spill] sm:$0xff]  ;;  %v6176_v44 = vld [vmem:[#allocation234_spill] sm:$0xff] }
 0x1e5   :  { %6159 = vst [vmem:[#allocation189_spill] sm:$0xff] %v4762_v30  ;;  %v1387_v52 = vrot.slane %v1386_v40, 1  ;;  %v1395_v14 = vrot.slane %v1394_v56, 1  ;;  %v1403_v55 = vrot.slane %v1402_v11, 1  ;;  %v1405_v34 = vsel %vm700_vm0, %v6163_v53, 0.0  ;;  %v6179_v53 = vld [vmem:[#allocation88_spill] sm:$0xff] }
 0x1e6   :  { %6160 = vst [vmem:[#allocation190_spill] sm:$0xff] %v4764_v5  ;;  %6161 = vst [vmem:[#allocation191_spill] sm:$0xff] %v4766_v15  ;;  %v1413_v2 = vsel %vm700_vm0, %v6164_v18, 0.0  ;;  %v1421_v13 = vsel %vm700_vm0, %v6165_v28, 0.0  ;;  %v1429_v24 = vsel %vm700_vm0, %v6166_v32, 0.0  ;;  %v4778_v36 = vadd.f32 %v1379_v61, %v1378_v3  ;;  %v6178_v3 = vld [vmem:[#allocation236_spill] sm:$0xff] }
 0x1e7   :  { %6162 = vst [vmem:[#allocation192_spill] sm:$0xff] %v4768_v42  ;;  %v4780_v54 = vadd.f32 %v1387_v52, %v1386_v40  ;;  %v4782_v62 = vadd.f32 %v1395_v14, %v1394_v56  ;;  %v4784_v39 = vadd.f32 %v1403_v55, %v1402_v11  ;;  %v1406_v47 = vadd.f32 %v1405_v34, %v6171_v0  ;;  %v6177_v40 = vld [vmem:[#allocation235_spill] sm:$0xff]  ;;  %v6180_v18 = vld [vmem:[#allocation89_spill] sm:$0xff]  ;;  %v6181_v28 = vld [vmem:[#allocation90_spill] sm:$0xff] }
 0x1e8   :  { %6167 = vst [vmem:[#allocation44_spill] sm:$0xff] %v4778_v36  ;;  %v1414_v26 = vadd.f32 %v1413_v2, %v6172_v8  ;;  %v1422_v7 = vadd.f32 %v1421_v13, %v6173_v22  ;;  %v1430_v4 = vadd.f32 %v1429_v24, %v6174_v31  ;;  %v1437_v46 = vsel %vm700_vm0, %v6175_v45, 0.0  ;;  %v6182_v32 = vld [vmem:[#allocation91_spill] sm:$0xff] }
 0x1e9   :  { %6168 = vst [vmem:[#allocation45_spill] sm:$0xff] %v4780_v54  ;;  %6169 = vst [vmem:[#allocation46_spill] sm:$0xff] %v4782_v62  ;;  %v1445_v57 = vsel %vm700_vm0, %v6176_v44, 0.0  ;;  %v1453_v56 = vsel %vm700_vm0, %v6177_v40, 0.0  ;;  %v1461_v11 = vsel %vm700_vm0, %v6178_v3, 0.0  ;;  %v1407_v61 = vrot.slane %v1406_v47, 4 }
 0x1ea   :  { %6170 = vst [vmem:[#allocation47_spill] sm:$0xff] %v4784_v39  ;;  %v1415_v52 = vrot.slane %v1414_v26, 4  ;;  %v1423_v14 = vrot.slane %v1422_v7, 4  ;;  %v1431_v55 = vrot.slane %v1430_v4, 4  ;;  %v1438_v34 = vadd.f32 %v1437_v46, %v6179_v53 }
 0x1eb   :  { %v1446_v2 = vadd.f32 %v1445_v57, %v6180_v18  ;;  %v1454_v13 = vadd.f32 %v1453_v56, %v6181_v28  ;;  %v1462_v24 = vadd.f32 %v1461_v11, %v6182_v32  ;;  %v1408_v0 = vadd.f32 %v1407_v61, %v1406_v47 }
 0x1ec   :  { %v1416_v8 = vadd.f32 %v1415_v52, %v1414_v26  ;;  %v1424_v22 = vadd.f32 %v1423_v14, %v1422_v7  ;;  %v1432_v31 = vadd.f32 %v1431_v55, %v1430_v4  ;;  %v1439_v45 = vrot.slane %v1438_v34, 4 }
 0x1ed   :  { %v1447_v44 = vrot.slane %v1446_v2, 4  ;;  %v1455_v40 = vrot.slane %v1454_v13, 4  ;;  %v1463_v3 = vrot.slane %v1462_v24, 4  ;;  %v1409_v62 = vrot.slane %v1408_v0, 2 }
 0x1ee   :  { %v1417_v39 = vrot.slane %v1416_v8, 2  ;;  %v1425_v36 = vrot.slane %v1424_v22, 2  ;;  %v1433_v54 = vrot.slane %v1432_v31, 2  ;;  %v1440_v15 = vadd.f32 %v1439_v45, %v1438_v34 }
 0x1ef   :  { %v1448_v46 = vadd.f32 %v1447_v44, %v1446_v2  ;;  %v1456_v53 = vadd.f32 %v1455_v40, %v1454_v13  ;;  %v1464_v57 = vadd.f32 %v1463_v3, %v1462_v24  ;;  %v1410_v18 = vadd.f32 %v1409_v62, %v1408_v0  ;;  %v6187_v0 = vld [vmem:[#allocation237_spill] sm:$0xff]  ;;  %v6190_v44 = vld [vmem:[#allocation240_spill] sm:$0xff] }
 0x1f0   :  { %v1418_v56 = vadd.f32 %v1417_v39, %v1416_v8  ;;  %v1426_v28 = vadd.f32 %v1425_v36, %v1424_v22  ;;  %v1434_v11 = vadd.f32 %v1433_v54, %v1432_v31  ;;  %v1441_v47 = vrot.slane %v1440_v15, 2  ;;  %v6188_v22 = vld [vmem:[#allocation238_spill] sm:$0xff]  ;;  %v6189_v31 = vld [vmem:[#allocation239_spill] sm:$0xff] }
 0x1f1   :  { %v1449_v26 = vrot.slane %v1448_v46, 2  ;;  %v1457_v7 = vrot.slane %v1456_v53, 2  ;;  %v1465_v4 = vrot.slane %v1464_v57, 2  ;;  %v1411_v61 = vrot.slane %v1410_v18, 1 }
 0x1f2   :  { %v1419_v52 = vrot.slane %v1418_v56, 1  ;;  %v1427_v14 = vrot.slane %v1426_v28, 1  ;;  %v1435_v55 = vrot.slane %v1434_v11, 1  ;;  %v1442_v32 = vadd.f32 %v1441_v47, %v1440_v15  ;;  %v6197_v47 = vld [vmem:[#allocation94_spill] sm:$0xff] }
 0x1f3   :  { %v1450_v42 = vadd.f32 %v1449_v26, %v1448_v46  ;;  %v1458_v30 = vadd.f32 %v1457_v7, %v1456_v53  ;;  %v1466_v5 = vadd.f32 %v1465_v4, %v1464_v57  ;;  %v4802_v34 = vadd.f32 %v1411_v61, %v1410_v18  ;;  %v6195_v18 = vld [vmem:[#allocation92_spill] sm:$0xff]  ;;  %v6198_v7 = vld [vmem:[#allocation95_spill] sm:$0xff]  ;;  %v6199_v61 = vld [vmem:[#allocation241_spill] sm:$0xff] }
 0x1f4   :  { %v4804_v2 = vadd.f32 %v1419_v52, %v1418_v56  ;;  %v4806_v62 = vadd.f32 %v1427_v14, %v1426_v28  ;;  %v4808_v36 = vadd.f32 %v1435_v55, %v1434_v11  ;;  %v1443_v54 = vrot.slane %v1442_v32, 1  ;;  %v6196_v28 = vld [vmem:[#allocation93_spill] sm:$0xff]  ;;  %v6200_v14 = vld [vmem:[#allocation242_spill] sm:$0xff] }
 0x1f5   :  { %6183 = vst [vmem:[#allocation193_spill] sm:$0xff] %v4802_v34  ;;  %v1451_v39 = vrot.slane %v1450_v42, 1  ;;  %v1459_v13 = vrot.slane %v1458_v30, 1  ;;  %v1467_v24 = vrot.slane %v1466_v5, 1  ;;  %v1469_v8 = vsel %vm700_vm0, %v6187_v0, 0.0  ;;  %v6203_v0 = vld [vmem:[#allocation96_spill] sm:$0xff] }
 0x1f6   :  { %6184 = vst [vmem:[#allocation194_spill] sm:$0xff] %v4804_v2  ;;  %6185 = vst [vmem:[#allocation195_spill] sm:$0xff] %v4806_v62  ;;  %v1477_v15 = vsel %vm700_vm0, %v6188_v22, 0.0  ;;  %v1485_v45 = vsel %vm700_vm0, %v6189_v31, 0.0  ;;  %v1493_v40 = vsel %vm700_vm0, %v6190_v44, 0.0  ;;  %v4818_v3 = vadd.f32 %v1443_v54, %v1442_v32  ;;  %v6202_v32 = vld [vmem:[#allocation244_spill] sm:$0xff] }
 0x1f7   :  { %6186 = vst [vmem:[#allocation196_spill] sm:$0xff] %v4808_v36  ;;  %v4820_v46 = vadd.f32 %v1451_v39, %v1450_v42  ;;  %v4822_v53 = vadd.f32 %v1459_v13, %v1458_v30  ;;  %v4824_v57 = vadd.f32 %v1467_v24, %v1466_v5  ;;  %v1470_v56 = vadd.f32 %v1469_v8, %v6195_v18  ;;  %v6201_v42 = vld [vmem:[#allocation243_spill] sm:$0xff]  ;;  %v6204_v22 = vld [vmem:[#allocation97_spill] sm:$0xff]  ;;  %v6205_v31 = vld [vmem:[#allocation98_spill] sm:$0xff] }
 0x1f8   :  { %6191 = vst [vmem:[#allocation48_spill] sm:$0xff] %v4818_v3  ;;  %v1478_v11 = vadd.f32 %v1477_v15, %v6196_v28  ;;  %v1486_v26 = vadd.f32 %v1485_v45, %v6197_v47  ;;  %v1494_v4 = vadd.f32 %v1493_v40, %v6198_v7  ;;  %v1501_v52 = vsel %vm700_vm0, %v6199_v61, 0.0  ;;  %v6206_v44 = vld [vmem:[#allocation99_spill] sm:$0xff] }
 0x1f9   :  { %6192 = vst [vmem:[#allocation49_spill] sm:$0xff] %v4820_v46  ;;  %6193 = vst [vmem:[#allocation50_spill] sm:$0xff] %v4822_v53  ;;  %v1509_v55 = vsel %vm700_vm0, %v6200_v14, 0.0  ;;  %v1517_v30 = vsel %vm700_vm0, %v6201_v42, 0.0  ;;  %v1525_v5 = vsel %vm700_vm0, %v6202_v32, 0.0  ;;  %v1471_v54 = vrot.slane %v1470_v56, 4 }
 0x1fa   :  { %6194 = vst [vmem:[#allocation51_spill] sm:$0xff] %v4824_v57  ;;  %v1479_v39 = vrot.slane %v1478_v11, 4  ;;  %v1487_v13 = vrot.slane %v1486_v26, 4  ;;  %v1495_v24 = vrot.slane %v1494_v4, 4  ;;  %v1502_v8 = vadd.f32 %v1501_v52, %v6203_v0 }
 0x1fb   :  { %v1510_v15 = vadd.f32 %v1509_v55, %v6204_v22  ;;  %v1518_v45 = vadd.f32 %v1517_v30, %v6205_v31  ;;  %v1526_v40 = vadd.f32 %v1525_v5, %v6206_v44  ;;  %v1472_v18 = vadd.f32 %v1471_v54, %v1470_v56 }
 0x1fc   :  { %v1480_v28 = vadd.f32 %v1479_v39, %v1478_v11  ;;  %v1488_v47 = vadd.f32 %v1487_v13, %v1486_v26  ;;  %v1496_v7 = vadd.f32 %v1495_v24, %v1494_v4  ;;  %v1503_v61 = vrot.slane %v1502_v8, 4 }
 0x1fd   :  { %v1511_v14 = vrot.slane %v1510_v15, 4  ;;  %v1519_v42 = vrot.slane %v1518_v45, 4  ;;  %v1527_v32 = vrot.slane %v1526_v40, 4  ;;  %v1473_v53 = vrot.slane %v1472_v18, 2 }
 0x1fe   :  { %v1481_v57 = vrot.slane %v1480_v28, 2  ;;  %v1489_v3 = vrot.slane %v1488_v47, 2  ;;  %v1497_v46 = vrot.slane %v1496_v7, 2  ;;  %v1504_v62 = vadd.f32 %v1503_v61, %v1502_v8 }
 0x1ff   :  { %v1512_v52 = vadd.f32 %v1511_v14, %v1510_v15  ;;  %v1520_v0 = vadd.f32 %v1519_v42, %v1518_v45  ;;  %v1528_v55 = vadd.f32 %v1527_v32, %v1526_v40  ;;  %v1474_v22 = vadd.f32 %v1473_v53, %v1472_v18  ;;  %v6210_v18 = vld [vmem:[#allocation245_spill] sm:$0xff]  ;;  %v6213_v14 = vld [vmem:[#allocation248_spill] sm:$0xff] }
 0x200   :  { %v1482_v30 = vadd.f32 %v1481_v57, %v1480_v28  ;;  %v1490_v31 = vadd.f32 %v1489_v3, %v1488_v47  ;;  %v1498_v5 = vadd.f32 %v1497_v46, %v1496_v7  ;;  %v1505_v56 = vrot.slane %v1504_v62, 2  ;;  %v6211_v47 = vld [vmem:[#allocation246_spill] sm:$0xff]  ;;  %v6212_v7 = vld [vmem:[#allocation247_spill] sm:$0xff] }
 0x201   :  { %v1513_v11 = vrot.slane %v1512_v52, 2  ;;  %v1521_v26 = vrot.slane %v1520_v0, 2  ;;  %v1529_v4 = vrot.slane %v1528_v55, 2  ;;  %v1475_v54 = vrot.slane %v1474_v22, 1 }
 0x202   :  { %v1483_v39 = vrot.slane %v1482_v30, 1  ;;  %v1491_v13 = vrot.slane %v1490_v31, 1  ;;  %v1499_v24 = vrot.slane %v1498_v5, 1  ;;  %v1506_v44 = vadd.f32 %v1505_v56, %v1504_v62  ;;  %v6220_v56 = vld [vmem:[#allocation102_spill] sm:$0xff] }
 0x203   :  { %v1514_v36 = vadd.f32 %v1513_v11, %v1512_v52  ;;  %v1522_v34 = vadd.f32 %v1521_v26, %v1520_v0  ;;  %v1530_v2 = vadd.f32 %v1529_v4, %v1528_v55  ;;  %v4842_v8 = vadd.f32 %v1475_v54, %v1474_v22  ;;  %v6218_v22 = vld [vmem:[#allocation100_spill] sm:$0xff]  ;;  %v6221_v26 = vld [vmem:[#allocation103_spill] sm:$0xff]  ;;  %v6222_v54 = vld [vmem:[#allocation249_spill] sm:$0xff] }
 0x204   :  { %v4844_v15 = vadd.f32 %v1483_v39, %v1482_v30  ;;  %v4846_v53 = vadd.f32 %v1491_v13, %v1490_v31  ;;  %v4848_v3 = vadd.f32 %v1499_v24, %v1498_v5  ;;  %v1507_v46 = vrot.slane %v1506_v44, 1  ;;  %v6219_v31 = vld [vmem:[#allocation101_spill] sm:$0xff]  ;;  %v6223_v13 = vld [vmem:[#allocation250_spill] sm:$0xff] }
 0x205   :  { %6207 = vst [vmem:[#allocation197_spill] sm:$0xff] %v4842_v8  ;;  %v1515_v57 = vrot.slane %v1514_v36, 1  ;;  %v1523_v45 = vrot.slane %v1522_v34, 1  ;;  %v1531_v40 = vrot.slane %v1530_v2, 1  ;;  %v1533_v28 = vsel %vm700_vm0, %v6210_v18, 0.0 }
 0x206   :  { %6208 = vst [vmem:[#allocation198_spill] sm:$0xff] %v4846_v53  ;;  %6209 = vst [vmem:[#allocation199_spill] sm:$0xff] %v4848_v3  ;;  %v1541_v62 = vsel %vm700_vm0, %v6211_v47, 0.0  ;;  %v1549_v61 = vsel %vm700_vm0, %v6212_v7, 0.0  ;;  %v1557_v42 = vsel %vm700_vm0, %v6213_v14, 0.0  ;;  %v4858_v32 = vadd.f32 %v1507_v46, %v1506_v44 }
 0x207   :  { %v4860_v52 = vadd.f32 %v1515_v57, %v1514_v36  ;;  %v4862_v0 = vadd.f32 %v1523_v45, %v1522_v34  ;;  %v4864_v55 = vadd.f32 %v1531_v40, %v1530_v2  ;;  %v1534_v30 = vadd.f32 %v1533_v28, %v6218_v22  ;;  %v6224_v36 = vld [vmem:[#allocation251_spill] sm:$0xff]  ;;  %v6225_v40 = vld [vmem:[#allocation104_spill] sm:$0xff]  ;;  %v6226_v28 = vld [vmem:[#allocation105_spill] sm:$0xff] }
 0x208   :  { %6214 = vst [vmem:[#allocation200_spill] sm:$0xff] %v4858_v32  ;;  %v1542_v5 = vadd.f32 %v1541_v62, %v6219_v31  ;;  %v1550_v11 = vadd.f32 %v1549_v61, %v6220_v56  ;;  %v1558_v4 = vadd.f32 %v1557_v42, %v6221_v26  ;;  %v1565_v39 = vsel %vm700_vm0, %v6222_v54, 0.0  ;;  %v6227_v62 = vld [vmem:[#allocation106_spill] sm:$0xff]  ;;  %v6228_v61 = vld [vmem:[#allocation107_spill] sm:$0xff] }
 0x209   :  { %6215 = vst [vmem:[#allocation52_spill] sm:$0xff] %v4860_v52  ;;  %6216 = vst [vmem:[#allocation53_spill] sm:$0xff] %v4862_v0  ;;  %v1573_v24 = vsel %vm700_vm0, %v6223_v13, 0.0  ;;  %v1581_v34 = vsel %vm700_vm0, %v4183_v27, 0.0  ;;  %v1589_v2 = vsel %vm700_vm0, %v6224_v36, 0.0  ;;  %v1535_v44 = vrot.slane %v1534_v30, 4 }
 0x20a   :  { %6217 = vst [vmem:[#allocation54_spill] sm:$0xff] %v4864_v55  ;;  %v1543_v46 = vrot.slane %v1542_v5, 4  ;;  %v1551_v57 = vrot.slane %v1550_v11, 4  ;;  %v1559_v45 = vrot.slane %v1558_v4, 4  ;;  %v1566_v18 = vadd.f32 %v1565_v39, %v6225_v40 }
 0x20b   :  { %v1574_v47 = vadd.f32 %v1573_v24, %v6226_v28  ;;  %v1582_v7 = vadd.f32 %v1581_v34, %v6227_v62  ;;  %v1590_v14 = vadd.f32 %v1589_v2, %v6228_v61  ;;  %v1536_v42 = vadd.f32 %v1535_v44, %v1534_v30 }
 0x20c   :  { %v1544_v22 = vadd.f32 %v1543_v46, %v1542_v5  ;;  %v1552_v31 = vadd.f32 %v1551_v57, %v1550_v11  ;;  %v1560_v56 = vadd.f32 %v1559_v45, %v1558_v4  ;;  %v1567_v27 = vrot.slane %v1566_v18, 4 }
 0x20d   :  { %v1575_v26 = vrot.slane %v1574_v47, 4  ;;  %v1583_v54 = vrot.slane %v1582_v7, 4  ;;  %v1591_v13 = vrot.slane %v1590_v14, 4  ;;  %v1537_v36 = vrot.slane %v1536_v42, 2 }
 0x20e   :  { %v1545_v0 = vrot.slane %v1544_v22, 2  ;;  %v1553_v55 = vrot.slane %v1552_v31, 2  ;;  %v1561_v32 = vrot.slane %v1560_v56, 2  ;;  %v1568_v52 = vadd.f32 %v1567_v27, %v1566_v18 }
 0x20f   :  { %v1576_v39 = vadd.f32 %v1575_v26, %v1574_v47  ;;  %v1584_v40 = vadd.f32 %v1583_v54, %v1582_v7  ;;  %v1592_v24 = vadd.f32 %v1591_v13, %v1590_v14  ;;  %v1538_v28 = vadd.f32 %v1537_v36, %v1536_v42  ;;  %v6233_v26 = vld [vmem:[#allocation254_spill] sm:$0xff] }
 0x210   :  { %v1546_v34 = vadd.f32 %v1545_v0, %v1544_v22  ;;  %v1554_v62 = vadd.f32 %v1553_v55, %v1552_v31  ;;  %v1562_v2 = vadd.f32 %v1561_v32, %v1560_v56  ;;  %v1569_v30 = vrot.slane %v1568_v52, 2  ;;  %v6231_v22 = vld [vmem:[#allocation252_spill] sm:$0xff]  ;;  %v6232_v56 = vld [vmem:[#allocation253_spill] sm:$0xff] }
 0x211   :  { %v1577_v5 = vrot.slane %v1576_v39, 2  ;;  %v1585_v11 = vrot.slane %v1584_v40, 2  ;;  %v1593_v4 = vrot.slane %v1592_v24, 2  ;;  %v1539_v44 = vrot.slane %v1538_v28, 1 }
 0x212   :  { %v1547_v46 = vrot.slane %v1546_v34, 1  ;;  %v1555_v57 = vrot.slane %v1554_v62, 1  ;;  %v1563_v45 = vrot.slane %v1562_v2, 1  ;;  %v1570_v61 = vadd.f32 %v1569_v30, %v1568_v52 }
 0x213   :  { %v1578_v53 = vadd.f32 %v1577_v5, %v1576_v39  ;;  %v1586_v3 = vadd.f32 %v1585_v11, %v1584_v40  ;;  %v1594_v8 = vadd.f32 %v1593_v4, %v1592_v24  ;;  %v4882_v18 = vadd.f32 %v1539_v44, %v1538_v28  ;;  %v6238_v24 = vld [vmem:[#allocation108_spill] sm:$0xff]  ;;  %v6241_v5 = vld [vmem:[#allocation111_spill] sm:$0xff] }
 0x214   :  { %v4884_v47 = vadd.f32 %v1547_v46, %v1546_v34  ;;  %v4886_v7 = vadd.f32 %v1555_v57, %v1554_v62  ;;  %v4888_v0 = vadd.f32 %v1563_v45, %v1562_v2  ;;  %v1571_v32 = vrot.slane %v1570_v61, 1  ;;  %v6239_v34 = vld [vmem:[#allocation109_spill] sm:$0xff]  ;;  %v6240_v2 = vld [vmem:[#allocation110_spill] sm:$0xff]  ;;  %v6243_v44 = vld [vmem:[#allocation256_spill] sm:$0xff] }
 0x215   :  { %v1579_v55 = vrot.slane %v1578_v53, 1  ;;  %v1587_v14 = vrot.slane %v1586_v3, 1  ;;  %v1595_v42 = vrot.slane %v1594_v8, 1  ;;  %v1597_v31 = vsel %vm700_vm0, %v6231_v22, 0.0 }
 0x216   :  { %6229 = vst [vmem:[#allocation55_spill] sm:$0xff] %v4886_v7  ;;  %6230 = vst [vmem:[#allocation201_spill] sm:$0xff] %v4888_v0  ;;  %v1605_v52 = vsel %vm700_vm0, %v6232_v56, 0.0  ;;  %v1613_v27 = vsel %vm700_vm0, %v4195_v23, 0.0  ;;  %v1621_v54 = vsel %vm700_vm0, %v6233_v26, 0.0  ;;  %v4898_v13 = vadd.f32 %v1571_v32, %v1570_v61  ;;  %v6242_v23 = vld [vmem:[#allocation255_spill] sm:$0xff] }
 0x217   :  { %v4900_v36 = vadd.f32 %v1579_v55, %v1578_v53  ;;  %v4902_v39 = vadd.f32 %v1587_v14, %v1586_v3  ;;  %v4904_v40 = vadd.f32 %v1595_v42, %v1594_v8  ;;  %v1598_v28 = vadd.f32 %v1597_v31, %v6238_v24  ;;  %v6244_v3 = vld [vmem:[#allocation257_spill] sm:$0xff]  ;;  %v6245_v55 = vld [vmem:[#allocation112_spill] sm:$0xff]  ;;  %v6247_v31 = vld [vmem:[#allocation114_spill] sm:$0xff] }
 0x218   :  { %6234 = vst [vmem:[#allocation202_spill] sm:$0xff] %v4898_v13  ;;  %v1606_v62 = vadd.f32 %v1605_v52, %v6239_v34  ;;  %v1614_v30 = vadd.f32 %v1613_v27, %v6240_v2  ;;  %v1622_v11 = vadd.f32 %v1621_v54, %v6241_v5  ;;  %v1629_v4 = vsel %vm700_vm0, %v6242_v23, 0.0  ;;  %v6246_v42 = vld [vmem:[#allocation113_spill] sm:$0xff]  ;;  %v6248_v52 = vld [vmem:[#allocation115_spill] sm:$0xff] }
 0x219   :  { %6235 = vst [vmem:[#allocation203_spill] sm:$0xff] %v4900_v36  ;;  %6236 = vst [vmem:[#allocation204_spill] sm:$0xff] %v4902_v39  ;;  %v1637_v46 = vsel %vm700_vm0, %v6243_v44, 0.0  ;;  %v1645_v53 = vsel %vm700_vm0, %v4207_v41, 0.0  ;;  %v1653_v8 = vsel %vm700_vm0, %v6244_v3, 0.0  ;;  %v1599_v57 = vrot.slane %v1598_v28, 4 }
 0x21a   :  { %6237 = vst [vmem:[#allocation56_spill] sm:$0xff] %v4904_v40  ;;  %v1607_v45 = vrot.slane %v1606_v62, 4  ;;  %v1615_v61 = vrot.slane %v1614_v30, 4  ;;  %v1623_v32 = vrot.slane %v1622_v11, 4  ;;  %v1630_v14 = vadd.f32 %v1629_v4, %v6245_v55 }
 0x21b   :  { %v1638_v22 = vadd.f32 %v1637_v46, %v6246_v42  ;;  %v1646_v56 = vadd.f32 %v1645_v53, %v6247_v31  ;;  %v1654_v27 = vadd.f32 %v1653_v8, %v6248_v52  ;;  %v1600_v26 = vadd.f32 %v1599_v57, %v1598_v28 }
 0x21c   :  { %v1608_v54 = vadd.f32 %v1607_v45, %v1606_v62  ;;  %v1616_v24 = vadd.f32 %v1615_v61, %v1614_v30  ;;  %v1624_v34 = vadd.f32 %v1623_v32, %v1622_v11  ;;  %v1631_v41 = vrot.slane %v1630_v14, 4 }
 0x21d   :  { %v1639_v2 = vrot.slane %v1638_v22, 4  ;;  %v1647_v5 = vrot.slane %v1646_v56, 4  ;;  %v1655_v23 = vrot.slane %v1654_v27, 4  ;;  %v1601_v44 = vrot.slane %v1600_v26, 2 }
 0x21e   :  { %v1609_v3 = vrot.slane %v1608_v54, 2  ;;  %v1617_v39 = vrot.slane %v1616_v24, 2  ;;  %v1625_v40 = vrot.slane %v1624_v34, 2  ;;  %v1632_v13 = vadd.f32 %v1631_v41, %v1630_v14  ;;  %v6252_v41 = vld [vmem:[#allocation259_spill] sm:$0xff] }
 0x21f   :  { %v1640_v4 = vadd.f32 %v1639_v2, %v1638_v22  ;;  %v1648_v55 = vadd.f32 %v1647_v5, %v1646_v56  ;;  %v1656_v46 = vadd.f32 %v1655_v23, %v1654_v27  ;;  %v1602_v42 = vadd.f32 %v1601_v44, %v1600_v26  ;;  %v6253_v5 = vld [vmem:[#allocation260_spill] sm:$0xff] }
 0x220   :  { %v1610_v53 = vadd.f32 %v1609_v3, %v1608_v54  ;;  %v1618_v31 = vadd.f32 %v1617_v39, %v1616_v24  ;;  %v1626_v8 = vadd.f32 %v1625_v40, %v1624_v34  ;;  %v1633_v28 = vrot.slane %v1632_v13, 2  ;;  %v6251_v24 = vld [vmem:[#allocation258_spill] sm:$0xff] }
 0x221   :  { %v1641_v62 = vrot.slane %v1640_v4, 2  ;;  %v1649_v30 = vrot.slane %v1648_v55, 2  ;;  %v1657_v11 = vrot.slane %v1656_v46, 2  ;;  %v1603_v57 = vrot.slane %v1602_v42, 1 }
 0x222   :  { %v1611_v45 = vrot.slane %v1610_v53, 1  ;;  %v1619_v61 = vrot.slane %v1618_v31, 1  ;;  %v1627_v32 = vrot.slane %v1626_v8, 1  ;;  %v1634_v52 = vadd.f32 %v1633_v28, %v1632_v13 }
 0x223   :  { %v1642_v36 = vadd.f32 %v1641_v62, %v1640_v4  ;;  %v1650_v7 = vadd.f32 %v1649_v30, %v1648_v55  ;;  %v1658_v0 = vadd.f32 %v1657_v11, %v1656_v46  ;;  %v4922_v14 = vadd.f32 %v1603_v57, %v1602_v42  ;;  %v6258_v46 = vld [vmem:[#allocation116_spill] sm:$0xff]  ;;  %v6261_v62 = vld [vmem:[#allocation119_spill] sm:$0xff]  ;;  %v6263_v57 = vld [vmem:[#allocation262_spill] sm:$0xff] }
 0x224   :  { %v4924_v22 = vadd.f32 %v1611_v45, %v1610_v53  ;;  %v4926_v56 = vadd.f32 %v1619_v61, %v1618_v31  ;;  %v4928_v39 = vadd.f32 %v1627_v32, %v1626_v8  ;;  %v1635_v40 = vrot.slane %v1634_v52, 1  ;;  %v6259_v53 = vld [vmem:[#allocation117_spill] sm:$0xff]  ;;  %v6260_v8 = vld [vmem:[#allocation118_spill] sm:$0xff] }
 0x225   :  { %v1643_v27 = vrot.slane %v1642_v36, 1  ;;  %v1651_v26 = vrot.slane %v1650_v7, 1  ;;  %v1659_v54 = vrot.slane %v1658_v0, 1  ;;  %v1661_v34 = vsel %vm700_vm0, %v6251_v24, 0.0 }
 0x226   :  { %6249 = vst [vmem:[#allocation57_spill] sm:$0xff] %v4926_v56  ;;  %6250 = vst [vmem:[#allocation58_spill] sm:$0xff] %v4928_v39  ;;  %v1669_v13 = vsel %vm700_vm0, %v6252_v41, 0.0  ;;  %v1677_v2 = vsel %vm700_vm0, %v4219_v50, 0.0  ;;  %v1685_v23 = vsel %vm700_vm0, %v6253_v5, 0.0  ;;  %v4938_v44 = vadd.f32 %v1635_v40, %v1634_v52  ;;  %v6262_v50 = vld [vmem:[#allocation261_spill] sm:$0xff] }
 0x227   :  { %v4940_v3 = vadd.f32 %v1643_v27, %v1642_v36  ;;  %v4942_v4 = vadd.f32 %v1651_v26, %v1650_v7  ;;  %v4944_v55 = vadd.f32 %v1659_v54, %v1658_v0  ;;  %v1662_v42 = vadd.f32 %v1661_v34, %v6258_v46  ;;  %v6264_v36 = vld [vmem:[#allocation263_spill] sm:$0xff]  ;;  %v6265_v27 = vld [vmem:[#allocation120_spill] sm:$0xff]  ;;  %v6266_v54 = vld [vmem:[#allocation121_spill] sm:$0xff] }
 0x228   :  { %6254 = vst [vmem:[#allocation59_spill] sm:$0xff] %v4938_v44  ;;  %v1670_v31 = vadd.f32 %v1669_v13, %v6259_v53  ;;  %v1678_v28 = vadd.f32 %v1677_v2, %v6260_v8  ;;  %v1686_v30 = vadd.f32 %v1685_v23, %v6261_v62  ;;  %v1693_v11 = vsel %vm700_vm0, %v6262_v50, 0.0  ;;  %v6267_v34 = vld [vmem:[#allocation122_spill] sm:$0xff]  ;;  %v6268_v13 = vld [vmem:[#allocation123_spill] sm:$0xff] }
 0x229   :  { %6255 = vst [vmem:[#allocation205_spill] sm:$0xff] %v4940_v3  ;;  %6256 = vst [vmem:[#allocation206_spill] sm:$0xff] %v4942_v4  ;;  %v1701_v45 = vsel %vm700_vm0, %v6263_v57, 0.0  ;;  %v1709_v7 = vsel %vm700_vm0, %v4231_v58, 0.0  ;;  %v1717_v0 = vsel %vm700_vm0, %v6264_v36, 0.0  ;;  %v1663_v61 = vrot.slane %v1662_v42, 4 }
 0x22a   :  { %6257 = vst [vmem:[#allocation207_spill] sm:$0xff] %v4944_v55  ;;  %v1671_v32 = vrot.slane %v1670_v31, 4  ;;  %v1679_v52 = vrot.slane %v1678_v28, 4  ;;  %v1687_v40 = vrot.slane %v1686_v30, 4  ;;  %v1694_v26 = vadd.f32 %v1693_v11, %v6265_v27 }
 0x22b   :  { %v1702_v24 = vadd.f32 %v1701_v45, %v6266_v54  ;;  %v1710_v41 = vadd.f32 %v1709_v7, %v6267_v34  ;;  %v1718_v2 = vadd.f32 %v1717_v0, %v6268_v13  ;;  %v1664_v5 = vadd.f32 %v1663_v61, %v1662_v42 }
 0x22c   :  { %v1672_v23 = vadd.f32 %v1671_v32, %v1670_v31  ;;  %v1680_v46 = vadd.f32 %v1679_v52, %v1678_v28  ;;  %v1688_v53 = vadd.f32 %v1687_v40, %v1686_v30  ;;  %v1695_v58 = vrot.slane %v1694_v26, 4 }
 0x22d   :  { %v1703_v8 = vrot.slane %v1702_v24, 4  ;;  %v1711_v62 = vrot.slane %v1710_v41, 4  ;;  %v1719_v50 = vrot.slane %v1718_v2, 4  ;;  %v1665_v57 = vrot.slane %v1664_v5, 2 }
 0x22e   :  { %v1673_v36 = vrot.slane %v1672_v23, 2  ;;  %v1681_v4 = vrot.slane %v1680_v46, 2  ;;  %v1689_v55 = vrot.slane %v1688_v53, 2  ;;  %v1696_v44 = vadd.f32 %v1695_v58, %v1694_v26  ;;  %v6272_v58 = vld [vmem:[#allocation265_spill] sm:$0xff] }
 0x22f   :  { %v1704_v11 = vadd.f32 %v1703_v8, %v1702_v24  ;;  %v1712_v27 = vadd.f32 %v1711_v62, %v1710_v41  ;;  %v1720_v45 = vadd.f32 %v1719_v50, %v1718_v2  ;;  %v1666_v54 = vadd.f32 %v1665_v57, %v1664_v5  ;;  %v6273_v62 = vld [vmem:[#allocation266_spill] sm:$0xff] }
 0x230   :  { %v1674_v7 = vadd.f32 %v1673_v36, %v1672_v23  ;;  %v1682_v34 = vadd.f32 %v1681_v4, %v1680_v46  ;;  %v1690_v0 = vadd.f32 %v1689_v55, %v1688_v53  ;;  %v1697_v42 = vrot.slane %v1696_v44, 2  ;;  %v6271_v46 = vld [vmem:[#allocation264_spill] sm:$0xff] }
 0x231   :  { %v1705_v31 = vrot.slane %v1704_v11, 2  ;;  %v1713_v28 = vrot.slane %v1712_v27, 2  ;;  %v1721_v30 = vrot.slane %v1720_v45, 2  ;;  %v1667_v61 = vrot.slane %v1666_v54, 1 }
 0x232   :  { %v1675_v32 = vrot.slane %v1674_v7, 1  ;;  %v1683_v52 = vrot.slane %v1682_v34, 1  ;;  %v1691_v40 = vrot.slane %v1690_v0, 1  ;;  %v1698_v13 = vadd.f32 %v1697_v42, %v1696_v44 }
 0x233   :  { %v1706_v3 = vadd.f32 %v1705_v31, %v1704_v11  ;;  %v1714_v56 = vadd.f32 %v1713_v28, %v1712_v27  ;;  %v1722_v39 = vadd.f32 %v1721_v30, %v1720_v45  ;;  %v4962_v26 = vadd.f32 %v1667_v61, %v1666_v54  ;;  %v6278_v45 = vld [vmem:[#allocation124_spill] sm:$0xff]  ;;  %v6281_v31 = vld [vmem:[#allocation127_spill] sm:$0xff] }
 0x234   :  { %v4964_v24 = vadd.f32 %v1675_v32, %v1674_v7  ;;  %v4966_v41 = vadd.f32 %v1683_v52, %v1682_v34  ;;  %v4968_v4 = vadd.f32 %v1691_v40, %v1690_v0  ;;  %v1699_v55 = vrot.slane %v1698_v13, 1  ;;  %v6279_v7 = vld [vmem:[#allocation125_spill] sm:$0xff]  ;;  %v6280_v0 = vld [vmem:[#allocation126_spill] sm:$0xff]  ;;  %v6283_v61 = vld [vmem:[#allocation268_spill] sm:$0xff] }
 0x235   :  { %v1707_v2 = vrot.slane %v1706_v3, 1  ;;  %v1715_v5 = vrot.slane %v1714_v56, 1  ;;  %v1723_v23 = vrot.slane %v1722_v39, 1  ;;  %v1725_v53 = vsel %vm700_vm0, %v6271_v46, 0.0 }
 0x236   :  { %6269 = vst [vmem:[#allocation208_spill] sm:$0xff] %v4966_v41  ;;  %6270 = vst [vmem:[#allocation60_spill] sm:$0xff] %v4968_v4  ;;  %v1733_v44 = vsel %vm700_vm0, %v6272_v58, 0.0  ;;  %v1741_v8 = vsel %vm700_vm0, %v4243_v12, 0.0  ;;  %v1749_v50 = vsel %vm700_vm0, %v6273_v62, 0.0  ;;  %v4978_v57 = vadd.f32 %v1699_v55, %v1698_v13  ;;  %v6282_v12 = vld [vmem:[#allocation267_spill] sm:$0xff] }
 0x237   :  { %v4980_v36 = vadd.f32 %v1707_v2, %v1706_v3  ;;  %v4982_v11 = vadd.f32 %v1715_v5, %v1714_v56  ;;  %v4984_v27 = vadd.f32 %v1723_v23, %v1722_v39  ;;  %v1726_v54 = vadd.f32 %v1725_v53, %v6278_v45  ;;  %v6284_v3 = vld [vmem:[#allocation269_spill] sm:$0xff]  ;;  %v6285_v2 = vld [vmem:[#allocation128_spill] sm:$0xff]  ;;  %v6287_v53 = vld [vmem:[#allocation130_spill] sm:$0xff] }
 0x238   :  { %6274 = vst [vmem:[#allocation61_spill] sm:$0xff] %v4978_v57  ;;  %v1734_v34 = vadd.f32 %v1733_v44, %v6279_v7  ;;  %v1742_v42 = vadd.f32 %v1741_v8, %v6280_v0  ;;  %v1750_v28 = vadd.f32 %v1749_v50, %v6281_v31  ;;  %v1757_v30 = vsel %vm700_vm0, %v6282_v12, 0.0  ;;  %v6286_v23 = vld [vmem:[#allocation129_spill] sm:$0xff]  ;;  %v6288_v44 = vld [vmem:[#allocation131_spill] sm:$0xff] }
 0x239   :  { %6275 = vst [vmem:[#allocation62_spill] sm:$0xff] %v4980_v36  ;;  %6276 = vst [vmem:[#allocation63_spill] sm:$0xff] %v4982_v11  ;;  %v1765_v32 = vsel %vm700_vm0, %v6283_v61, 0.0  ;;  %v1773_v56 = vsel %vm700_vm0, %v4255_v21, 0.0  ;;  %v1781_v39 = vsel %vm700_vm0, %v6284_v3, 0.0  ;;  %v1727_v52 = vrot.slane %v1726_v54, 4 }
 0x23a   :  { %6277 = vst [vmem:[#allocation209_spill] sm:$0xff] %v4984_v27  ;;  %v1735_v40 = vrot.slane %v1734_v34, 4  ;;  %v1743_v13 = vrot.slane %v1742_v42, 4  ;;  %v1751_v55 = vrot.slane %v1750_v28, 4  ;;  %v1758_v5 = vadd.f32 %v1757_v30, %v6285_v2 }
 0x23b   :  { %v1766_v46 = vadd.f32 %v1765_v32, %v6286_v23  ;;  %v1774_v58 = vadd.f32 %v1773_v56, %v6287_v53  ;;  %v1782_v8 = vadd.f32 %v1781_v39, %v6288_v44  ;;  %v1728_v62 = vadd.f32 %v1727_v52, %v1726_v54 }
 0x23c   :  { %v1736_v50 = vadd.f32 %v1735_v40, %v1734_v34  ;;  %v1744_v45 = vadd.f32 %v1743_v13, %v1742_v42  ;;  %v1752_v7 = vadd.f32 %v1751_v55, %v1750_v28  ;;  %v1759_v21 = vrot.slane %v1758_v5, 4 }
 0x23d   :  { %v1767_v0 = vrot.slane %v1766_v46, 4  ;;  %v1775_v31 = vrot.slane %v1774_v58, 4  ;;  %v1783_v12 = vrot.slane %v1782_v8, 4  ;;  %v1729_v61 = vrot.slane %v1728_v62, 2 }
 0x23e   :  { %v1737_v3 = vrot.slane %v1736_v50, 2  ;;  %v1745_v11 = vrot.slane %v1744_v45, 2  ;;  %v1753_v27 = vrot.slane %v1752_v7, 2  ;;  %v1760_v57 = vadd.f32 %v1759_v21, %v1758_v5  ;;  %v6291_v21 = vld [vmem:[#allocation271_spill] sm:$0xff] }
 0x23f   :  { %v1768_v30 = vadd.f32 %v1767_v0, %v1766_v46  ;;  %v1776_v2 = vadd.f32 %v1775_v31, %v1774_v58  ;;  %v1784_v32 = vadd.f32 %v1783_v12, %v1782_v8  ;;  %v1730_v23 = vadd.f32 %v1729_v61, %v1728_v62  ;;  %v6292_v31 = vld [vmem:[#allocation272_spill] sm:$0xff] }
 0x240   :  { %v1738_v56 = vadd.f32 %v1737_v3, %v1736_v50  ;;  %v1746_v53 = vadd.f32 %v1745_v11, %v1744_v45  ;;  %v1754_v39 = vadd.f32 %v1753_v27, %v1752_v7  ;;  %v1761_v54 = vrot.slane %v1760_v57, 2  ;;  %v6290_v45 = vld [vmem:[#allocation270_spill] sm:$0xff] }
 0x241   :  { %v1769_v34 = vrot.slane %v1768_v30, 2  ;;  %v1777_v42 = vrot.slane %v1776_v2, 2  ;;  %v1785_v28 = vrot.slane %v1784_v32, 2  ;;  %v1731_v52 = vrot.slane %v1730_v23, 1 }
 0x242   :  { %v1739_v40 = vrot.slane %v1738_v56, 1  ;;  %v1747_v13 = vrot.slane %v1746_v53, 1  ;;  %v1755_v55 = vrot.slane %v1754_v39, 1  ;;  %v1762_v44 = vadd.f32 %v1761_v54, %v1760_v57 }
 0x243   :  { %v1770_v36 = vadd.f32 %v1769_v34, %v1768_v30  ;;  %v1778_v41 = vadd.f32 %v1777_v42, %v1776_v2  ;;  %v1786_v4 = vadd.f32 %v1785_v28, %v1784_v32  ;;  %v5002_v5 = vadd.f32 %v1731_v52, %v1730_v23  ;;  %v6297_v32 = vld [vmem:[#allocation132_spill] sm:$0xff]  ;;  %v6300_v34 = vld [vmem:[#allocation135_spill] sm:$0xff]  ;;  %v6302_v52 = vld [vmem:[#allocation274_spill] sm:$0xff] }
 0x244   :  { %v5004_v46 = vadd.f32 %v1739_v40, %v1738_v56  ;;  %v5006_v58 = vadd.f32 %v1747_v13, %v1746_v53  ;;  %v5008_v11 = vadd.f32 %v1755_v55, %v1754_v39  ;;  %v1763_v27 = vrot.slane %v1762_v44, 1  ;;  %v6298_v56 = vld [vmem:[#allocation133_spill] sm:$0xff]  ;;  %v6299_v39 = vld [vmem:[#allocation134_spill] sm:$0xff] }
 0x245   :  { %v1771_v8 = vrot.slane %v1770_v36, 1  ;;  %v1779_v62 = vrot.slane %v1778_v41, 1  ;;  %v1787_v50 = vrot.slane %v1786_v4, 1  ;;  %v1789_v7 = vsel %vm700_vm0, %v6290_v45, 0.0  ;;  %v6305_v45 = vld [vmem:[#allocation138_spill] sm:$0xff] }
 0x246   :  { %6289 = vst [vmem:[#allocation210_spill] sm:$0xff] %v5006_v58  ;;  %v1797_v57 = vsel %vm700_vm0, %v6291_v21, 0.0  ;;  %v1805_v0 = vsel %vm700_vm0, %v4267_v33, 0.0  ;;  %v1813_v12 = vsel %vm700_vm0, %v6292_v31, 0.0  ;;  %v5018_v61 = vadd.f32 %v1763_v27, %v1762_v44  ;;  %v6301_v33 = vld [vmem:[#allocation273_spill] sm:$0xff]  ;;  %v6303_v27 = vld [vmem:[#allocation136_spill] sm:$0xff] }
 0x247   :  { %v5020_v3 = vadd.f32 %v1771_v8, %v1770_v36  ;;  %v5022_v30 = vadd.f32 %v1779_v62, %v1778_v41  ;;  %v5024_v2 = vadd.f32 %v1787_v50, %v1786_v4  ;;  %v1790_v23 = vadd.f32 %v1789_v7, %v6297_v32  ;;  %v6304_v62 = vld [vmem:[#allocation137_spill] sm:$0xff]  ;;  %v6306_v21 = vld [vmem:[#allocation139_spill] sm:$0xff] }
 0x248   :  { %6293 = vst [vmem:[#allocation211_spill] sm:$0xff] %v5018_v61  ;;  %v1798_v53 = vadd.f32 %v1797_v57, %v6298_v56  ;;  %v1806_v54 = vadd.f32 %v1805_v0, %v6299_v39  ;;  %v1814_v42 = vadd.f32 %v1813_v12, %v6300_v34  ;;  %v1821_v28 = vsel %vm700_vm0, %v6301_v33, 0.0 }
 0x249   :  { %6294 = vst [vmem:[#allocation212_spill] sm:$0xff] %v5020_v3  ;;  %6295 = vst [vmem:[#allocation64_spill] sm:$0xff] %v5022_v30  ;;  %v1829_v40 = vsel %vm700_vm0, %v6302_v52, 0.0  ;;  %v1837_v41 = vsel %vm700_vm0, %v4279_v25, 0.0  ;;  %v1845_v4 = vsel %vm700_vm0, %v4282_v35, 0.0  ;;  %v1791_v36 = vrot.slane %v1790_v23, 4 }
 0x24a   :  { %6296 = vst [vmem:[#allocation65_spill] sm:$0xff] %v5024_v2  ;;  %v1799_v13 = vrot.slane %v1798_v53, 4  ;;  %v1807_v55 = vrot.slane %v1806_v54, 4  ;;  %v1815_v44 = vrot.slane %v1814_v42, 4  ;;  %v1822_v8 = vadd.f32 %v1821_v28, %v6303_v27 }
 0x24b   :  { %v1830_v50 = vadd.f32 %v1829_v40, %v6304_v62  ;;  %v1838_v7 = vadd.f32 %v1837_v41, %v6305_v45  ;;  %v1846_v57 = vadd.f32 %v1845_v4, %v6306_v21  ;;  %v1792_v0 = vadd.f32 %v1791_v36, %v1790_v23 }
 0x24c   :  { %v1800_v31 = vadd.f32 %v1799_v13, %v1798_v53  ;;  %v1808_v12 = vadd.f32 %v1807_v55, %v1806_v54  ;;  %v1816_v32 = vadd.f32 %v1815_v44, %v1814_v42  ;;  %v1823_v25 = vrot.slane %v1822_v8, 4 }
 0x24d   :  { %v1831_v56 = vrot.slane %v1830_v50, 4  ;;  %v1839_v39 = vrot.slane %v1838_v7, 4  ;;  %v1847_v35 = vrot.slane %v1846_v57, 4  ;;  %v1793_v34 = vrot.slane %v1792_v0, 2 }
 0x24e   :  { %v1801_v33 = vrot.slane %v1800_v31, 2  ;;  %v1809_v52 = vrot.slane %v1808_v12, 2  ;;  %v1817_v30 = vrot.slane %v1816_v32, 2  ;;  %v1824_v2 = vadd.f32 %v1823_v25, %v1822_v8  ;;  %v6307_v25 = vld [vmem:[#allocation275_spill] sm:$0xff] }
 0x24f   :  { %v1832_v28 = vadd.f32 %v1831_v56, %v1830_v50  ;;  %v1840_v27 = vadd.f32 %v1839_v39, %v1838_v7  ;;  %v1848_v40 = vadd.f32 %v1847_v35, %v1846_v57  ;;  %v1794_v62 = vadd.f32 %v1793_v34, %v1792_v0 }
 0x250   :  { %v1802_v41 = vadd.f32 %v1801_v33, %v1800_v31  ;;  %v1810_v45 = vadd.f32 %v1809_v52, %v1808_v12  ;;  %v1818_v4 = vadd.f32 %v1817_v30, %v1816_v32  ;;  %v1825_v23 = vrot.slane %v1824_v2, 2 }
 0x251   :  { %v1833_v53 = vrot.slane %v1832_v28, 2  ;;  %v1841_v54 = vrot.slane %v1840_v27, 2  ;;  %v1849_v42 = vrot.slane %v1848_v40, 2  ;;  %v1795_v36 = vrot.slane %v1794_v62, 1 }
 0x252   :  { %v1803_v13 = vrot.slane %v1802_v41, 1  ;;  %v1811_v55 = vrot.slane %v1810_v45, 1  ;;  %v1819_v44 = vrot.slane %v1818_v4, 1  ;;  %v1826_v21 = vadd.f32 %v1825_v23, %v1824_v2  ;;  %v6316_v23 = vld [vmem:[#allocation277_spill] sm:$0xff] }
 0x253   :  { %v1834_v61 = vadd.f32 %v1833_v53, %v1832_v28  ;;  %v1842_v3 = vadd.f32 %v1841_v54, %v1840_v27  ;;  %v1850_v58 = vadd.f32 %v1849_v42, %v1848_v40  ;;  %v5042_v8 = vadd.f32 %v1795_v36, %v1794_v62  ;;  %v6311_v28 = vld [vmem:[#allocation140_spill] sm:$0xff]  ;;  %v6313_v62 = vld [vmem:[#allocation142_spill] sm:$0xff] }
 0x254   :  { %v5044_v50 = vadd.f32 %v1803_v13, %v1802_v41  ;;  %v5046_v7 = vadd.f32 %v1811_v55, %v1810_v45  ;;  %v5048_v57 = vadd.f32 %v1819_v44, %v1818_v4  ;;  %v1827_v30 = vrot.slane %v1826_v21, 1  ;;  %v6314_v45 = vld [vmem:[#allocation143_spill] sm:$0xff]  ;;  %v6317_v13 = vld [vmem:[#allocation144_spill] sm:$0xff]  ;;  %v6318_v44 = vld [vmem:[#allocation145_spill] sm:$0xff] }
 0x255   :  { %v1835_v0 = vrot.slane %v1834_v61, 1  ;;  %v1843_v31 = vrot.slane %v1842_v3, 1  ;;  %v1851_v12 = vrot.slane %v1850_v58, 1  ;;  %v1853_v32 = vsel %vm700_vm0, %v4285_v51, 0.0  ;;  %v6312_v51 = vld [vmem:[#allocation141_spill] sm:$0xff] }
 0x256   :  { %v1861_v2 = vsel %vm700_vm0, %v6307_v25, 0.0  ;;  %v1869_v56 = vsel %vm700_vm0, %v4291_v59, 0.0  ;;  %v1877_v39 = vsel %vm700_vm0, %v4294_v48, 0.0  ;;  %v5058_v35 = vadd.f32 %v1827_v30, %v1826_v21  ;;  %v6319_v30 = vld [vmem:[#allocation146_spill] sm:$0xff] }
 0x257   :  { %v5060_v34 = vadd.f32 %v1835_v0, %v1834_v61  ;;  %v5062_v33 = vadd.f32 %v1843_v31, %v1842_v3  ;;  %v5064_v52 = vadd.f32 %v1851_v12, %v1850_v58  ;;  %v1854_v27 = vadd.f32 %v1853_v32, %v6311_v28  ;;  %v6315_v61 = vld [vmem:[#allocation276_spill] sm:$0xff] }
 0x258   :  { %6308 = vst [vmem:[#allocation66_spill] sm:$0xff] %v5058_v35  ;;  %v1862_v40 = vadd.f32 %v1861_v2, %v6312_v51  ;;  %v1870_v41 = vadd.f32 %v1869_v56, %v6313_v62  ;;  %v1878_v4 = vadd.f32 %v1877_v39, %v6314_v45  ;;  %v1885_v59 = vsel %vm700_vm0, %v4297_v49, 0.0  ;;  %v6320_v49 = vld [vmem:[#allocation147_spill] sm:$0xff] }
 0x259   :  { %6309 = vst [vmem:[#allocation67_spill] sm:$0xff] %v5062_v33  ;;  %6310 = vst [vmem:[#allocation213_spill] sm:$0xff] %v5064_v52  ;;  %v1893_v48 = vsel %vm700_vm0, %v4300_v60, 0.0  ;;  %v1901_v3 = vsel %vm700_vm0, %v6315_v61, 0.0  ;;  %v1909_v58 = vsel %vm700_vm0, %v6316_v23, 0.0  ;;  %v1855_v53 = vrot.slane %v1854_v27, 4 }
 0x25a   :  { %v1863_v54 = vrot.slane %v1862_v40, 4  ;;  %v1871_v42 = vrot.slane %v1870_v41, 4  ;;  %v1879_v36 = vrot.slane %v1878_v4, 4  ;;  %v1886_v55 = vadd.f32 %v1885_v59, %v6317_v13 }
 0x25b   :  { %v1894_v21 = vadd.f32 %v1893_v48, %v6318_v44  ;;  %v1902_v0 = vadd.f32 %v1901_v3, %v6319_v30  ;;  %v1910_v31 = vadd.f32 %v1909_v58, %v6320_v49  ;;  %v1856_v12 = vadd.f32 %v1855_v53, %v1854_v27 }
 0x25c   :  { %v1864_v60 = vadd.f32 %v1863_v54, %v1862_v40  ;;  %v1872_v32 = vadd.f32 %v1871_v42, %v1870_v41  ;;  %v1880_v25 = vadd.f32 %v1879_v36, %v1878_v4  ;;  %v1887_v2 = vrot.slane %v1886_v55, 4 }
 0x25d   :  { %v1895_v56 = vrot.slane %v1894_v21, 4  ;;  %v1903_v39 = vrot.slane %v1902_v0, 4  ;;  %v1911_v28 = vrot.slane %v1910_v31, 4  ;;  %v1857_v51 = vrot.slane %v1856_v12, 2 }
 0x25e   :  { %v1865_v62 = vrot.slane %v1864_v60, 2  ;;  %v1873_v45 = vrot.slane %v1872_v32, 2  ;;  %v1881_v61 = vrot.slane %v1880_v25, 2  ;;  %v1888_v23 = vadd.f32 %v1887_v2, %v1886_v55  ;;  %v6325_v2 = vld [vmem:[#allocation278_spill] sm:$0xff] }
 0x25f   :  { %v1896_v59 = vadd.f32 %v1895_v56, %v1894_v21  ;;  %v1904_v13 = vadd.f32 %v1903_v39, %v1902_v0  ;;  %v1912_v48 = vadd.f32 %v1911_v28, %v1910_v31  ;;  %v1858_v44 = vadd.f32 %v1857_v51, %v1856_v12  ;;  %v6326_v39 = vld [vmem:[#allocation279_spill] sm:$0xff]  ;;  %v6327_v51 = vld [vmem:[#allocation280_spill] sm:$0xff] }
 0x260   :  { %v1866_v3 = vadd.f32 %v1865_v62, %v1864_v60  ;;  %v1874_v30 = vadd.f32 %v1873_v45, %v1872_v32  ;;  %v1882_v58 = vadd.f32 %v1881_v61, %v1880_v25  ;;  %v1889_v27 = vrot.slane %v1888_v23, 2  ;;  %v6328_v45 = vld [vmem:[#allocation281_spill] sm:$0xff] }
 0x261   :  { %v1897_v40 = vrot.slane %v1896_v59, 2  ;;  %v1905_v41 = vrot.slane %v1904_v13, 2  ;;  %v1913_v4 = vrot.slane %v1912_v48, 2  ;;  %v1859_v53 = vrot.slane %v1858_v44, 1 }
 0x262   :  { %v1867_v54 = vrot.slane %v1866_v3, 1  ;;  %v1875_v42 = vrot.slane %v1874_v30, 1  ;;  %v1883_v36 = vrot.slane %v1882_v58, 1  ;;  %v1890_v49 = vadd.f32 %v1889_v27, %v1888_v23  ;;  %v6335_v27 = vld [vmem:[#allocation150_spill] sm:$0xff] }
 0x263   :  { %v1898_v33 = vadd.f32 %v1897_v40, %v1896_v59  ;;  %v1906_v52 = vadd.f32 %v1905_v41, %v1904_v13  ;;  %v1914_v35 = vadd.f32 %v1913_v4, %v1912_v48  ;;  %v5082_v55 = vadd.f32 %v1859_v53, %v1858_v44  ;;  %v6333_v44 = vld [vmem:[#allocation148_spill] sm:$0xff]  ;;  %v6336_v41 = vld [vmem:[#allocation151_spill] sm:$0xff]  ;;  %v6337_v53 = vld [vmem:[#allocation282_spill] sm:$0xff] }
 0x264   :  { %v5084_v21 = vadd.f32 %v1867_v54, %v1866_v3  ;;  %v5086_v0 = vadd.f32 %v1875_v42, %v1874_v30  ;;  %v5088_v31 = vadd.f32 %v1883_v36, %v1882_v58  ;;  %v1891_v12 = vrot.slane %v1890_v49, 1  ;;  %v6334_v30 = vld [vmem:[#allocation149_spill] sm:$0xff]  ;;  %v6338_v42 = vld [vmem:[#allocation283_spill] sm:$0xff] }
 0x265   :  { %6321 = vst [vmem:[#allocation214_spill] sm:$0xff] %v5082_v55  ;;  %v1899_v60 = vrot.slane %v1898_v33, 1  ;;  %v1907_v32 = vrot.slane %v1906_v52, 1  ;;  %v1915_v25 = vrot.slane %v1914_v35, 1  ;;  %v1917_v56 = vsel %vm700_vm0, %v6325_v2, 0.0  ;;  %v6341_v2 = vld [vmem:[#allocation152_spill] sm:$0xff] }
 0x266   :  { %6322 = vst [vmem:[#allocation215_spill] sm:$0xff] %v5084_v21  ;;  %6323 = vst [vmem:[#allocation216_spill] sm:$0xff] %v5086_v0  ;;  %v1925_v28 = vsel %vm700_vm0, %v6326_v39, 0.0  ;;  %v1933_v62 = vsel %vm700_vm0, %v6327_v51, 0.0  ;;  %v1941_v61 = vsel %vm700_vm0, %v6328_v45, 0.0  ;;  %v5098_v23 = vadd.f32 %v1891_v12, %v1890_v49  ;;  %v6340_v49 = vld [vmem:[#allocation285_spill] sm:$0xff] }
 0x267   :  { %6324 = vst [vmem:[#allocation68_spill] sm:$0xff] %v5088_v31  ;;  %v5100_v59 = vadd.f32 %v1899_v60, %v1898_v33  ;;  %v5102_v13 = vadd.f32 %v1907_v32, %v1906_v52  ;;  %v5104_v48 = vadd.f32 %v1915_v25, %v1914_v35  ;;  %v1918_v3 = vadd.f32 %v1917_v56, %v6333_v44  ;;  %v6339_v33 = vld [vmem:[#allocation284_spill] sm:$0xff]  ;;  %v6342_v39 = vld [vmem:[#allocation153_spill] sm:$0xff]  ;;  %v6343_v51 = vld [vmem:[#allocation154_spill] sm:$0xff] }
 0x268   :  { %6329 = vst [vmem:[#allocation69_spill] sm:$0xff] %v5098_v23  ;;  %v1926_v58 = vadd.f32 %v1925_v28, %v6334_v30  ;;  %v1934_v40 = vadd.f32 %v1933_v62, %v6335_v27  ;;  %v1942_v4 = vadd.f32 %v1941_v61, %v6336_v41  ;;  %v1949_v54 = vsel %vm700_vm0, %v6337_v53, 0.0  ;;  %v6344_v45 = vld [vmem:[#allocation155_spill] sm:$0xff] }
 0x269   :  { %6330 = vst [vmem:[#allocation70_spill] sm:$0xff] %v5100_v59  ;;  %6331 = vst [vmem:[#allocation71_spill] sm:$0xff] %v5102_v13  ;;  %v1957_v36 = vsel %vm700_vm0, %v6338_v42, 0.0  ;;  %v1965_v52 = vsel %vm700_vm0, %v6339_v33, 0.0  ;;  %v1973_v35 = vsel %vm700_vm0, %v6340_v49, 0.0  ;;  %v1919_v12 = vrot.slane %v1918_v3, 4 }
 0x26a   :  { %6332 = vst [vmem:[#allocation217_spill] sm:$0xff] %v5104_v48  ;;  %v1927_v60 = vrot.slane %v1926_v58, 4  ;;  %v1935_v32 = vrot.slane %v1934_v40, 4  ;;  %v1943_v25 = vrot.slane %v1942_v4, 4  ;;  %v1950_v56 = vadd.f32 %v1949_v54, %v6341_v2 }
 0x26b   :  { %v1958_v28 = vadd.f32 %v1957_v36, %v6342_v39  ;;  %v1966_v62 = vadd.f32 %v1965_v52, %v6343_v51  ;;  %v1974_v61 = vadd.f32 %v1973_v35, %v6344_v45  ;;  %v1920_v44 = vadd.f32 %v1919_v12, %v1918_v3 }
 0x26c   :  { %v1928_v30 = vadd.f32 %v1927_v60, %v1926_v58  ;;  %v1936_v27 = vadd.f32 %v1935_v32, %v1934_v40  ;;  %v1944_v41 = vadd.f32 %v1943_v25, %v1942_v4  ;;  %v1951_v53 = vrot.slane %v1950_v56, 4 }
 0x26d   :  { %v1959_v42 = vrot.slane %v1958_v28, 4  ;;  %v1967_v33 = vrot.slane %v1966_v62, 4  ;;  %v1975_v49 = vrot.slane %v1974_v61, 4  ;;  %v1921_v13 = vrot.slane %v1920_v44, 2 }
 0x26e   :  { %v1929_v48 = vrot.slane %v1928_v30, 2  ;;  %v1937_v23 = vrot.slane %v1936_v27, 2  ;;  %v1945_v59 = vrot.slane %v1944_v41, 2  ;;  %v1952_v0 = vadd.f32 %v1951_v53, %v1950_v56 }
 0x26f   :  { %v1960_v54 = vadd.f32 %v1959_v42, %v1958_v28  ;;  %v1968_v2 = vadd.f32 %v1967_v33, %v1966_v62  ;;  %v1976_v36 = vadd.f32 %v1975_v49, %v1974_v61  ;;  %v1922_v39 = vadd.f32 %v1921_v13, %v1920_v44  ;;  %v6345_v44 = vld [vmem:[#allocation286_spill] sm:$0xff]  ;;  %v6346_v33 = vld [vmem:[#allocation156_spill] sm:$0xff] }
 0x270   :  { %v1930_v52 = vadd.f32 %v1929_v48, %v1928_v30  ;;  %v1938_v51 = vadd.f32 %v1937_v23, %v1936_v27  ;;  %v1946_v35 = vadd.f32 %v1945_v59, %v1944_v41  ;;  %v1953_v3 = vrot.slane %v1952_v0, 2 }
 0x271   :  { %v1961_v58 = vrot.slane %v1960_v54, 2  ;;  %v1969_v40 = vrot.slane %v1968_v2, 2  ;;  %v1977_v4 = vrot.slane %v1976_v36, 2  ;;  %v1923_v12 = vrot.slane %v1922_v39, 1 }
 0x272   :  { %v1931_v60 = vrot.slane %v1930_v52, 1  ;;  %v1939_v32 = vrot.slane %v1938_v51, 1  ;;  %v1947_v25 = vrot.slane %v1946_v35, 1  ;;  %v1954_v45 = vadd.f32 %v1953_v3, %v1952_v0 }
 0x273   :  { %v1962_v31 = vadd.f32 %v1961_v58, %v1960_v54  ;;  %v1970_v55 = vadd.f32 %v1969_v40, %v1968_v2  ;;  %v1978_v21 = vadd.f32 %v1977_v4, %v1976_v36  ;;  %v5122_v56 = vadd.f32 %v1923_v12, %v1922_v39  ;;  %v6347_v54 = vld [vmem:[#allocation157_spill] sm:$0xff]  ;;  %v6348_v36 = vld [vmem:[#allocation287_spill] sm:$0xff]  ;;  %v6350_v4 = vld [vmem:[#allocation10_spill] sm:$0xff] }
 0x274   :  { %v5124_v28 = vadd.f32 %v1931_v60, %v1930_v52  ;;  %v5126_v13 = vadd.f32 %v1939_v32, %v1938_v51  ;;  %v5128_v23 = vadd.f32 %v1947_v25, %v1946_v35  ;;  %v1955_v59 = vrot.slane %v1954_v45, 1  ;;  %v6351_v12 = vld [vmem:[#allocation9_spill] sm:$0xff]  ;;  %v6353_v32 = vld [vmem:[#allocation11_spill] sm:$0xff] }
 0x275   :  { %v1963_v48 = vrot.slane %v1962_v31, 1  ;;  %v1971_v62 = vrot.slane %v1970_v55, 1  ;;  %v1979_v61 = vrot.slane %v1978_v21, 1  ;;  %v1981_v30 = vsel %vm700_vm0, %v6345_v44, 0.0 }
 0x276   :  { %v2183_v0 = vcombine.low %v4362_v63, %v4364_v9  ;;  %v5134_v27 = vadd.f32 %v1955_v59, %v1954_v45  ;;  %v1982_v49 = vadd.f32 %v1981_v30, %v6346_v33  ;;  %v1990_v2 = vsel %vm1989_vm1, %v6347_v54, 0.0  ;;  %v6354_v59 = vld [vmem:[#allocation160_spill] sm:$0xff]  ;;  %v6360_v33 = vld [vmem:[#allocation162_spill] sm:$0xff] }
 0x277   :  { %v5136_v41 = vadd.f32 %v1963_v48, %v1962_v31  ;;  %v5138_v53 = vadd.f32 %v1971_v62, %v1970_v55  ;;  %v5140_v42 = vadd.f32 %v1979_v61, %v1978_v21  ;;  %v1992_v39 = vsel %vm1991_vm2, %v6348_v36, 0.0  ;;  %v6356_v48 = vld [vmem:[#allocation13_spill] sm:$0xff]  ;;  %v6357_v62 = vld [vmem:[#allocation12_spill] sm:$0xff]  ;;  %v6359_v61 = vld [vmem:[#allocation14_spill] sm:$0xff] }
 0x278   :  { %v2184_v52 = vcombine.low %v4366_v20, %v4368_v1  ;;  %v1993_v51 = vadd.f32 %v1992_v39, %v1990_v2  ;;  %v2185_v63 = vcombine.low %v4378_v43, %v4380_v37  ;;  %v2186_v9 = vcombine.low %v4382_v10, %v4384_v38  ;;  %v6349_v20 = vld [vmem:[#allocation8_spill] sm:$0xff]  ;;  %v6352_v38 = vld [vmem:[#allocation158_spill] sm:$0xff]  ;;  %v6363_v36 = vld [vmem:[#allocation163_spill] sm:$0xff] }
 0x279   :  { %v1983_v55 = vrot.slane %v1982_v49, 4  ;;  %v3311_v31 = vmov 1966171168   ;;  %v5661_v35 = vlaneseq  ;;  %v2232_v3 = vcombine.low %v4402_v6, %v4404_v16  ;;  %v6355_v6 = vld [vmem:[#allocation159_spill] sm:$0xff]  ;;  %v6362_v2 = vld [vmem:[#allocation164_spill] sm:$0xff] }
 0x27a   :  { %v2188_v21 = vunpack.c.l.s4 %v3311_v31  ;;  %v1994_v58 = vrot.slane %v1993_v51, 4  ;;  %v2233_v40 = vcombine.low %v4406_v29, %v4408_v17  ;;  %v2234_v1 = vcombine.low %v6349_v20, %v4420_v19  ;;  %v6358_v17 = vld [vmem:[#allocation15_spill] sm:$0xff]  ;;  %v6365_v31 = vld [vmem:[#allocation16_spill] sm:$0xff]  ;;  %v6367_v20 = vld [vmem:[#allocation18_spill] sm:$0xff] }
 0x27b   :  { %v2235_v43 = vcombine.low %v6351_v12, %v6350_v4  ;;  %v1984_v37 = vadd.f32 %v1983_v55, %v1982_v49  ;;  %v2191_v10 = vshrl.u32 %v5661_v35, 7  ;;  %v2281_v25 = vcombine.low %v6353_v32, %v6352_v38  ;;  %v6361_v49 = vld [vmem:[#allocation161_spill] sm:$0xff]  ;;  %v6368_v12 = vld [vmem:[#allocation166_spill] sm:$0xff] }
 0x27c   :  { %v2189_v60 = vunpack.c.0.s8 %v2188_v21  ;;  %v1995_v45 = vadd.f32 %v1994_v58, %v1993_v51  ;;  %v2282_v16 = vcombine.low %v6355_v6, %v6354_v59  ;;  %v2283_v29 = vcombine.low %v6357_v62, %v6356_v48  ;;  %v6364_v51 = vld [vmem:[#allocation17_spill] sm:$0xff]  ;;  %v6366_v58 = vld [vmem:[#allocation19_spill] sm:$0xff]  ;;  %v6400_v35 = vld [vmem:[#allocation182_spill] sm:$0xff] }
 0x27d   :  { %v2284_v19 = vcombine.low %v6359_v61, %v6358_v17  ;;  %v1985_v44 = vrot.slane %v1984_v37, 2  ;;  %v2330_v54 = vcombine.low %v6361_v49, %v6360_v33  ;;  %v2331_v39 = vcombine.low %v6363_v36, %v6362_v2  ;;  %v6369_v38 = vld [vmem:[#allocation165_spill] sm:$0xff] }
 0x27e   :  { %v5168_v30 = vsub.s32 %v2189_v60, %v2191_v10  ;;  %v1996_v55 = vrot.slane %v1995_v45, 2  ;;  %v2332_v21 = vcombine.low %v6365_v31, %v6364_v51  ;;  %v2333_v4 = vcombine.low %v6367_v20, %v6366_v58 }
 0x27f   :  { %v2379_v32 = vcombine.low %v6369_v38, %v6368_v12  ;;  %v1986_v59 = vadd.f32 %v1985_v44, %v1984_v37 }
 0x280   :  { %v2193_v60 = vrot.slane %v2183_v0, %v5168_v30  ;;  %v2200_v10 = vrot.slane %v2184_v52, %v5168_v30  ;;  %v2207_v6 = vrot.slane %v2185_v63, %v5168_v30  ;;  %v1997_v48 = vadd.f32 %v1996_v55, %v1995_v45 }
 0x281   :  { %v2214_v62 = vrot.slane %v2186_v9, %v5168_v30  ;;  %v2242_v17 = vrot.slane %v2232_v3, %v5168_v30  ;;  %v2249_v61 = vrot.slane %v2233_v40, %v5168_v30  ;;  %v1987_v33 = vrot.slane %v1986_v59, 1 }
 0x282   :  { %v2215_v49 = vcombine.low %v2193_v60, %v2200_v10  ;;  %v2256_v2 = vrot.slane %v2234_v1, %v5168_v30  ;;  %v2263_v36 = vrot.slane %v2235_v43, %v5168_v30  ;;  %v1998_v37 = vrot.slane %v1997_v48, 1  ;;  %v6371_v10 = vld [vmem:[#allocation167_spill] sm:$0xff] }
 0x283   :  { %v2216_v44 = vcombine.low %v2207_v6, %v2214_v62  ;;  %v2264_v0 = vcombine.low %v2242_v17, %v2249_v61  ;;  %v2291_v52 = vrot.slane %v2281_v25, %v5168_v30  ;;  %v5189_v51 = vadd.f32 %v1987_v33, %v1986_v59  ;;  %v6372_v62 = vld [vmem:[#allocation21_spill] sm:$0xff]  ;;  %v6373_v17 = vld [vmem:[#allocation20_spill] sm:$0xff]  ;;  %v6375_v33 = vld [vmem:[#allocation22_spill] sm:$0xff] }
 0x284   :  { %v5192_v63 = vrot.slane %v2215_v49, %v5168_v30  ;;  %v2265_v9 = vcombine.low %v2256_v2, %v2263_v36  ;;  %v2298_v3 = vrot.slane %v2282_v16, %v5168_v30  ;;  %v5195_v40 = vadd.f32 %v1998_v37, %v1997_v48  ;;  %v6376_v36 = vld [vmem:[#allocation170_spill] sm:$0xff]  ;;  %v6377_v37 = vld [vmem:[#allocation169_spill] sm:$0xff] }
 0x285   :  { %v5198_v45 = vrot.slane %v2216_v44, %v5168_v30  ;;  %v5201_v1 = vrot.slane %v2264_v0, %v5168_v30  ;;  %v2305_v43 = vrot.slane %v2283_v29, %v5168_v30  ;;  %v2312_v55 = vrot.slane %v2284_v19, %v5168_v30  ;;  %v6370_v19 = vld [vmem:[#allocation168_spill] sm:$0xff]  ;;  %v6418_v29 = vld [vmem:[#allocation190_spill] sm:$0xff] }
 0x286   :  { %v5205_v25 = vrot.slane %v2265_v9, %v5168_v30  ;;  %v2313_v31 = vcombine.low %v2291_v52, %v2298_v3  ;;  %v2340_v58 = vrot.slane %v2330_v54, %v5168_v30  ;;  %v2347_v20 = vrot.slane %v2331_v39, %v5168_v30  ;;  %v6374_v39 = vld [vmem:[#allocation23_spill] sm:$0xff] }
 0x287   :  { %v2354_v12 = vrot.slane %v2332_v21, %v5168_v30  ;;  %v2361_v38 = vrot.slane %v2333_v4, %v5168_v30  ;;  %v2314_v59 = vcombine.low %v2305_v43, %v2312_v55  ;;  %v2380_v6 = vcombine.low %v6371_v10, %v6370_v19  ;;  %v6382_v10 = vld [vmem:[#allocation27_spill] sm:$0xff] }
 0x288   :  { %v5217_v60 = vrot.slane %v2313_v31, %v5168_v30  ;;  %v2362_v54 = vcombine.low %v2340_v58, %v2347_v20  ;;  %v2381_v61 = vcombine.low %v6373_v17, %v6372_v62  ;;  %v2382_v21 = vcombine.low %v6375_v33, %v6374_v39  ;;  %v6379_v31 = vld [vmem:[#allocation171_spill] sm:$0xff]  ;;  %v6380_v20 = vld [vmem:[#allocation25_spill] sm:$0xff]  ;;  %v6384_v39 = vld [vmem:[#allocation174_spill] sm:$0xff] }
 0x289   :  { %v2363_v48 = vcombine.low %v2354_v12, %v2361_v38  ;;  %v5226_v4 = vrot.slane %v2314_v59, %v5168_v30  ;;  %v2389_v49 = vrot.slane %v2379_v32, %v5168_v30  ;;  %v2396_v2 = vrot.slane %v2380_v6, %v5168_v30  ;;  %v6378_v32 = vld [vmem:[#allocation172_spill] sm:$0xff]  ;;  %v6383_v6 = vld [vmem:[#allocation26_spill] sm:$0xff]  ;;  %v6385_v33 = vld [vmem:[#allocation173_spill] sm:$0xff] }
 0x28a   :  { %v2428_v44 = vcombine.low %v6377_v37, %v6376_v36  ;;  %v5233_v0 = vrot.slane %v2362_v54, %v5168_v30  ;;  %v2403_v9 = vrot.slane %v2381_v61, %v5168_v30  ;;  %v2410_v3 = vrot.slane %v2382_v21, %v5168_v30  ;;  %v6381_v12 = vld [vmem:[#allocation24_spill] sm:$0xff]  ;;  %v6387_v37 = vld [vmem:[#allocation175_spill] sm:$0xff]  ;;  %v6408_v59 = vld [vmem:[#allocation186_spill] sm:$0xff] }
 0x28b   :  { %v5236_v52 = vrot.slane %v2363_v48, %v5168_v30  ;;  %v2411_v55 = vcombine.low %v2389_v49, %v2396_v2  ;;  %v2429_v58 = vcombine.low %v6379_v31, %v6378_v32  ;;  %v2430_v38 = vcombine.low %v6381_v12, %v6380_v20  ;;  %v6386_v36 = vld [vmem:[#allocation176_spill] sm:$0xff]  ;;  %v6390_v31 = vld [vmem:[#allocation31_spill] sm:$0xff]  ;;  %v6391_v20 = vld [vmem:[#allocation30_spill] sm:$0xff] }
 0x28c   :  { %v2412_v19 = vcombine.low %v2403_v9, %v2410_v3  ;;  %v2431_v54 = vcombine.low %v6383_v6, %v6382_v10  ;;  %v2438_v48 = vrot.slane %v2428_v44, %v5168_v30  ;;  %v2477_v21 = vcombine.low %v6385_v33, %v6384_v39  ;;  %v6388_v3 = vld [vmem:[#allocation29_spill] sm:$0xff]  ;;  %v6389_v44 = vld [vmem:[#allocation28_spill] sm:$0xff] }
 0x28d   :  { %v5252_v62 = vrot.slane %v2411_v55, %v5168_v30  ;;  %v2445_v17 = vrot.slane %v2429_v58, %v5168_v30  ;;  %v2452_v61 = vrot.slane %v2430_v38, %v5168_v30  ;;  %v2478_v9 = vcombine.low %v6387_v37, %v6386_v36  ;;  %v6392_v38 = vld [vmem:[#allocation178_spill] sm:$0xff]  ;;  %v6393_v10 = vld [vmem:[#allocation177_spill] sm:$0xff]  ;;  %v6395_v37 = vld [vmem:[#allocation179_spill] sm:$0xff] }
 0x28e   :  { %v5259_v49 = vrot.slane %v2412_v19, %v5168_v30  ;;  %v2459_v2 = vrot.slane %v2431_v54, %v5168_v30  ;;  %v2479_v32 = vcombine.low %v6389_v44, %v6388_v3  ;;  %v2480_v58 = vcombine.low %v6391_v20, %v6390_v31  ;;  %v6397_v44 = vld [vmem:[#allocation32_spill] sm:$0xff]  ;;  %v6401_v19 = vld [vmem:[#allocation181_spill] sm:$0xff] }
 0x28f   :  { %v2460_v55 = vcombine.low %v2438_v48, %v2445_v17  ;;  %v2487_v12 = vrot.slane %v2477_v21, %v5168_v30  ;;  %v2526_v6 = vcombine.low %v6393_v10, %v6392_v38  ;;  %v2494_v54 = vrot.slane %v2478_v9, %v5168_v30  ;;  %v6394_v17 = vld [vmem:[#allocation180_spill] sm:$0xff]  ;;  %v6396_v21 = vld [vmem:[#allocation33_spill] sm:$0xff] }
 0x290   :  { %v2461_v39 = vcombine.low %v2452_v61, %v2459_v2  ;;  %v2501_v33 = vrot.slane %v2479_v32, %v5168_v30  ;;  %v2508_v48 = vrot.slane %v2480_v58, %v5168_v30  ;;  %v2527_v3 = vcombine.low %v6395_v37, %v6394_v17  ;;  %v6398_v61 = vld [vmem:[#allocation35_spill] sm:$0xff]  ;;  %v6399_v2 = vld [vmem:[#allocation34_spill] sm:$0xff] }
 0x291   :  { %v5276_v36 = vrot.slane %v2460_v55, %v5168_v30  ;;  %v2528_v31 = vcombine.low %v6397_v44, %v6396_v21  ;;  %v2509_v38 = vcombine.low %v2487_v12, %v2494_v54  ;;  %v2529_v9 = vcombine.low %v6399_v2, %v6398_v61  ;;  %v6402_v54 = vld [vmem:[#allocation184_spill] sm:$0xff]  ;;  %v6403_v21 = vld [vmem:[#allocation183_spill] sm:$0xff] }
 0x292   :  { %v5284_v20 = vrot.slane %v2461_v39, %v5168_v30  ;;  %v2536_v32 = vrot.slane %v2526_v6, %v5168_v30  ;;  %v2510_v10 = vcombine.low %v2501_v33, %v2508_v48  ;;  %v2543_v55 = vrot.slane %v2527_v3, %v5168_v30  ;;  %v6404_v48 = vld [vmem:[#allocation37_spill] sm:$0xff]  ;;  %v6405_v3 = vld [vmem:[#allocation36_spill] sm:$0xff]  ;;  %v6406_v61 = vld [vmem:[#allocation39_spill] sm:$0xff] }
 0x293   :  { %v2550_v58 = vrot.slane %v2528_v31, %v5168_v30  ;;  %v2575_v17 = vcombine.low %v6401_v19, %v6400_v35  ;;  %v5296_v39 = vrot.slane %v2509_v38, %v5168_v30  ;;  %v2557_v12 = vrot.slane %v2529_v9, %v5168_v30  ;;  %v6407_v35 = vld [vmem:[#allocation38_spill] sm:$0xff]  ;;  %v6409_v9 = vld [vmem:[#allocation185_spill] sm:$0xff] }
 0x294   :  { %v2576_v44 = vcombine.low %v6403_v21, %v6402_v54  ;;  %v5302_v6 = vrot.slane %v2510_v10, %v5168_v30  ;;  %v2558_v33 = vcombine.low %v2536_v32, %v2543_v55  ;;  %v2577_v31 = vcombine.low %v6405_v3, %v6404_v48  ;;  %v6414_v48 = vld [vmem:[#allocation41_spill] sm:$0xff]  ;;  %v6415_v3 = vld [vmem:[#allocation40_spill] sm:$0xff] }
 0x295   :  { %v2578_v19 = vcombine.low %v6407_v35, %v6406_v61  ;;  %v2559_v2 = vcombine.low %v2550_v58, %v2557_v12  ;;  %v2585_v37 = vrot.slane %v2575_v17, %v5168_v30  ;;  %v2624_v43 = vcombine.low %v6409_v9, %v6408_v59  ;;  %v6412_v17 = vld [vmem:[#allocation188_spill] sm:$0xff]  ;;  %v6413_v12 = vld [vmem:[#allocation187_spill] sm:$0xff]  ;;  %v6417_v9 = vld [vmem:[#allocation42_spill] sm:$0xff] }
 0x296   :  { %v2592_v38 = vrot.slane %v2576_v44, %v5168_v30  ;;  %v5315_v10 = vrot.slane %v2558_v33, %v5168_v30  ;;  %v2599_v32 = vrot.slane %v2577_v31, %v5168_v30  ;;  %v2625_v44 = vcombine.low %v6413_v12, %v6412_v17  ;;  %v6416_v35 = vld [vmem:[#allocation43_spill] sm:$0xff]  ;;  %v6419_v31 = vld [vmem:[#allocation189_spill] sm:$0xff]  ;;  %v6421_v17 = vld [vmem:[#allocation192_spill] sm:$0xff] }
 0x297   :  { %v2606_v55 = vrot.slane %v2578_v19, %v5168_v30  ;;  %v5320_v21 = vrot.slane %v2559_v2, %v5168_v30  ;;  %v2626_v59 = vcombine.low %v6415_v3, %v6414_v48  ;;  %v2627_v54 = vcombine.low %v6417_v9, %v6416_v35  ;;  %v6423_v48 = vld [vmem:[#allocation45_spill] sm:$0xff]  ;;  %v6425_v9 = vld [vmem:[#allocation47_spill] sm:$0xff] }
 0x298   :  { %6410 = vst [vmem:[#allocation218_spill] sm:$0xff] %v5315_v10  ;;  %v2607_v58 = vcombine.low %v2585_v37, %v2592_v38  ;;  %v2634_v33 = vrot.slane %v2624_v43, %v5168_v30  ;;  %v2673_v16 = vcombine.low %v6419_v31, %v6418_v29  ;;  %v2641_v2 = vrot.slane %v2625_v44, %v5168_v30  ;;  %v6422_v43 = vld [vmem:[#allocation191_spill] sm:$0xff]  ;;  %v6424_v29 = vld [vmem:[#allocation44_spill] sm:$0xff]  ;;  %v6426_v31 = vld [vmem:[#allocation46_spill] sm:$0xff] }
 0x299   :  { %6411 = vst [vmem:[#allocation219_spill] sm:$0xff] %v5320_v21  ;;  %v2608_v61 = vcombine.low %v2599_v32, %v2606_v55  ;;  %v2648_v38 = vrot.slane %v2626_v59, %v5168_v30  ;;  %v2655_v55 = vrot.slane %v2627_v54, %v5168_v30  ;;  %v2674_v12 = vcombine.low %v6422_v43, %v6421_v17  ;;  %v6427_v44 = vld [vmem:[#allocation194_spill] sm:$0xff]  ;;  %v6428_v21 = vld [vmem:[#allocation193_spill] sm:$0xff] }
 0x29a   :  { %v5334_v37 = vrot.slane %v2607_v58, %v5168_v30  ;;  %v2675_v3 = vcombine.low %v6424_v29, %v6423_v48  ;;  %v2656_v35 = vcombine.low %v2634_v33, %v2641_v2  ;;  %v2676_v58 = vcombine.low %v6426_v31, %v6425_v9  ;;  %v6429_v2 = vld [vmem:[#allocation196_spill] sm:$0xff]  ;;  %v6430_v48 = vld [vmem:[#allocation195_spill] sm:$0xff] }
 0x29b   :  { %v5339_v32 = vrot.slane %v2608_v61, %v5168_v30  ;;  %v2683_v19 = vrot.slane %v2673_v16, %v5168_v30  ;;  %v2722_v59 = vcombine.low %v6428_v21, %v6427_v44  ;;  %v2657_v10 = vcombine.low %v2648_v38, %v2655_v55  ;;  %v6431_v16 = vld [vmem:[#allocation49_spill] sm:$0xff]  ;;  %v6432_v9 = vld [vmem:[#allocation48_spill] sm:$0xff]  ;;  %v6433_v38 = vld [vmem:[#allocation51_spill] sm:$0xff] }
 0x29c   :  { %v2690_v54 = vrot.slane %v2674_v12, %v5168_v30  ;;  %v2697_v17 = vrot.slane %v2675_v3, %v5168_v30  ;;  %v5356_v43 = vrot.slane %v2656_v35, %v5168_v30  ;;  %v2704_v33 = vrot.slane %v2676_v58, %v5168_v30  ;;  %v6434_v55 = vld [vmem:[#allocation50_spill] sm:$0xff] }
 0x29d   :  { %6420 = vst [vmem:[#allocation220_spill] sm:$0xff] %v5339_v32  ;;  %v2723_v29 = vcombine.low %v6430_v48, %v6429_v2  ;;  %v2724_v31 = vcombine.low %v6432_v9, %v6431_v16  ;;  %v5364_v21 = vrot.slane %v2657_v10, %v5168_v30  ;;  %v2725_v12 = vcombine.low %v6434_v55, %v6433_v38  ;;  %v6435_v32 = vld [vmem:[#allocation197_spill] sm:$0xff]  ;;  %v6437_v16 = vld [vmem:[#allocation198_spill] sm:$0xff] }
 0x29e   :  { %v2705_v44 = vcombine.low %v2683_v19, %v2690_v54  ;;  %v2732_v3 = vrot.slane %v2722_v59, %v5168_v30  ;;  %v2706_v61 = vcombine.low %v2697_v17, %v2704_v33  ;;  %v2771_v2 = vcombine.low %v6435_v32, %v4844_v15  ;;  %v6436_v54 = vld [vmem:[#allocation199_spill] sm:$0xff]  ;;  %v6438_v33 = vld [vmem:[#allocation52_spill] sm:$0xff]  ;;  %v6440_v38 = vld [vmem:[#allocation54_spill] sm:$0xff] }
 0x29f   :  { %v2739_v35 = vrot.slane %v2723_v29, %v5168_v30  ;;  %v2746_v58 = vrot.slane %v2724_v31, %v5168_v30  ;;  %v2753_v19 = vrot.slane %v2725_v12, %v5168_v30  ;;  %v2772_v9 = vcombine.low %v6437_v16, %v6436_v54  ;;  %v6439_v29 = vld [vmem:[#allocation200_spill] sm:$0xff]  ;;  %v6441_v15 = vld [vmem:[#allocation53_spill] sm:$0xff] }
 0x2a0   :  { %v5376_v10 = vrot.slane %v2705_v44, %v5168_v30  ;;  %v5382_v59 = vrot.slane %v2706_v61, %v5168_v30  ;;  %v2773_v31 = vcombine.low %v6439_v29, %v6438_v33  ;;  %v2774_v32 = vcombine.low %v6441_v15, %v6440_v38  ;;  %v6444_v33 = vld [vmem:[#allocation203_spill] sm:$0xff]  ;;  %v6445_v29 = vld [vmem:[#allocation202_spill] sm:$0xff]  ;;  %v6446_v38 = vld [vmem:[#allocation56_spill] sm:$0xff] }
 0x2a1   :  { %v2754_v17 = vcombine.low %v2732_v3, %v2739_v35  ;;  %v2755_v55 = vcombine.low %v2746_v58, %v2753_v19  ;;  %v2781_v48 = vrot.slane %v2771_v2, %v5168_v30  ;;  %v2788_v44 = vrot.slane %v2772_v9, %v5168_v30  ;;  %v6442_v2 = vld [vmem:[#allocation201_spill] sm:$0xff]  ;;  %v6443_v19 = vld [vmem:[#allocation55_spill] sm:$0xff]  ;;  %v6447_v15 = vld [vmem:[#allocation204_spill] sm:$0xff] }
 0x2a2   :  { %v2820_v12 = vcombine.low %v4882_v18, %v4884_v47  ;;  %v2795_v3 = vrot.slane %v2773_v31, %v5168_v30  ;;  %v2802_v35 = vrot.slane %v2774_v32, %v5168_v30  ;;  %v2821_v9 = vcombine.low %v6443_v19, %v6442_v2  ;;  %v6448_v2 = vld [vmem:[#allocation58_spill] sm:$0xff] }
 0x2a3   :  { %v5395_v61 = vrot.slane %v2754_v17, %v5168_v30  ;;  %v5400_v16 = vrot.slane %v2755_v55, %v5168_v30  ;;  %v2803_v58 = vcombine.low %v2781_v48, %v2788_v44  ;;  %v2822_v18 = vcombine.low %v6445_v29, %v6444_v33  ;;  %v6450_v33 = vld [vmem:[#allocation205_spill] sm:$0xff] }
 0x2a4   :  { %v2804_v47 = vcombine.low %v2795_v3, %v2802_v35  ;;  %v2823_v54 = vcombine.low %v6447_v15, %v6446_v38  ;;  %v2830_v17 = vrot.slane %v2820_v12, %v5168_v30  ;;  %v2869_v31 = vcombine.low %v4922_v14, %v4924_v22  ;;  %v6449_v12 = vld [vmem:[#allocation57_spill] sm:$0xff]  ;;  %v6451_v14 = vld [vmem:[#allocation59_spill] sm:$0xff]  ;;  %v6453_v15 = vld [vmem:[#allocation206_spill] sm:$0xff] }
 0x2a5   :  { %v5414_v48 = vrot.slane %v2803_v58, %v5168_v30  ;;  %v2837_v55 = vrot.slane %v2821_v9, %v5168_v30  ;;  %v2844_v44 = vrot.slane %v2822_v18, %v5168_v30  ;;  %v2870_v19 = vcombine.low %v6449_v12, %v6448_v2  ;;  %v6452_v38 = vld [vmem:[#allocation207_spill] sm:$0xff] }
 0x2a6   :  { %v5419_v3 = vrot.slane %v2804_v47, %v5168_v30  ;;  %v2851_v35 = vrot.slane %v2823_v54, %v5168_v30  ;;  %v2871_v22 = vcombine.low %v6451_v14, %v6450_v33  ;;  %v2872_v58 = vcombine.low %v6453_v15, %v6452_v38  ;;  %v6455_v33 = vld [vmem:[#allocation208_spill] sm:$0xff]  ;;  %v6457_v38 = vld [vmem:[#allocation61_spill] sm:$0xff] }
 0x2a7   :  { %v2852_v29 = vcombine.low %v2830_v17, %v2837_v55  ;;  %v2879_v32 = vrot.slane %v2869_v31, %v5168_v30  ;;  %v2918_v9 = vcombine.low %v4962_v26, %v4964_v24  ;;  %v2886_v54 = vrot.slane %v2870_v19, %v5168_v30  ;;  %v6454_v55 = vld [vmem:[#allocation60_spill] sm:$0xff]  ;;  %v6456_v31 = vld [vmem:[#allocation62_spill] sm:$0xff] }
 0x2a8   :  { %v2853_v47 = vcombine.low %v2844_v44, %v2851_v35  ;;  %v2893_v2 = vrot.slane %v2871_v22, %v5168_v30  ;;  %v2900_v17 = vrot.slane %v2872_v58, %v5168_v30  ;;  %v2919_v14 = vcombine.low %v6455_v33, %v6454_v55  ;;  %v6458_v44 = vld [vmem:[#allocation209_spill] sm:$0xff]  ;;  %v6459_v35 = vld [vmem:[#allocation63_spill] sm:$0xff] }
 0x2a9   :  { %v5436_v12 = vrot.slane %v2852_v29, %v5168_v30  ;;  %v2920_v15 = vcombine.low %v6457_v38, %v6456_v31  ;;  %v2901_v24 = vcombine.low %v2879_v32, %v2886_v54  ;;  %v2921_v19 = vcombine.low %v6459_v35, %v6458_v44  ;;  %v6460_v54 = vld [vmem:[#allocation210_spill] sm:$0xff] }
 0x2aa   :  { %v5444_v26 = vrot.slane %v2853_v47, %v5168_v30  ;;  %v2928_v22 = vrot.slane %v2918_v9, %v5168_v30  ;;  %v2902_v18 = vcombine.low %v2893_v2, %v2900_v17  ;;  %v2935_v29 = vrot.slane %v2919_v14, %v5168_v30  ;;  %v6461_v17 = vld [vmem:[#allocation212_spill] sm:$0xff]  ;;  %v6462_v14 = vld [vmem:[#allocation211_spill] sm:$0xff] }
 0x2ab   :  { %v2942_v58 = vrot.slane %v2920_v15, %v5168_v30  ;;  %v2967_v55 = vcombine.low %v5002_v5, %v5004_v46  ;;  %v5456_v47 = vrot.slane %v2901_v24, %v5168_v30  ;;  %v2949_v32 = vrot.slane %v2921_v19, %v5168_v30  ;;  %v6463_v15 = vld [vmem:[#allocation65_spill] sm:$0xff]  ;;  %v6464_v5 = vld [vmem:[#allocation64_spill] sm:$0xff] }
 0x2ac   :  { %v2868_v33 = vcombine.low %v5436_v12, %v5444_v26  ;;  %v2968_v31 = vcombine.low %v6460_v54, %v5008_v11  ;;  %v5462_v9 = vrot.slane %v2902_v18, %v5168_v30  ;;  %v2950_v2 = vcombine.low %v2928_v22, %v2935_v29 }
 0x2ad   :  { %v2969_v38 = vcombine.low %v6462_v14, %v6461_v17  ;;  %v2970_v46 = vcombine.low %v6464_v5, %v6463_v15  ;;  %v2951_v44 = vcombine.low %v2942_v58, %v2949_v32  ;;  %v2977_v35 = vrot.slane %v2967_v55, %v5168_v30  ;;  %v6465_v32 = vld [vmem:[#allocation66_spill] sm:$0xff]  ;;  %v6467_v17 = vld [vmem:[#allocation67_spill] sm:$0xff] }
 0x2ae   :  { %v2984_v24 = vrot.slane %v2968_v31, %v5168_v30  ;;  %v3016_v19 = vcombine.low %v5042_v8, %v5044_v50  ;;  %v2917_v11 = vcombine.low %v5456_v47, %v5462_v9  ;;  %v5475_v18 = vrot.slane %v2950_v2, %v5168_v30  ;;  %v6466_v31 = vld [vmem:[#allocation213_spill] sm:$0xff]  ;;  %v6468_v15 = vld [vmem:[#allocation215_spill] sm:$0xff] }
 0x2af   :  { %v2991_v22 = vrot.slane %v2969_v38, %v5168_v30  ;;  %v2998_v29 = vrot.slane %v2970_v46, %v5168_v30  ;;  %v5480_v54 = vrot.slane %v2951_v44, %v5168_v30  ;;  %v3017_v55 = vcombine.low %v5046_v7, %v5048_v57  ;;  %v6469_v38 = vld [vmem:[#allocation214_spill] sm:$0xff] }
 0x2b0   :  { %v2999_v58 = vcombine.low %v2977_v35, %v2984_v24  ;;  %v3018_v8 = vcombine.low %v6465_v32, %v5060_v34  ;;  %v3019_v14 = vcombine.low %v6467_v17, %v6466_v31  ;;  %v3026_v2 = vrot.slane %v3016_v19, %v5168_v30  ;;  %v6470_v24 = vld [vmem:[#allocation68_spill] sm:$0xff]  ;;  %v6473_v32 = vld [vmem:[#allocation69_spill] sm:$0xff] }
 0x2b1   :  { %v3000_v50 = vcombine.low %v2991_v22, %v2998_v29  ;;  %v3065_v5 = vcombine.low %v6469_v38, %v6468_v15  ;;  %v3033_v7 = vrot.slane %v3017_v55, %v5168_v30  ;;  %v6471_v19 = vld [vmem:[#allocation216_spill] sm:$0xff]  ;;  %v6472_v29 = vld [vmem:[#allocation70_spill] sm:$0xff]  ;;  %v6474_v15 = vld [vmem:[#allocation217_spill] sm:$0xff]  ;;  %v3114_v55 = vcombine.low %v5122_v56, %v5124_v28 }
 0x2b2   :  { %v5494_v44 = vrot.slane %v2999_v58, %v5168_v30  ;;  %v3040_v57 = vrot.slane %v3018_v8, %v5168_v30  ;;  %v3047_v35 = vrot.slane %v3019_v14, %v5168_v30  ;;  %v3066_v22 = vcombine.low %v6471_v19, %v6470_v24  ;;  %v6475_v38 = vld [vmem:[#allocation71_spill] sm:$0xff]  ;;  %v2001_v28 = vld [vmem:[#allocation4 + $0x8] sm:$0xff] }
 0x2b3   :  { %v5499_v34 = vrot.slane %v3000_v50, %v5168_v30  ;;  %v3067_v31 = vcombine.low %v6473_v32, %v6472_v29  ;;  %v3048_v17 = vcombine.low %v3026_v2, %v3033_v7  ;;  %v3068_v58 = vcombine.low %v6475_v38, %v6474_v15  ;;  %v2000_v19 = vld [vmem:[#allocation4] sm:$0xff]  ;;  %v2002_v32 = vld [vmem:[#allocation4 + $0x10] sm:$0xff]  ;;  %v2013_v8 = vld [vmem:[#allocation4 + $0x68] sm:$0xff] }
 0x2b4   :  { %v3075_v46 = vrot.slane %v3065_v5, %v5168_v30  ;;  %v3049_v50 = vcombine.low %v3040_v57, %v3047_v35  ;;  %v3082_v14 = vrot.slane %v3066_v22, %v5168_v30  ;;  %v3115_v5 = vcombine.low %v5126_v13, %v5128_v23 }
 0x2b5   :  { %v3089_v24 = vrot.slane %v3067_v31, %v5168_v30  ;;  %v5516_v29 = vrot.slane %v3048_v17, %v5168_v30  ;;  %v3096_v2 = vrot.slane %v3068_v58, %v5168_v30  ;;  %v3116_v56 = vcombine.low %v5134_v27, %v5136_v41  ;;  %v2003_v31 = vld [vmem:[#allocation4 + $0x18] sm:$0xff]  ;;  %v2004_v17 = vld [vmem:[#allocation4 + $0x20] sm:$0xff]  ;;  %v2005_v27 = vld [vmem:[#allocation4 + $0x28] sm:$0xff] }
 0x2b6   :  { %v5524_v7 = vrot.slane %v3049_v50, %v5168_v30  ;;  %v3097_v57 = vcombine.low %v3075_v46, %v3082_v14  ;;  %v3117_v35 = vcombine.low %v5138_v53, %v5140_v42  ;;  %v3124_v22 = vrot.slane %v3114_v55, %v5168_v30  ;;  %v2006_v41 = vld [vmem:[#allocation4 + $0x30] sm:$0xff]  ;;  %v2007_v58 = vld [vmem:[#allocation4 + $0x38] sm:$0xff]  ;;  %v2008_v14 = vld [vmem:[#allocation4 + $0x40] sm:$0xff] }
 0x2b7   :  { %v3098_v15 = vcombine.low %v3089_v24, %v3096_v2  ;;  %v3131_v38 = vrot.slane %v3115_v5, %v5168_v30  ;;  %v3138_v13 = vrot.slane %v3116_v56, %v5168_v30  ;;  %v3163_v23 = vcombine.low %v5189_v51, %v5195_v40  ;;  %v2009_v24 = vld [vmem:[#allocation4 + $0x48] sm:$0xff]  ;;  %v2010_v2 = vld [vmem:[#allocation4 + $0x50] sm:$0xff] }
 0x2b8   :  { %v3064_v46 = vcombine.low %v5516_v29, %v5524_v7  ;;  %v3105_v53 = vrot.slane %v3097_v57, %v5168_v30  ;;  %v3145_v42 = vrot.slane %v3117_v35, %v5168_v30  ;;  %v6476_v55 = vcombine.low %v5192_v63, %v5198_v45  ;;  %v2011_v7 = vld [vmem:[#allocation4 + $0x58] sm:$0xff]  ;;  %v2012_v57 = vld [vmem:[#allocation4 + $0x60] sm:$0xff] }
 0x2b9   :  { %v3112_v5 = vrot.slane %v3098_v15, %v5168_v30  ;;  %v3146_v51 = vcombine.low %v3124_v22, %v3131_v38  ;;  %v3170_v40 = vrot.slane %v3163_v23, %v5168_v30  ;;  %v6477_v56 = vcombine.low %v5201_v1, %v5205_v25  ;;  %v2014_v1 = vld [vmem:[#allocation4 + $0x70] sm:$0xff]  ;;  %v2015_v25 = vld [vmem:[#allocation4 + $0x78] sm:$0xff] }
 0x2ba   :  { %v3199_v50 = vadd.f32 %v6476_v55, %v2000_v19  ;;  %v3147_v35 = vcombine.low %v3138_v13, %v3145_v42  ;;  %v6478_v63 = vcombine.low %v5217_v60, %v5226_v4  ;;  %v6479_v19 = vcombine.low %v5233_v0, %v5236_v52  ;;  %v2017_v52 = vld [vmem:[#allocation4 + $0x88] sm:$0xff]  ;;  %v6483_v23 = vld [vmem:[#allocation218_spill] sm:$0xff] }
 0x2bb   :  { %v3200_v29 = vadd.f32 %v6477_v56, %v2001_v28  ;;  %v6480_v22 = vcombine.low %v5252_v62, %v5259_v49  ;;  %v2016_v28 = vld [vmem:[#allocation4 + $0x80] sm:$0xff]  ;;  %v3113_v38 = vcombine.low %v3105_v53, %v3112_v5  ;;  %v3154_v13 = vrot.slane %v3146_v51, %v5168_v30  ;;  %v2018_v62 = vld [vmem:[#allocation4 + $0x90] sm:$0xff] }
 0x2bc   :  { %v3201_v45 = vadd.f32 %v6478_v63, %v2002_v32  ;;  %v3202_v55 = vadd.f32 %v6479_v19, %v2003_v31  ;;  %3220 = vst [vmem:[%s5660_s3] sm:$0xff] %v3199_v50  ;;  %v3177_v60 = vrot.slane %v3170_v40, %v5168_v30  ;;  %v6481_v4 = vcombine.low %v5276_v36, %v5284_v20  ;;  %v2020_v49 = vld [vmem:[#allocation4 + $0xa0] sm:$0x3]  ;;  %v6486_v36 = vld [vmem:[#allocation220_spill] sm:$0xff] }
 0x2bd   :  { %v3203_v15 = vadd.f32 %v6480_v22, %v2004_v17  ;;  %3221 = vst [vmem:[%s5660_s3 + $0x8] sm:$0xff] %v3200_v29  ;;  %v3161_v32 = vrot.slane %v3147_v35, %v5168_v30  ;;  %v6482_v31 = vcombine.low %v5296_v39, %v5302_v6  ;;  %v6484_v53 = vld [vmem:[#allocation219_spill] sm:$0xff]  ;;  %v6487_v20 = vcombine.low %v5334_v37, %v6486_v36 }
 0x2be   :  { %v3204_v0 = vadd.f32 %v6481_v4, %v2005_v27  ;;  %v6485_v42 = vcombine.low %v6483_v23, %v6484_v53  ;;  %3222 = vst [vmem:[%s5660_s3 + $0x10] sm:$0xff] %v3201_v45  ;;  %3223 = vst [vmem:[%s5660_s3 + $0x18] sm:$0xff] %v3202_v55  ;;  %v2019_v30 = vld [vmem:[#allocation4 + $0x98] sm:$0xff]  ;;  %v6488_v39 = vcombine.low %v5356_v43, %v5364_v21 }
 0x2bf   :  { %v3205_v17 = vadd.f32 %v6482_v31, %v2006_v41  ;;  %v3207_v27 = vadd.f32 %v6487_v20, %v2008_v14  ;;  %3224 = vst [vmem:[%s5660_s3 + $0x20] sm:$0xff] %v3203_v15  ;;  %v6489_v37 = vcombine.low %v5376_v10, %v5382_v59  ;;  %v6491_v5 = vcombine.low %v5414_v48, %v5419_v3 }
 0x2c0   :  { %v3206_v50 = vadd.f32 %v6485_v42, %v2007_v58  ;;  %v3208_v6 = vadd.f32 %v6488_v39, %v2009_v24  ;;  %v6490_v58 = vcombine.low %v5395_v61, %v5400_v16  ;;  %3225 = vst [vmem:[%s5660_s3 + $0x28] sm:$0xff] %v3204_v0  ;;  %v3162_v40 = vcombine.low %v3154_v13, %v3161_v32 }
 0x2c1   :  { %v3209_v41 = vadd.f32 %v6489_v37, %v2010_v2  ;;  %v3211_v51 = vadd.f32 %v6491_v5, %v2012_v57  ;;  %v3212_v43 = vadd.f32 %v2868_v33, %v2013_v8  ;;  %v3213_v21 = vadd.f32 %v2917_v11, %v2014_v1  ;;  %3226 = vst [vmem:[%s5660_s3 + $0x30] sm:$0xff] %v3205_v17 }
 0x2c2   :  { %v3210_v14 = vadd.f32 %v6490_v58, %v2011_v7  ;;  %v6492_v10 = vcombine.low %v5475_v18, %v5480_v54  ;;  %3227 = vst [vmem:[%s5660_s3 + $0x38] sm:$0xff] %v3206_v50  ;;  %3228 = vst [vmem:[%s5660_s3 + $0x40] sm:$0xff] %v3207_v27  ;;  %v6493_v61 = vcombine.low %v5494_v44, %v5499_v34  ;;  %v6494_v33 = vlaneseq }
 0x2c3   :  { %v3216_v48 = vadd.f32 %v3064_v46, %v2017_v52  ;;  %v3217_v3 = vadd.f32 %v3113_v38, %v2018_v62  ;;  %v3219_v12 = vadd.f32 %v3177_v60, %v2020_v49  ;;  %3229 = vst [vmem:[%s5660_s3 + $0x48] sm:$0xff] %v3208_v6  ;;  %3230 = vst [vmem:[%s5660_s3 + $0x50] sm:$0xff] %v3209_v41 }
 0x2c4   :  { %v3214_v59 = vadd.f32 %v6492_v10, %v2015_v25  ;;  %v3215_v16 = vadd.f32 %v6493_v61, %v2016_v28  ;;  %3231 = vst [vmem:[%s5660_s3 + $0x58] sm:$0xff] %v3210_v14  ;;  %3232 = vst [vmem:[%s5660_s3 + $0x60] sm:$0xff] %v3211_v51  ;;  %v3218_v26 = vadd.f32 %v3162_v40, %v2019_v30  ;;  %vm3242_vm3 = vcmp.lt.s32.totalorder %v6494_v33, 190 }
 0x2c5   :  { %3233 = vst [vmem:[%s5660_s3 + $0x68] sm:$0xff] %v3212_v43  ;;  %3234 = vst [vmem:[%s5660_s3 + $0x70] sm:$0xff] %v3213_v21 }
 0x2c6   :  { %3235 = vst [vmem:[%s5660_s3 + $0x78] sm:$0xff] %v3214_v59  ;;  %3236 = vst [vmem:[%s5660_s3 + $0x80] sm:$0xff] %v3215_v16 }
 0x2c7   :  { %3237 = vst [vmem:[%s5660_s3 + $0x88] sm:$0xff] %v3216_v48  ;;  %3238 = vst [vmem:[%s5660_s3 + $0x90] sm:$0xff] %v3217_v3 }
 0x2c8   :  { %3244 = vst.msk [vmem:[%s5660_s3 + $0xa0] sm:$0x3] %vm3242_vm3, %v3219_v12  ;;  %3239 = vst [vmem:[%s5660_s3 + $0x98] sm:$0xff] %v3218_v26 }
 0x2c9   :  { %3249 = vsyncpa [#allocation3], 1 }
 0x2ca   :  { %3250 = vsyncpa [#allocation5], 1 }

</bundles_post_ra>
